<compile_context>
chip_gen: v7x
topology: tpu7x:2x2x1
jax: 0.10.0
libtpu: 0.0.40
codegen_flags: <defaults>
</compile_context>

<pallas_src>
import functools

import jax
import jax.numpy as jnp
from jax.experimental import pallas as pl
from jax.experimental.pallas import tpu as pltpu


def _round_up(x, m):
    return ((x + m - 1) // m) * m


def _default_block_b():
    """256 on v6e/v7x (fills a 256-wide MXU); 128 on v5e (128x128 MXU)."""
    try:
        kind = jax.devices()[0].device_kind.lower()
    except Exception:
        return 256
    if "v5 lite" in kind or "v5lite" in kind or "v5e" in kind:
        return 128
    return 256


def _decoder_kernel(x_ref, w1_ref, b1_ref, w2_ref, b2_ref, w3_ref, b3_ref,
                    o_ref):
    """Fused fc1 -> lrelu -> fc2 -> lrelu -> fc3 -> lrelu for one batch tile."""

    def lrelu(v):
        # LeakyReLU(negative_slope=0.01), evaluated in f32.
        return jnp.where(v > 0, v, 0.01 * v)

    mxu_dtype = w1_ref.dtype  # bf16 weights -> bf16 MXU inputs, f32 accumulate.

    x = x_ref[...].astype(mxu_dtype)
    # Bias folded into the accumulator init; accumulate in f32 on the MXU.
    y = b1_ref[...] + jnp.dot(x, w1_ref[...], preferred_element_type=jnp.float32)
    y = lrelu(y)
    y = b2_ref[...] + jnp.dot(y.astype(mxu_dtype), w2_ref[...],
                              preferred_element_type=jnp.float32)
    y = lrelu(y)
    y = b3_ref[...] + jnp.dot(y.astype(mxu_dtype), w3_ref[...],
                              preferred_element_type=jnp.float32)
    o_ref[...] = lrelu(y).astype(o_ref.dtype)


def _build_call(B, D, D1, D2, D3, block_b, x_dtype, w_dtype, out_dtype,
                single_buffer_weights):
    grid = (B // block_b,)

    # Weights/biases have a constant block index -> resident across the grid;
    # single-buffer them so they do not get a useless second VMEM copy.
    w_kwargs = dict(pipeline_mode=pl.Buffered(1)) if single_buffer_weights else {}

    in_specs = [
        pl.BlockSpec((block_b, D), lambda i: (i, 0)),          # x tile
        pl.BlockSpec((D, D1), lambda i: (0, 0), **w_kwargs),   # w1
        pl.BlockSpec((1, D1), lambda i: (0, 0), **w_kwargs),   # b1
        pl.BlockSpec((D1, D2), lambda i: (0, 0), **w_kwargs),  # w2
        pl.BlockSpec((1, D2), lambda i: (0, 0), **w_kwargs),   # b2
        pl.BlockSpec((D2, D3), lambda i: (0, 0), **w_kwargs),  # w3
        pl.BlockSpec((1, D3), lambda i: (0, 0), **w_kwargs),   # b3
    ]
    out_spec = pl.BlockSpec((block_b, D3), lambda i: (i, 0))

    w_bytes = jnp.dtype(w_dtype).itemsize
    x_bytes = jnp.dtype(x_dtype).itemsize
    o_bytes = jnp.dtype(out_dtype).itemsize
    weight_elems = D * D1 + D1 * D2 + D2 * D3
    bias_elems = D1 + D2 + D3

    # Conservative VMEM budget (assume double-buffering everywhere plus f32
    # intermediates), clamped to the smallest physical VMEM (v7x: 64 MiB).
    vmem_need = (2 * weight_elems * w_bytes
                 + 2 * bias_elems * 4
                 + 2 * block_b * (D * x_bytes + D3 * o_bytes)
                 + 4 * block_b * (D1 + D2 + D3))
    vmem_limit = int(min(max(int(vmem_need * 1.25) + (4 << 20), 32 << 20),
                         64 << 20))

    cost = pl.CostEstimate(
        flops=2 * B * weight_elems,
        transcendentals=0,
        bytes_accessed=(B * D * x_bytes + B * D3 * o_bytes
                        + weight_elems * w_bytes + bias_elems * 4),
    )

    return pl.pallas_call(
        _decoder_kernel,
        out_shape=jax.ShapeDtypeStruct((B, D3), out_dtype),
        grid_spec=pltpu.PrefetchScalarGridSpec(
            num_scalar_prefetch=0,
            grid=grid,
            in_specs=in_specs,
            out_specs=out_spec,
        ),
        compiler_params=pltpu.CompilerParams(
            dimension_semantics=("parallel",),
            vmem_limit_bytes=vmem_limit,
        ),
        cost_estimate=cost,
    )


@functools.partial(jax.jit, static_argnames=("block_b", "single_buffer_weights"))
def decoder_forward(x, w1, b1, w2, b2, w3, b3, *, block_b=256,
                    single_buffer_weights=True):
    """x: (B, D) -> (B, 8*D). Weights are (in, out) (transposed vs PyTorch)."""
    B, D = x.shape
    D1, D2, D3 = w1.shape[1], w2.shape[1], w3.shape[1]
    out_dtype = x.dtype

    # Batch tile: big enough to fill the MXU M dim, multiple of 8 sublanes,
    # never larger than the (padded) batch itself.
    bb = max(8, min(block_b, _round_up(B, 8)))
    bb = _round_up(bb, 8)
    Bp = _round_up(B, bb)
    xp = jnp.pad(x, ((0, Bp - B), (0, 0))) if Bp != B else x

    call = _build_call(Bp, D, D1, D2, D3, bb, x.dtype, w1.dtype, out_dtype,
                       single_buffer_weights)
    out = call(xp, w1, b1, w2, b2, w3, b3)
    return out[:B] if Bp != B else out


def init_decoder_params(key, latent_size):
    """nn.Linear + xavier_uniform_ weights (returned as (in, out)), zero bias."""
    dims = [latent_size, latent_size * 2, latent_size * 4, latent_size * 8]
    params = []
    for i in range(3):
        fan_in, fan_out = dims[i], dims[i + 1]
        key, sub = jax.random.split(key)
        bound = (6.0 / (fan_in + fan_out)) ** 0.5
        w = jax.random.uniform(sub, (fan_in, fan_out), dtype=jnp.float32,
                               minval=-bound, maxval=bound)
        b = jnp.zeros((1, fan_out), dtype=jnp.float32)
        params.extend([w, b])
    return params


if __name__ == "__main__":
    latent_size = 128   # small, but keeps every matmul dim a multiple of 128
    batch = 16

    key = jax.random.PRNGKey(0)
    key, xkey = jax.random.split(key)
    x = jax.random.normal(xkey, (batch, latent_size), dtype=jnp.float32)

    w1, b1, w2, b2, w3, b3 = init_decoder_params(key, latent_size)
    # Cast weights once (outside jit) to bf16: the kernel is weight-bandwidth
    # bound for realistic batches; biases and accumulation stay f32.
    w1, w2, w3 = (w.astype(jnp.bfloat16) for w in (w1, w2, w3))

    block_b = _default_block_b()
    try:
        out = decoder_forward(x, w1, b1, w2, b2, w3, b3, block_b=block_b,
                              single_buffer_weights=True)
        out = jax.block_until_ready(out)
    except Exception:
        # Fallback if this JAX build rejects pl.Buffered(1) on resident blocks.
        out = decoder_forward(x, w1, b1, w2, b2, w3, b3, block_b=block_b,
                              single_buffer_weights=False)
        out = jax.block_until_ready(out)

    # Reference in plain JAX with identical bf16-weight / f32-accumulate math.
    def lrelu(v):
        return jnp.where(v > 0, v, 0.01 * v)

    def ref_layer(v, w, b):
        return lrelu(jnp.dot(v.astype(w.dtype), w,
                             preferred_element_type=jnp.float32) + b)

    ref = ref_layer(ref_layer(ref_layer(x, w1, b1), w2, b2), w3, b3)

    assert out.shape == (batch, latent_size * 8)
    assert jnp.allclose(out, ref, atol=2e-2, rtol=2e-2), \
        float(jnp.max(jnp.abs(out - ref)))

    print("KERNEL_OK")
</pallas_src>

<mosaic_0001>
module attributes {stable_mosaic.version = 11 : i64} {
  func.func @_decoder_kernel(%arg0: i32, %arg1: memref<16x128xf32, #tpu.memory_space<vmem>>, %arg2: memref<128x256xbf16, #tpu.memory_space<vmem>>, %arg3: memref<1x256xf32, #tpu.memory_space<vmem>>, %arg4: memref<256x512xbf16, #tpu.memory_space<vmem>>, %arg5: memref<1x512xf32, #tpu.memory_space<vmem>>, %arg6: memref<512x1024xbf16, #tpu.memory_space<vmem>>, %arg7: memref<1x1024xf32, #tpu.memory_space<vmem>>, %arg8: memref<16x1024xf32, #tpu.memory_space<vmem>>) attributes {dimension_semantics = [#tpu.dimension_semantics<parallel>], iteration_bounds = array<i64: 1>, scalar_prefetch = 0 : i64, scratch_operands = 0 : i64, tpu.core_type = #tpu.core_type<tc>, window_params = [{transform_indices = @transform_0, window_bounds = array<i64: 16, 128>}, {pipeline_mode = #tpu.pipeline_mode<synchronous>, transform_indices = @transform_1, window_bounds = array<i64: 128, 256>}, {pipeline_mode = #tpu.pipeline_mode<synchronous>, transform_indices = @transform_2, window_bounds = array<i64: 1, 256>}, {pipeline_mode = #tpu.pipeline_mode<synchronous>, transform_indices = @transform_3, window_bounds = array<i64: 256, 512>}, {pipeline_mode = #tpu.pipeline_mode<synchronous>, transform_indices = @transform_4, window_bounds = array<i64: 1, 512>}, {pipeline_mode = #tpu.pipeline_mode<synchronous>, transform_indices = @transform_5, window_bounds = array<i64: 512, 1024>}, {pipeline_mode = #tpu.pipeline_mode<synchronous>, transform_indices = @transform_6, window_bounds = array<i64: 1, 1024>}, {transform_indices = @transform_7, window_bounds = array<i64: 16, 1024>}]} {
    %c0 = arith.constant 0 : index
    %c0_0 = arith.constant 0 : index
    %0 = vector.load %arg1[%c0, %c0_0] : memref<16x128xf32, #tpu.memory_space<vmem>>, vector<16x128xf32>
    %1 = arith.truncf %0 : vector<16x128xf32> to vector<16x128xbf16>
    %c0_1 = arith.constant 0 : index
    %c0_2 = arith.constant 0 : index
    %2 = vector.load %arg3[%c0_1, %c0_2] : memref<1x256xf32, #tpu.memory_space<vmem>>, vector<1x256xf32>
    %c0_3 = arith.constant 0 : index
    %c0_4 = arith.constant 0 : index
    %3 = vector.load %arg2[%c0_3, %c0_4] : memref<128x256xbf16, #tpu.memory_space<vmem>>, vector<128x256xbf16>
    %cst = arith.constant dense<0.000000e+00> : vector<16x256xf32>
    %4 = tpu.matmul %1, %3, %cst {dimension_numbers = #tpu.dot_dimension_numbers<[1], [0], [0], [1], [0, 0, 1, 1], [], []>} : vector<16x128xbf16>, vector<128x256xbf16>, vector<16x256xf32> -> vector<16x256xf32>
    %5 = vector.broadcast %2 : vector<1x256xf32> to vector<16x256xf32>
    %6 = arith.addf %5, %4 : vector<16x256xf32>
    %cst_5 = arith.constant 0.000000e+00 : f32
    %7 = vector.broadcast %cst_5 : f32 to vector<16x256xf32>
    %8 = arith.cmpf ogt, %6, %7 : vector<16x256xf32>
    %cst_6 = arith.constant 0.00999999977 : f32
    %9 = vector.broadcast %cst_6 : f32 to vector<16x256xf32>
    %10 = arith.mulf %9, %6 : vector<16x256xf32>
    %11 = arith.select %8, %6, %10 : vector<16x256xi1>, vector<16x256xf32>
    %c0_7 = arith.constant 0 : index
    %c0_8 = arith.constant 0 : index
    %12 = vector.load %arg5[%c0_7, %c0_8] : memref<1x512xf32, #tpu.memory_space<vmem>>, vector<1x512xf32>
    %13 = arith.truncf %11 : vector<16x256xf32> to vector<16x256xbf16>
    %c0_9 = arith.constant 0 : index
    %c0_10 = arith.constant 0 : index
    %14 = vector.load %arg4[%c0_9, %c0_10] : memref<256x512xbf16, #tpu.memory_space<vmem>>, vector<256x512xbf16>
    %cst_11 = arith.constant dense<0.000000e+00> : vector<16x512xf32>
    %15 = tpu.matmul %13, %14, %cst_11 {dimension_numbers = #tpu.dot_dimension_numbers<[1], [0], [0], [1], [0, 0, 1, 1], [], []>} : vector<16x256xbf16>, vector<256x512xbf16>, vector<16x512xf32> -> vector<16x512xf32>
    %16 = vector.broadcast %12 : vector<1x512xf32> to vector<16x512xf32>
    %17 = arith.addf %16, %15 : vector<16x512xf32>
    %cst_12 = arith.constant 0.000000e+00 : f32
    %18 = vector.broadcast %cst_12 : f32 to vector<16x512xf32>
    %19 = arith.cmpf ogt, %17, %18 : vector<16x512xf32>
    %cst_13 = arith.constant 0.00999999977 : f32
    %20 = vector.broadcast %cst_13 : f32 to vector<16x512xf32>
    %21 = arith.mulf %20, %17 : vector<16x512xf32>
    %22 = arith.select %19, %17, %21 : vector<16x512xi1>, vector<16x512xf32>
    %c0_14 = arith.constant 0 : index
    %c0_15 = arith.constant 0 : index
    %23 = vector.load %arg7[%c0_14, %c0_15] : memref<1x1024xf32, #tpu.memory_space<vmem>>, vector<1x1024xf32>
    %24 = arith.truncf %22 : vector<16x512xf32> to vector<16x512xbf16>
    %c0_16 = arith.constant 0 : index
    %c0_17 = arith.constant 0 : index
    %25 = vector.load %arg6[%c0_16, %c0_17] : memref<512x1024xbf16, #tpu.memory_space<vmem>>, vector<512x1024xbf16>
    %cst_18 = arith.constant dense<0.000000e+00> : vector<16x1024xf32>
    %26 = tpu.matmul %24, %25, %cst_18 {dimension_numbers = #tpu.dot_dimension_numbers<[1], [0], [0], [1], [0, 0, 1, 1], [], []>} : vector<16x512xbf16>, vector<512x1024xbf16>, vector<16x1024xf32> -> vector<16x1024xf32>
    %27 = vector.broadcast %23 : vector<1x1024xf32> to vector<16x1024xf32>
    %28 = arith.addf %27, %26 : vector<16x1024xf32>
    %cst_19 = arith.constant 0.000000e+00 : f32
    %29 = vector.broadcast %cst_19 : f32 to vector<16x1024xf32>
    %30 = arith.cmpf ogt, %28, %29 : vector<16x1024xf32>
    %cst_20 = arith.constant 0.00999999977 : f32
    %31 = vector.broadcast %cst_20 : f32 to vector<16x1024xf32>
    %32 = arith.mulf %31, %28 : vector<16x1024xf32>
    %33 = arith.select %30, %28, %32 : vector<16x1024xi1>, vector<16x1024xf32>
    %c0_21 = arith.constant 0 : index
    %c0_22 = arith.constant 0 : index
    %34 = vector.load %arg8[%c0_21, %c0_22] : memref<16x1024xf32, #tpu.memory_space<vmem>>, vector<16x1024xf32>
    tpu.vector_store %arg8[%c0_21, %c0_22], %33 {strides = array<i32>} : memref<16x1024xf32, #tpu.memory_space<vmem>>, vector<16x1024xf32>,
    return
  }
  func.func @transform_0(%arg0: i32) -> (i32, i32) {
    %c0_i32 = arith.constant 0 : i32
    %c0_i32_0 = arith.constant 0 : i32
    return %arg0, %c0_i32 : i32, i32
  }
  func.func @transform_1(%arg0: i32) -> (i32, i32) {
    %c0_i32 = arith.constant 0 : i32
    %c0_i32_0 = arith.constant 0 : i32
    %c0_i32_1 = arith.constant 0 : i32
    return %c0_i32, %c0_i32_0 : i32, i32
  }
  func.func @transform_2(%arg0: i32) -> (i32, i32) {
    %c0_i32 = arith.constant 0 : i32
    %c0_i32_0 = arith.constant 0 : i32
    %c0_i32_1 = arith.constant 0 : i32
    return %c0_i32, %c0_i32_0 : i32, i32
  }
  func.func @transform_3(%arg0: i32) -> (i32, i32) {
    %c0_i32 = arith.constant 0 : i32
    %c0_i32_0 = arith.constant 0 : i32
    %c0_i32_1 = arith.constant 0 : i32
    return %c0_i32, %c0_i32_0 : i32, i32
  }
  func.func @transform_4(%arg0: i32) -> (i32, i32) {
    %c0_i32 = arith.constant 0 : i32
    %c0_i32_0 = arith.constant 0 : i32
    %c0_i32_1 = arith.constant 0 : i32
    return %c0_i32, %c0_i32_0 : i32, i32
  }
  func.func @transform_5(%arg0: i32) -> (i32, i32) {
    %c0_i32 = arith.constant 0 : i32
    %c0_i32_0 = arith.constant 0 : i32
    %c0_i32_1 = arith.constant 0 : i32
    return %c0_i32, %c0_i32_0 : i32, i32
  }
  func.func @transform_6(%arg0: i32) -> (i32, i32) {
    %c0_i32 = arith.constant 0 : i32
    %c0_i32_0 = arith.constant 0 : i32
    %c0_i32_1 = arith.constant 0 : i32
    return %c0_i32, %c0_i32_0 : i32, i32
  }
  func.func @transform_7(%arg0: i32) -> (i32, i32) {
    %c0_i32 = arith.constant 0 : i32
    %c0_i32_0 = arith.constant 0 : i32
    return %arg0, %c0_i32 : i32, i32
  }
}

module attributes {stable_mosaic.version = 11 : i64} {
  func.func @_decoder_kernel(%arg0: i32, %arg1: memref<16x128xf32, #tpu.memory_space<vmem>>, %arg2: memref<128x256xbf16, #tpu.memory_space<vmem>>, %arg3: memref<1x256xf32, #tpu.memory_space<vmem>>, %arg4: memref<256x512xbf16, #tpu.memory_space<vmem>>, %arg5: memref<1x512xf32, #tpu.memory_space<vmem>>, %arg6: memref<512x1024xbf16, #tpu.memory_space<vmem>>, %arg7: memref<1x1024xf32, #tpu.memory_space<vmem>>, %arg8: memref<16x1024xf32, #tpu.memory_space<vmem>>) attributes {dimension_semantics = [#tpu.dimension_semantics<parallel>], iteration_bounds = array<i64: 1>, scalar_prefetch = 0 : i64, scratch_operands = 0 : i64, tpu.core_type = #tpu.core_type<tc>, window_params = [{transform_indices = @transform_0, window_bounds = array<i64: 16, 128>}, {pipeline_mode = #tpu.pipeline_mode<synchronous>, transform_indices = @transform_1, window_bounds = array<i64: 128, 256>}, {pipeline_mode = #tpu.pipeline_mode<synchronous>, transform_indices = @transform_2, window_bounds = array<i64: 1, 256>}, {pipeline_mode = #tpu.pipeline_mode<synchronous>, transform_indices = @transform_3, window_bounds = array<i64: 256, 512>}, {pipeline_mode = #tpu.pipeline_mode<synchronous>, transform_indices = @transform_4, window_bounds = array<i64: 1, 512>}, {pipeline_mode = #tpu.pipeline_mode<synchronous>, transform_indices = @transform_5, window_bounds = array<i64: 512, 1024>}, {pipeline_mode = #tpu.pipeline_mode<synchronous>, transform_indices = @transform_6, window_bounds = array<i64: 1, 1024>}, {transform_indices = @transform_7, window_bounds = array<i64: 16, 1024>}]} {
    %c0 = arith.constant 0 : index
    %c0_0 = arith.constant 0 : index
    %0 = vector.load %arg1[%c0, %c0_0] : memref<16x128xf32, #tpu.memory_space<vmem>>, vector<16x128xf32>
    %1 = arith.truncf %0 : vector<16x128xf32> to vector<16x128xbf16>
    %c0_1 = arith.constant 0 : index
    %c0_2 = arith.constant 0 : index
    %2 = vector.load %arg3[%c0_1, %c0_2] : memref<1x256xf32, #tpu.memory_space<vmem>>, vector<1x256xf32>
    %c0_3 = arith.constant 0 : index
    %c0_4 = arith.constant 0 : index
    %3 = vector.load %arg2[%c0_3, %c0_4] : memref<128x256xbf16, #tpu.memory_space<vmem>>, vector<128x256xbf16>
    %cst = arith.constant dense<0.000000e+00> : vector<16x256xf32>
    %4 = tpu.matmul %1, %3, %cst {dimension_numbers = #tpu.dot_dimension_numbers<[1], [0], [0], [1], [0, 0, 1, 1], [], []>} : vector<16x128xbf16>, vector<128x256xbf16>, vector<16x256xf32> -> vector<16x256xf32>
    %5 = vector.broadcast %2 : vector<1x256xf32> to vector<16x256xf32>
    %6 = arith.addf %5, %4 : vector<16x256xf32>
    %cst_5 = arith.constant 0.000000e+00 : f32
    %7 = vector.broadcast %cst_5 : f32 to vector<16x256xf32>
    %8 = arith.cmpf ogt, %6, %7 : vector<16x256xf32>
    %cst_6 = arith.constant 0.00999999977 : f32
    %9 = vector.broadcast %cst_6 : f32 to vector<16x256xf32>
    %10 = arith.mulf %9, %6 : vector<16x256xf32>
    %11 = arith.select %8, %6, %10 : vector<16x256xi1>, vector<16x256xf32>
    %c0_7 = arith.constant 0 : index
    %c0_8 = arith.constant 0 : index
    %12 = vector.load %arg5[%c0_7, %c0_8] : memref<1x512xf32, #tpu.memory_space<vmem>>, vector<1x512xf32>
    %13 = arith.truncf %11 : vector<16x256xf32> to vector<16x256xbf16>
    %c0_9 = arith.constant 0 : index
    %c0_10 = arith.constant 0 : index
    %14 = vector.load %arg4[%c0_9, %c0_10] : memref<256x512xbf16, #tpu.memory_space<vmem>>, vector<256x512xbf16>
    %cst_11 = arith.constant dense<0.000000e+00> : vector<16x512xf32>
    %15 = tpu.matmul %13, %14, %cst_11 {dimension_numbers = #tpu.dot_dimension_numbers<[1], [0], [0], [1], [0, 0, 1, 1], [], []>} : vector<16x256xbf16>, vector<256x512xbf16>, vector<16x512xf32> -> vector<16x512xf32>
    %16 = vector.broadcast %12 : vector<1x512xf32> to vector<16x512xf32>
    %17 = arith.addf %16, %15 : vector<16x512xf32>
    %cst_12 = arith.constant 0.000000e+00 : f32
    %18 = vector.broadcast %cst_12 : f32 to vector<16x512xf32>
    %19 = arith.cmpf ogt, %17, %18 : vector<16x512xf32>
    %cst_13 = arith.constant 0.00999999977 : f32
    %20 = vector.broadcast %cst_13 : f32 to vector<16x512xf32>
    %21 = arith.mulf %20, %17 : vector<16x512xf32>
    %22 = arith.select %19, %17, %21 : vector<16x512xi1>, vector<16x512xf32>
    %c0_14 = arith.constant 0 : index
    %c0_15 = arith.constant 0 : index
    %23 = vector.load %arg7[%c0_14, %c0_15] : memref<1x1024xf32, #tpu.memory_space<vmem>>, vector<1x1024xf32>
    %24 = arith.truncf %22 : vector<16x512xf32> to vector<16x512xbf16>
    %c0_16 = arith.constant 0 : index
    %c0_17 = arith.constant 0 : index
    %25 = vector.load %arg6[%c0_16, %c0_17] : memref<512x1024xbf16, #tpu.memory_space<vmem>>, vector<512x1024xbf16>
    %cst_18 = arith.constant dense<0.000000e+00> : vector<16x1024xf32>
    %26 = tpu.matmul %24, %25, %cst_18 {dimension_numbers = #tpu.dot_dimension_numbers<[1], [0], [0], [1], [0, 0, 1, 1], [], []>} : vector<16x512xbf16>, vector<512x1024xbf16>, vector<16x1024xf32> -> vector<16x1024xf32>
    %27 = vector.broadcast %23 : vector<1x1024xf32> to vector<16x1024xf32>
    %28 = arith.addf %27, %26 : vector<16x1024xf32>
    %cst_19 = arith.constant 0.000000e+00 : f32
    %29 = vector.broadcast %cst_19 : f32 to vector<16x1024xf32>
    %30 = arith.cmpf ogt, %28, %29 : vector<16x1024xf32>
    %cst_20 = arith.constant 0.00999999977 : f32
    %31 = vector.broadcast %cst_20 : f32 to vector<16x1024xf32>
    %32 = arith.mulf %31, %28 : vector<16x1024xf32>
    %33 = arith.select %30, %28, %32 : vector<16x1024xi1>, vector<16x1024xf32>
    %c0_21 = arith.constant 0 : index
    %c0_22 = arith.constant 0 : index
    %34 = vector.load %arg8[%c0_21, %c0_22] : memref<16x1024xf32, #tpu.memory_space<vmem>>, vector<16x1024xf32>
    tpu.vector_store %arg8[%c0_21, %c0_22], %33 {strides = array<i32>} : memref<16x1024xf32, #tpu.memory_space<vmem>>, vector<16x1024xf32>,
    return
  }
  func.func @transform_0(%arg0: i32) -> (i32, i32) {
    %c0_i32 = arith.constant 0 : i32
    %c0_i32_0 = arith.constant 0 : i32
    return %arg0, %c0_i32 : i32, i32
  }
  func.func @transform_1(%arg0: i32) -> (i32, i32) {
    %c0_i32 = arith.constant 0 : i32
    %c0_i32_0 = arith.constant 0 : i32
    %c0_i32_1 = arith.constant 0 : i32
    return %c0_i32, %c0_i32_0 : i32, i32
  }
  func.func @transform_2(%arg0: i32) -> (i32, i32) {
    %c0_i32 = arith.constant 0 : i32
    %c0_i32_0 = arith.constant 0 : i32
    %c0_i32_1 = arith.constant 0 : i32
    return %c0_i32, %c0_i32_0 : i32, i32
  }
  func.func @transform_3(%arg0: i32) -> (i32, i32) {
    %c0_i32 = arith.constant 0 : i32
    %c0_i32_0 = arith.constant 0 : i32
    %c0_i32_1 = arith.constant 0 : i32
    return %c0_i32, %c0_i32_0 : i32, i32
  }
  func.func @transform_4(%arg0: i32) -> (i32, i32) {
    %c0_i32 = arith.constant 0 : i32
    %c0_i32_0 = arith.constant 0 : i32
    %c0_i32_1 = arith.constant 0 : i32
    return %c0_i32, %c0_i32_0 : i32, i32
  }
  func.func @transform_5(%arg0: i32) -> (i32, i32) {
    %c0_i32 = arith.constant 0 : i32
    %c0_i32_0 = arith.constant 0 : i32
    %c0_i32_1 = arith.constant 0 : i32
    return %c0_i32, %c0_i32_0 : i32, i32
  }
  func.func @transform_6(%arg0: i32) -> (i32, i32) {
    %c0_i32 = arith.constant 0 : i32
    %c0_i32_0 = arith.constant 0 : i32
    %c0_i32_1 = arith.constant 0 : i32
    return %c0_i32, %c0_i32_0 : i32, i32
  }
  func.func @transform_7(%arg0: i32) -> (i32, i32) {
    %c0_i32 = arith.constant 0 : i32
    %c0_i32_0 = arith.constant 0 : i32
    return %arg0, %c0_i32 : i32, i32
  }
}

</mosaic_0001>

<bundles_post_ra>
// kernel: decoder_forward.1
= control target key start
LH: loop header
LB: loop body
LE: loop exit
PB: predicated region body
PF: predicated region fallthrough
CT: control target
= control target key end

     0   :  { %12 = vsyncpa [#allocation3], 0  ;;  %s3614_s0 = inlined_call_operand.hbm [shape: f32[16,128], index: 0, kind: input, shape index: {}]   ;;  %s3615_s1 = inlined_call_operand.hbm [shape: bf16[128,256], index: 1, kind: input, shape index: {}]   ;;  %s3616_s2 = inlined_call_operand.vmem [shape: f32[1,256], index: 2, kind: input, shape index: {}]   ;;  %s3617_s3 = inlined_call_operand.hbm [shape: bf16[256,512], index: 3, kind: input, shape index: {}]   ;;  %s3618_s4 = inlined_call_operand.vmem [shape: f32[1,512], index: 4, kind: input, shape index: {}]   ;;  %s3619_s5 = inlined_call_operand.hbm [shape: bf16[512,1024], index: 5, kind: input, shape index: {}]   ;;  %s3620_s6 = inlined_call_operand.vmem [shape: f32[1,1024], index: 6, kind: input, shape index: {}]   ;;  %s3621_s7 = inlined_call_operand.hbm [shape: f32[16,1024], index: 7, kind: output, shape index: {}]  }
   0x1   :  { %13 = vsyncpa [#allocation6], 0 }
   0x2   :  { %14 = vsyncpa [#allocation9], 0 }
   0x3   :  { %15 = vsyncpa [#allocation4], 0  ;;  %s3408_s24 = smov [#allocation5]   ;;  %s3409_s26 = smov [#allocation2]  }
   0x4   :  { %s33_s25 = sshll.u32 %s3408_s24, 4  ;;  %s21_s27 = sshll.u32 %s3409_s26, 4  ;;  %s34_s25 = int_to_ptr.vmem [resolvable:$true] %s33_s25  ;;  %s3462_s27 = int_to_ptr.vmem [resolvable:$true] %s21_s27 }
   0x5   :  { %s3290_s30 = scalar_lea.hbm %s3615_s1, 2048 }
   0x6   :  { %p3291_p0 = scmp.ne.s32.totalorder %s3615_s1, %s3290_s30  ;;  %p3294_p1 = scmp.lt.u32.totalorder %s3290_s30, %s3615_s1 }
   0x8   :  { %p3296_p2 = pnand %p3294_p1, %p3291_p0 }
   0xa   :  { %3299 = shalt.err (!%p3296_p2)
}
   0xb   :  { %s3300_s12 = scalar_lea.vmem %s34_s25, 2048  ;;  %p3305_p4 = scmp.lt.s32.totalorder %s34_s25, %s34_s25 }
   0xc   :  { %p3301_p3 = scmp.ne.s32.totalorder %s34_s25, %s3300_s12  ;;  %p3306_p5 = scmp.lt.s32.totalorder %s3300_s12, %s3300_s12 }
   0xe   :  { %p3307_p6 = por %p3306_p5, %p3305_p4 }
  0x10   :  { %p3308_p7 = pnand %p3307_p6, %p3301_p3 }
  0x12   :  { %3311 = shalt.err (!%p3308_p7)
}
  0x13   :  { %s3410_s13 = smov 128   ;;  %s3411_s14 = smov 8  }
  0x14   :  { %39 = dma.hbm_to_vmem [thread:$0]  %s3615_s1, 2048, %s34_s25, [#allocation6], %s3410_s13, %s3410_s13, %s3411_s14  }
  0x15   :  { %s3312_s19 = scalar_lea.hbm %s3614_s0, 256 }
  0x16   :  { %p3313_p8 = scmp.ne.s32.totalorder %s3614_s0, %s3312_s19  ;;  %p3316_p9 = scmp.lt.u32.totalorder %s3312_s19, %s3614_s0 }
  0x18   :  { %p3318_p10 = pnand %p3316_p9, %p3313_p8 }
  0x1a   :  { %3321 = shalt.err (!%p3318_p10)
}
  0x1b   :  { %s3322_s24 = scalar_lea.vmem %s3462_s27, 256  ;;  %p3327_p12 = scmp.lt.s32.totalorder %s3462_s27, %s3462_s27 }
  0x1c   :  { %p3323_p11 = scmp.ne.s32.totalorder %s3462_s27, %s3322_s24  ;;  %p3328_p13 = scmp.lt.s32.totalorder %s3322_s24, %s3322_s24 }
  0x1e   :  { %p3329_p0 = por %p3328_p13, %p3327_p12 }
  0x20   :  { %p3330_p1 = pnand %p3329_p0, %p3323_p11 }
  0x22   :  { %3333 = shalt.err (!%p3330_p1)
}
  0x23   :  { %27 = dma.hbm_to_vmem [thread:$0]  %s3614_s0, 256, %s3462_s27, [#allocation3], %s3410_s13, %s3410_s13, %s3411_s14  }
  0x24   :  { %s3412_s26 = smov [#allocation7]   ;;  %s3334_s8 = scalar_lea.hbm %s3617_s3, 8192 }
  0x25   :  { %s47_s28 = sshll.u32 %s3412_s26, 4  ;;  %p3335_p2 = scmp.ne.s32.totalorder %s3617_s3, %s3334_s8  ;;  %s48_s28 = int_to_ptr.vmem [resolvable:$true] %s47_s28 }
  0x26   :  { %p3338_p3 = scmp.lt.u32.totalorder %s3334_s8, %s3617_s3 }
  0x28   :  { %p3340_p4 = pnand %p3338_p3, %p3335_p2 }
  0x2a   :  { %3343 = shalt.err (!%p3340_p4)
}
  0x2b   :  { %s3344_s15 = scalar_lea.vmem %s48_s28, 8192  ;;  %p3349_p6 = scmp.lt.s32.totalorder %s48_s28, %s48_s28 }
  0x2c   :  { %p3345_p5 = scmp.ne.s32.totalorder %s48_s28, %s3344_s15  ;;  %p3350_p7 = scmp.lt.s32.totalorder %s3344_s15, %s3344_s15 }
  0x2e   :  { %p3351_p8 = por %p3350_p7, %p3349_p6 }
  0x30   :  { %p3352_p9 = pnand %p3351_p8, %p3345_p5 }
  0x32   :  { %3355 = shalt.err (!%p3352_p9)
}
  0x33   :  { %s3413_s0 = smov 256   ;;  %s3414_s27 = smov 16  }
  0x34   :  { %53 = dma.hbm_to_vmem [thread:$0]  %s3617_s3, 8192, %s48_s28, [#allocation6], %s3413_s0, %s3413_s0, %s3414_s27  }
  0x35   :  { %s3415_s16 = smov [#allocation8]   ;;  %s3356_s20 = scalar_lea.hbm %s3619_s5, 32768 }
  0x36   :  { %s61_s17 = sshll.u32 %s3415_s16, 4  ;;  %p3357_p10 = scmp.ne.s32.totalorder %s3619_s5, %s3356_s20  ;;  %s62_s17 = int_to_ptr.vmem [resolvable:$true] %s61_s17 }
  0x37   :  { %p3360_p11 = scmp.lt.u32.totalorder %s3356_s20, %s3619_s5 }
  0x39   :  { %p3362_p12 = pnand %p3360_p11, %p3357_p10 }
  0x3b   :  { %3365 = shalt.err (!%p3362_p12)
}
  0x3c   :  { %s3366_s1 = scalar_lea.vmem %s62_s17, 32768  ;;  %p3371_p0 = scmp.lt.s32.totalorder %s62_s17, %s62_s17 }
  0x3d   :  { %p3367_p13 = scmp.ne.s32.totalorder %s62_s17, %s3366_s1  ;;  %p3372_p1 = scmp.lt.s32.totalorder %s3366_s1, %s3366_s1 }
  0x3f   :  { %p3373_p2 = por %p3372_p1, %p3371_p0 }
  0x41   :  { %p3374_p3 = pnand %p3373_p2, %p3367_p13 }
  0x43   :  { %3377 = shalt.err (!%p3374_p3)
}
  0x44   :  { %s3416_s3 = smov 512   ;;  %s3417_s25 = smov 32  }
  0x45   :  { %67 = dma.hbm_to_vmem [thread:$0]  %s3619_s5, 32768, %s62_s17, [#allocation9], %s3416_s3, %s3416_s3, %s3417_s25  }
  0x46   :  { %3400 = dma.done.wait [#allocation3], 256  }
  0x47   :  { %3401 = vsyncadd [#allocation3], 4294967040 }
  0x48   :  { %3402 = dma.done.wait [#allocation6], 10240  }
  0x49   :  { %3403 = vsyncadd [#allocation6], 4294957056 }
  0x4a   :  { %3404 = dma.done.wait [#allocation9], 32768  }
  0x4b   :  { %3405 = vsyncadd [#allocation9], 4294934528  ;;  %v3418_v0 = vmov 0   ;;  %v3170_v1 = vld [vmem:[#allocation5 + $0x4] ss:$8 sps:$4 sm:$0xff]   ;;  %v83_v26 = vld [vmem:[#allocation2] sm:$0xff] }
  0x4c   :  { %215 = vmatprep.mubr.bf16.mxu0 %v3418_v0  ;;  %v3172_v2 = vld [vmem:[#allocation5] ss:$8 sps:$4 sm:$0xff]   ;;  %183 = vmatprep.subr.bf16.mxu0 %v3170_v1  ;;  %v3173_v3 = vld [vmem:[#allocation5 + $0x14] ss:$8 sps:$4 sm:$0xff]   ;;  %v3175_v4 = vld [vmem:[#allocation5 + $0x10] ss:$8 sps:$4 sm:$0xff]  }
  0x4d   :  { %184 = vmatpush1.bf16.msra.mxu0 %v3172_v2  ;;  %v3176_v5 = vld [vmem:[#allocation5 + $0x24] ss:$8 sps:$4 sm:$0xff]   ;;  %v3178_v6 = vld [vmem:[#allocation5 + $0x20] ss:$8 sps:$4 sm:$0xff]   ;;  %v3179_v7 = vld [vmem:[#allocation5 + $0x34] ss:$8 sps:$4 sm:$0xff]  }
  0x4e   :  { %185 = vmatprep.subr.bf16.mxu0 %v3173_v3  ;;  %v3181_v8 = vld [vmem:[#allocation5 + $0x30] ss:$8 sps:$4 sm:$0xff]   ;;  %v3182_v9 = vld [vmem:[#allocation5 + $0x44] ss:$8 sps:$4 sm:$0xff]   ;;  %v3184_v13 = vld [vmem:[#allocation5 + $0x40] ss:$8 sps:$4 sm:$0xff]  }
  0x4f   :  { %v3194_v10 = vld [vmem:[#allocation7 + $0x4] ss:$16 sps:$4 sm:$0xff]   ;;  %v3199_v11 = vld [vmem:[#allocation7] ss:$16 sps:$4 sm:$0xff]   ;;  %v84_v27 = vld [vmem:[#allocation2 + $0x8] sm:$0xff] }
  0x50   :  { %640 = vmatprep.subr.bf16.mxu1 %v3194_v10  ;;  %v3200_v12 = vld [vmem:[#allocation7 + $0x24] ss:$16 sps:$4 sm:$0xff]   ;;  %v3205_v15 = vld [vmem:[#allocation7 + $0x20] ss:$16 sps:$4 sm:$0xff]   ;;  %v3198_v28 = vld [vmem:[#allocation7 + $0xc] ss:$16 sps:$4 sm:$0xff]   ;;  %v85_v31 = vpack.c.bf16 %v84_v27, %v83_v26 }
  0x51   :  { %186 = vmatpush1.bf16.msra.mxu0 %v3175_v4  ;;  %641 = vmatpush1.bf16.msra.mxu1 %v3199_v11  ;;  %v3185_v14 = vld [vmem:[#allocation5 + $0x54] ss:$8 sps:$4 sm:$0xff]   ;;  %v3187_v17 = vld [vmem:[#allocation5 + $0x50] ss:$8 sps:$4 sm:$0xff]   ;;  %v3188_v18 = vld [vmem:[#allocation5 + $0x64] ss:$8 sps:$4 sm:$0xff]  }
  0x52   :  { %187 = vmatprep.subr.bf16.mxu0 %v3176_v5  ;;  %642 = vmatprep.subr.bf16.mxu1 %v3200_v12  ;;  %v3206_v16 = vld [vmem:[#allocation7 + $0x44] ss:$16 sps:$4 sm:$0xff]   ;;  %v3211_v19 = vld [vmem:[#allocation7 + $0x40] ss:$16 sps:$4 sm:$0xff]   ;;  %v3196_v32 = vld [vmem:[#allocation7 + $0x8] ss:$16 sps:$4 sm:$0xff]  }
  0x53   :  { %v3212_v20 = vld [vmem:[#allocation7 + $0x64] ss:$16 sps:$4 sm:$0xff]   ;;  %v3190_v21 = vld [vmem:[#allocation5 + $0x60] ss:$8 sps:$4 sm:$0xff]   ;;  %v3193_v25 = vld [vmem:[#allocation5 + $0x70] ss:$8 sps:$4 sm:$0xff]  }
  0x54   :  { %v3217_v22 = vld [vmem:[#allocation7 + $0x60] ss:$16 sps:$4 sm:$0xff]   ;;  %v3191_v23 = vld [vmem:[#allocation5 + $0x74] ss:$8 sps:$4 sm:$0xff]   ;;  %v3202_v36 = vld [vmem:[#allocation7 + $0x28] ss:$16 sps:$4 sm:$0xff]  }
  0x55   :  { %188 = vmatpush1.bf16.msra.mxu0 %v3178_v6  ;;  %643 = vmatpush1.bf16.msra.mxu1 %v3205_v15  ;;  %v3218_v24 = vld [vmem:[#allocation7 + $0x84] ss:$16 sps:$4 sm:$0xff]   ;;  %v3223_v29 = vld [vmem:[#allocation7 + $0x80] ss:$16 sps:$4 sm:$0xff]   ;;  %v3204_v34 = vld [vmem:[#allocation7 + $0x2c] ss:$16 sps:$4 sm:$0xff]  }
  0x56   :  { %189 = vmatprep.subr.bf16.mxu0 %v3179_v7  ;;  %644 = vmatprep.subr.bf16.mxu1 %v3206_v16  ;;  %v3224_v30 = vld [vmem:[#allocation7 + $0xa4] ss:$16 sps:$4 sm:$0xff]   ;;  %v3229_v33 = vld [vmem:[#allocation7 + $0xa0] ss:$16 sps:$4 sm:$0xff]   ;;  %v3210_v37 = vld [vmem:[#allocation7 + $0x4c] ss:$16 sps:$4 sm:$0xff]  }
  0x57   :  { %v3230_v35 = vld [vmem:[#allocation7 + $0xc4] ss:$16 sps:$4 sm:$0xff]   ;;  %v3235_v38 = vld [vmem:[#allocation7 + $0xc0] ss:$16 sps:$4 sm:$0xff]   ;;  %v3208_v40 = vld [vmem:[#allocation7 + $0x48] ss:$16 sps:$4 sm:$0xff]  }
  0x58   :  { %v3236_v39 = vld [vmem:[#allocation7 + $0xe4] ss:$16 sps:$4 sm:$0xff]   ;;  %v3241_v41 = vld [vmem:[#allocation7 + $0xe0] ss:$16 sps:$4 sm:$0xff]   ;;  %v3216_v42 = vld [vmem:[#allocation7 + $0x6c] ss:$16 sps:$4 sm:$0xff]  }
  0x59   :  { %190 = vmatpush1.bf16.msra.mxu0 %v3181_v8  ;;  %645 = vmatpush1.bf16.msra.mxu1 %v3211_v19  ;;  %v3242_v43 = vld [vmem:[#allocation7 + $0x104] ss:$16 sps:$4 sm:$0xff]   ;;  %v3214_v44 = vld [vmem:[#allocation7 + $0x68] ss:$16 sps:$4 sm:$0xff]   ;;  %v3222_v45 = vld [vmem:[#allocation7 + $0x8c] ss:$16 sps:$4 sm:$0xff]  }
  0x5a   :  { %191 = vmatprep.subr.bf16.mxu0 %v3182_v9  ;;  %646 = vmatprep.subr.bf16.mxu1 %v3212_v20  ;;  %v3247_v46 = vld [vmem:[#allocation7 + $0x100] ss:$16 sps:$4 sm:$0xff]   ;;  %v3248_v47 = vld [vmem:[#allocation7 + $0x124] ss:$16 sps:$4 sm:$0xff]   ;;  %v3220_v48 = vld [vmem:[#allocation7 + $0x88] ss:$16 sps:$4 sm:$0xff]  }
  0x5b   :  { %v3253_v49 = vld [vmem:[#allocation7 + $0x120] ss:$16 sps:$4 sm:$0xff]   ;;  %v3228_v50 = vld [vmem:[#allocation7 + $0xac] ss:$16 sps:$4 sm:$0xff]   ;;  %v3254_v51 = vld [vmem:[#allocation7 + $0x144] ss:$16 sps:$4 sm:$0xff]  }
  0x5c   :  { %v3226_v52 = vld [vmem:[#allocation7 + $0xa8] ss:$16 sps:$4 sm:$0xff]   ;;  %v3259_v53 = vld [vmem:[#allocation7 + $0x140] ss:$16 sps:$4 sm:$0xff]   ;;  %v3234_v54 = vld [vmem:[#allocation7 + $0xcc] ss:$16 sps:$4 sm:$0xff]  }
  0x5d   :  { %192 = vmatpush1.bf16.msra.mxu0 %v3184_v13  ;;  %647 = vmatpush1.bf16.msra.mxu1 %v3217_v22  ;;  %v3260_v55 = vld [vmem:[#allocation7 + $0x164] ss:$16 sps:$4 sm:$0xff]   ;;  %v3232_v56 = vld [vmem:[#allocation7 + $0xc8] ss:$16 sps:$4 sm:$0xff]   ;;  %v3265_v57 = vld [vmem:[#allocation7 + $0x160] ss:$16 sps:$4 sm:$0xff]  }
  0x5e   :  { %193 = vmatprep.subr.bf16.mxu0 %v3185_v14  ;;  %648 = vmatprep.subr.bf16.mxu1 %v3218_v24  ;;  %v3240_v58 = vld [vmem:[#allocation7 + $0xec] ss:$16 sps:$4 sm:$0xff]   ;;  %v3266_v59 = vld [vmem:[#allocation7 + $0x184] ss:$16 sps:$4 sm:$0xff]   ;;  %v3238_v60 = vld [vmem:[#allocation7 + $0xe8] ss:$16 sps:$4 sm:$0xff]  }
  0x5f   :  { %v3271_v61 = vld [vmem:[#allocation7 + $0x180] ss:$16 sps:$4 sm:$0xff]   ;;  %v3246_v62 = vld [vmem:[#allocation7 + $0x10c] ss:$16 sps:$4 sm:$0xff]   ;;  %v3244_v63 = vld [vmem:[#allocation7 + $0x108] ss:$16 sps:$4 sm:$0xff]  }
  0x60   :  { %v3252_v0 = vld [vmem:[#allocation7 + $0x12c] ss:$16 sps:$4 sm:$0xff]   ;;  %v3250_v1 = vld [vmem:[#allocation7 + $0x128] ss:$16 sps:$4 sm:$0xff]   ;;  %v3272_v8 = vld [vmem:[#allocation7 + $0x1a4] ss:$16 sps:$4 sm:$0xff]  }
  0x61   :  { %194 = vmatpush1.bf16.msra.mxu0 %v3187_v17  ;;  %649 = vmatpush1.bf16.msra.mxu1 %v3223_v29  ;;  %v3258_v2 = vld [vmem:[#allocation7 + $0x14c] ss:$16 sps:$4 sm:$0xff]   ;;  %v3256_v3 = vld [vmem:[#allocation7 + $0x148] ss:$16 sps:$4 sm:$0xff]   ;;  %v3277_v11 = vld [vmem:[#allocation7 + $0x1a0] ss:$16 sps:$4 sm:$0xff]  }
  0x62   :  { %195 = vmatprep.subr.bf16.mxu0 %v3188_v18  ;;  %650 = vmatprep.subr.bf16.mxu1 %v3224_v30  ;;  %v3264_v4 = vld [vmem:[#allocation7 + $0x16c] ss:$16 sps:$4 sm:$0xff]   ;;  %v3262_v5 = vld [vmem:[#allocation7 + $0x168] ss:$16 sps:$4 sm:$0xff]   ;;  %v3278_v12 = vld [vmem:[#allocation7 + $0x1c4] ss:$16 sps:$4 sm:$0xff]  }
  0x63   :  { %v3270_v6 = vld [vmem:[#allocation7 + $0x18c] ss:$16 sps:$4 sm:$0xff]   ;;  %v3268_v7 = vld [vmem:[#allocation7 + $0x188] ss:$16 sps:$4 sm:$0xff]   ;;  %v3283_v15 = vld [vmem:[#allocation7 + $0x1c0] ss:$16 sps:$4 sm:$0xff]  }
  0x64   :  { %v3276_v9 = vld [vmem:[#allocation7 + $0x1ac] ss:$16 sps:$4 sm:$0xff]   ;;  %v3274_v10 = vld [vmem:[#allocation7 + $0x1a8] ss:$16 sps:$4 sm:$0xff]   ;;  %v3284_v16 = vld [vmem:[#allocation7 + $0x1e4] ss:$16 sps:$4 sm:$0xff]  }
  0x65   :  { %196 = vmatpush1.bf16.msra.mxu0 %v3190_v21  ;;  %651 = vmatpush1.bf16.msra.mxu1 %v3229_v33  ;;  %v3282_v13 = vld [vmem:[#allocation7 + $0x1cc] ss:$16 sps:$4 sm:$0xff]   ;;  %v3280_v14 = vld [vmem:[#allocation7 + $0x1c8] ss:$16 sps:$4 sm:$0xff]   ;;  %v3289_v19 = vld [vmem:[#allocation7 + $0x1e0] ss:$16 sps:$4 sm:$0xff]  }
  0x66   :  { %197 = vmatprep.subr.bf16.mxu0 %v3191_v23  ;;  %652 = vmatprep.subr.bf16.mxu1 %v3230_v35  ;;  %v3286_v17 = vld [vmem:[#allocation7 + $0x1e8] ss:$16 sps:$4 sm:$0xff]   ;;  %v3288_v18 = vld [vmem:[#allocation7 + $0x1ec] ss:$16 sps:$4 sm:$0xff]   ;;  %v784_v20 = vld [vmem:[#allocation8] sm:$0xff] }
  0x67   :  { %v788_v21 = vld [vmem:[#allocation8 + $0x20] sm:$0xff]  ;;  %v785_v22 = vld [vmem:[#allocation8 + $0x8] sm:$0xff] }
  0x68   :  { %v2884_v23 = vcombine.low %v784_v20, %v788_v21  ;;  %v2885_v24 = vcombine.high %v784_v20, %v788_v21  ;;  %v828_v20 = vld [vmem:[#allocation8 + $0x160] sm:$0xff]  ;;  %v825_v21 = vld [vmem:[#allocation8 + $0x148] sm:$0xff] }
  0x69   :  { %198 = vmatpush1.bf16.msra.mxu0 %v3193_v25  ;;  %653 = vmatpush1.bf16.msra.mxu1 %v3235_v38  ;;  %v789_v25 = vld [vmem:[#allocation8 + $0x28] sm:$0xff] }
  0x6a   :  { %683 = vmatprep.subr.bf16.mxu0 %v3198_v28  ;;  %654 = vmatprep.subr.bf16.mxu1 %v3236_v39  ;;  %v2886_v26 = vcombine.low %v785_v22, %v789_v25  ;;  %v2887_v27 = vcombine.high %v785_v22, %v789_v25  ;;  %v227_v28 = vlaneseq  ;;  %v829_v22 = vld [vmem:[#allocation8 + $0x168] sm:$0xff] }
  0x6c   :  { %216 = vmatmul.mubr.bf16.vlgmr.msra.gmra.mrb[0].mxu0 %v85_v31  ;;  %v3517_v29 = vshrl.u32 %v227_v28, 7  ;;  %v86_v31 = vld [vmem:[%s3616_s2] sm:$0x3]  ;;  %v836_v28 = vld [vmem:[#allocation8 + $0x1a0] sm:$0xff] }
  0x6d   :  { %684 = vmatpush1.bf16.msra.mxu0 %v3196_v32  ;;  %655 = vmatpush1.bf16.msra.mxu1 %v3241_v41 }
  0x6e   :  { %685 = vmatprep.subr.bf16.mxu0 %v3204_v34  ;;  %656 = vmatprep.subr.bf16.mxu1 %v3242_v43  ;;  %v3520_v30 = vsub.s32 0, %v3517_v29  ;;  %v3526_v32 = vsub.s32 1, %v3517_v29 }
  0x70   :  { %v230_v33 = vrot.slane %v86_v31, %v3520_v30  ;;  %v234_v34 = vrot.slane %v86_v31, %v3526_v32  ;;  %v833_v31 = vld [vmem:[#allocation8 + $0x188] sm:$0xff] }
  0x71   :  { %686 = vmatpush1.bf16.msra.mxu0 %v3202_v36  ;;  %657 = vmatpush1.bf16.msra.mxu1 %v3247_v46 }
  0x72   :  { %687 = vmatprep.subr.bf16.mxu0 %v3210_v37  ;;  %658 = vmatprep.subr.bf16.mxu1 %v3248_v47  ;;  %v792_v47 = vld [vmem:[#allocation8 + $0x40] sm:$0xff] }
  0x75   :  { %688 = vmatpush1.bf16.msra.mxu0 %v3208_v40  ;;  %659 = vmatpush1.bf16.msra.mxu1 %v3253_v49 }
  0x76   :  { %689 = vmatprep.subr.bf16.mxu0 %v3216_v42  ;;  %660 = vmatprep.subr.bf16.mxu1 %v3254_v51  ;;  %v793_v51 = vld [vmem:[#allocation8 + $0x48] sm:$0xff] }
  0x79   :  { %690 = vmatpush1.bf16.msra.mxu0 %v3214_v44  ;;  %661 = vmatpush1.bf16.msra.mxu1 %v3259_v53 }
  0x7a   :  { %691 = vmatprep.subr.bf16.mxu0 %v3222_v45  ;;  %662 = vmatprep.subr.bf16.mxu1 %v3260_v55 }
  0x7d   :  { %692 = vmatpush1.bf16.msra.mxu0 %v3220_v48  ;;  %663 = vmatpush1.bf16.msra.mxu1 %v3265_v57 }
  0x7e   :  { %693 = vmatprep.subr.bf16.mxu0 %v3228_v50  ;;  %664 = vmatprep.subr.bf16.mxu1 %v3266_v59  ;;  %v796_v50 = vld [vmem:[#allocation8 + $0x60] sm:$0xff] }
  0x7f   :  { %v2893_v57 = vcombine.high %v792_v47, %v796_v50  ;;  %v800_v59 = vld [vmem:[#allocation8 + $0x80] sm:$0xff] }
  0x81   :  { %694 = vmatpush1.bf16.msra.mxu0 %v3226_v52  ;;  %665 = vmatpush1.bf16.msra.mxu1 %v3271_v61  ;;  %v797_v52 = vld [vmem:[#allocation8 + $0x68] sm:$0xff] }
  0x82   :  { %695 = vmatprep.subr.bf16.mxu0 %v3234_v54  ;;  %666 = vmatprep.subr.bf16.mxu1 %v3272_v8  ;;  %v801_v61 = vld [vmem:[#allocation8 + $0x88] sm:$0xff] }
  0x85   :  { %696 = vmatpush1.bf16.msra.mxu0 %v3232_v56  ;;  %667 = vmatpush1.bf16.msra.mxu1 %v3277_v11  ;;  %v816_v11 = vld [vmem:[#allocation8 + $0x100] sm:$0xff] }
  0x86   :  { %697 = vmatprep.subr.bf16.mxu0 %v3240_v58  ;;  %668 = vmatprep.subr.bf16.mxu1 %v3278_v12  ;;  %v2895_v58 = vcombine.high %v793_v51, %v797_v52  ;;  %v820_v12 = vld [vmem:[#allocation8 + $0x120] sm:$0xff] }
  0x89   :  { %698 = vmatpush1.bf16.msra.mxu0 %v3238_v60  ;;  %669 = vmatpush1.bf16.msra.mxu1 %v3283_v15  ;;  %v804_v60 = vld [vmem:[#allocation8 + $0xa0] sm:$0xff] }
  0x8a   :  { %699 = vmatprep.subr.bf16.mxu0 %v3246_v62  ;;  %670 = vmatprep.subr.bf16.mxu1 %v3284_v16  ;;  %v805_v62 = vld [vmem:[#allocation8 + $0xa8] sm:$0xff] }
  0x8b   :  { %v2902_v8 = vcombine.low %v801_v61, %v805_v62 }
  0x8d   :  { %700 = vmatpush1.bf16.msra.mxu0 %v3244_v63  ;;  %671 = vmatpush1.bf16.msra.mxu1 %v3289_v19  ;;  %v2892_v63 = vcombine.low %v792_v47, %v796_v50  ;;  %v824_v19 = vld [vmem:[#allocation8 + $0x140] sm:$0xff] }
  0x8e   :  { %701 = vmatprep.subr.bf16.mxu0 %v3252_v0  ;;  %2320 = vmatprep.subr.bf16.mxu1 %v2885_v24  ;;  %v2894_v0 = vcombine.low %v793_v51, %v797_v52  ;;  %v2925_v25 = vcombine.high %v824_v19, %v828_v20  ;;  %v852_v47 = vld [vmem:[#allocation8 + $0x220] sm:$0xff] }
  0x91   :  { %702 = vmatpush1.bf16.msra.mxu0 %v3250_v1  ;;  %v2901_v1 = vcombine.high %v800_v59, %v804_v60 }
  0x92   :  { %703 = vmatprep.subr.bf16.mxu0 %v3258_v2  ;;  %v2903_v2 = vcombine.high %v801_v61, %v805_v62  ;;  %v864_v62 = vld [vmem:[#allocation8 + $0x280] sm:$0xff] }
  0x95   :  { %704 = vmatpush1.bf16.msra.mxu0 %v3256_v3  ;;  %v808_v3 = vld [vmem:[#allocation8 + $0xc0] sm:$0xff] }
  0x96   :  { %705 = vmatprep.subr.bf16.mxu0 %v3264_v4  ;;  %v812_v4 = vld [vmem:[#allocation8 + $0xe0] sm:$0xff] }
  0x97   :  { %v2908_v15 = vcombine.low %v808_v3, %v812_v4 }
  0x99   :  { %706 = vmatpush1.bf16.msra.mxu0 %v3262_v5  ;;  %v809_v5 = vld [vmem:[#allocation8 + $0xc8] sm:$0xff] }
  0x9a   :  { %707 = vmatprep.subr.bf16.mxu0 %v3270_v6  ;;  %v813_v6 = vld [vmem:[#allocation8 + $0xe8] sm:$0xff] }
  0x9b   :  { %v2910_v16 = vcombine.low %v809_v5, %v813_v6 }
  0x9d   :  { %708 = vmatpush1.bf16.msra.mxu0 %v3268_v7  ;;  %v2900_v7 = vcombine.low %v800_v59, %v804_v60 }
  0x9e   :  { %709 = vmatprep.subr.bf16.mxu0 %v3276_v9  ;;  %v2909_v9 = vcombine.high %v808_v3, %v812_v4 }
  0xa1   :  { %710 = vmatpush1.bf16.msra.mxu0 %v3274_v10  ;;  %v2911_v10 = vcombine.high %v809_v5, %v813_v6  ;;  %v872_v6 = vld [vmem:[#allocation8 + $0x2c0] sm:$0xff] }
  0xa2   :  { %711 = vmatprep.subr.bf16.mxu0 %v3282_v13  ;;  %v817_v13 = vld [vmem:[#allocation8 + $0x108] sm:$0xff] }
  0xa5   :  { %712 = vmatpush1.bf16.msra.mxu0 %v3280_v14  ;;  %v821_v14 = vld [vmem:[#allocation8 + $0x128] sm:$0xff] }
  0xa6   :  { %713 = vmatprep.subr.bf16.mxu0 %v3288_v18  ;;  %v2919_v18 = vcombine.high %v817_v13, %v821_v14  ;;  %v2918_v24 = vcombine.low %v817_v13, %v821_v14  ;;  %v880_v14 = vld [vmem:[#allocation8 + $0x300] sm:$0xff] }
  0xa9   :  { %714 = vmatpush1.bf16.msra.mxu0 %v3286_v17  ;;  %v2917_v17 = vcombine.high %v816_v11, %v820_v12 }
  0xaa   :  { %2406 = vmatprep.subr.bf16.mxu0 %v2887_v27  ;;  %v832_v27 = vld [vmem:[#allocation8 + $0x180] sm:$0xff] }
 0x13f   :  { %v217_v35 = vpop.f32.mrb[0].mxu0 }
 0x140   :  { %v237_v36 = vadd.f32 %v230_v33, %v217_v35  ;;  %v219_v37 = vpop.f32.mrb[1].mxu0  ;;  %v2926_v35 = vcombine.low %v825_v21, %v829_v22 }
 0x141   :  { %v238_v38 = vadd.f32 %v234_v34, %v219_v37  ;;  %v221_v39 = vpop.f32.mrb[2].mxu0 }
 0x142   :  { %v245_v40 = vmul.f32 0.01, %v237_v36  ;;  %v239_v41 = vadd.f32 %v230_v33, %v221_v39  ;;  %v223_v42 = vpop.f32.mrb[3].mxu0  ;;  %vm241_vm0 = vcmp.gt.f32.partialorder %v237_v36, 0.0  ;;  %v837_v33 = vld [vmem:[#allocation8 + $0x1a8] sm:$0xff]  ;;  %v844_v39 = vld [vmem:[#allocation8 + $0x1e0] sm:$0xff] }
 0x143   :  { %v246_v43 = vmul.f32 0.01, %v238_v38  ;;  %v240_v44 = vadd.f32 %v234_v34, %v223_v42  ;;  %vm242_vm2 = vcmp.gt.f32.partialorder %v238_v38, 0.0  ;;  %v2924_v34 = vcombine.low %v824_v19, %v828_v20 }
 0x144   :  { %vm243_vm1 = vcmp.gt.f32.partialorder %v239_v41, 0.0  ;;  %v247_v45 = vmul.f32 0.01, %v239_v41  ;;  %v249_v48 = vsel %vm241_vm0, %v237_v36, %v245_v40  ;;  %v2933_v36 = vcombine.high %v832_v27, %v836_v28  ;;  %v841_v40 = vld [vmem:[#allocation8 + $0x1c8] sm:$0xff] }
 0x145   :  { %v248_v46 = vmul.f32 0.01, %v240_v44  ;;  %vm244_vm3 = vcmp.gt.f32.partialorder %v240_v44, 0.0  ;;  %v250_v53 = vsel %vm242_vm2, %v238_v38, %v246_v43  ;;  %v2935_v37 = vcombine.high %v833_v31, %v837_v33  ;;  %v840_v38 = vld [vmem:[#allocation8 + $0x1c0] sm:$0xff] }
 0x146   :  { %v251_v49 = vsel %vm243_vm1, %v239_v41, %v247_v45  ;;  %v845_v41 = vld [vmem:[#allocation8 + $0x1e8] sm:$0xff]  ;;  %v2932_v42 = vcombine.low %v832_v27, %v836_v28  ;;  %v2934_v43 = vcombine.low %v833_v31, %v837_v33  ;;  %v2940_v50 = vcombine.low %v840_v38, %v844_v39 }
 0x147   :  { %v252_v54 = vsel %vm244_vm3, %v240_v44, %v248_v46  ;;  %v254_v55 = vpack.c.bf16 %v251_v49, %v249_v48  ;;  %v2941_v44 = vcombine.high %v840_v38, %v844_v39  ;;  %v2943_v45 = vcombine.high %v841_v40, %v845_v41  ;;  %v848_v46 = vld [vmem:[#allocation8 + $0x200] sm:$0xff]  ;;  %v849_v48 = vld [vmem:[#allocation8 + $0x208] sm:$0xff] }
 0x148   :  { %v255_v56 = vpack.c.bf16 %v252_v54, %v250_v53  ;;  %v853_v49 = vld [vmem:[#allocation8 + $0x228] sm:$0xff]  ;;  %v2942_v51 = vcombine.low %v841_v40, %v845_v41  ;;  %v2949_v52 = vcombine.high %v848_v46, %v852_v47  ;;  %v856_v54 = vld [vmem:[#allocation8 + $0x240] sm:$0xff] }
 0x149   :  { %v2951_v53 = vcombine.high %v849_v48, %v853_v49  ;;  %v2950_v59 = vcombine.low %v849_v48, %v853_v49  ;;  %v901_v39 = vld [vmem:[#allocation8 + $0x3a8] sm:$0xff] }
 0x14a   :  { %672 = vmatprep.mubr.bf16.mxu1 %v255_v56  ;;  %715 = vmatprep.mubr.bf16.mxu0 %v255_v56  ;;  %v857_v56 = vld [vmem:[#allocation8 + $0x248] sm:$0xff] }
 0x14b   :  { %673 = vmatmul.mubr.bf16.vlgmr.msra.gmra.mrb[0].mxu1 %v254_v55  ;;  %716 = vmatmul.mubr.bf16.vlgmr.msra.gmra.mrb[4].mxu0 %v254_v55  ;;  %v860_v55 = vld [vmem:[#allocation8 + $0x260] sm:$0xff] }
 0x14c   :  { %2321 = vmatpush1.bf16.msra.mxu1 %v2884_v23  ;;  %2407 = vmatpush1.bf16.msra.mxu0 %v2886_v26  ;;  %v2916_v23 = vcombine.low %v816_v11, %v820_v12  ;;  %v2927_v26 = vcombine.high %v825_v21, %v829_v22  ;;  %v2957_v60 = vcombine.high %v856_v54, %v860_v55  ;;  %v888_v22 = vld [vmem:[#allocation8 + $0x340] sm:$0xff] }
 0x14d   :  { %2322 = vmatprep.subr.bf16.mxu1 %v2893_v57  ;;  %2408 = vmatprep.subr.bf16.mxu0 %v2895_v58  ;;  %v861_v57 = vld [vmem:[#allocation8 + $0x268] sm:$0xff]  ;;  %v2948_v58 = vcombine.low %v848_v46, %v852_v47 }
 0x14e   :  { %v2959_v61 = vcombine.high %v857_v56, %v861_v57  ;;  %v2958_v3 = vcombine.low %v857_v56, %v861_v57  ;;  %v909_v47 = vld [vmem:[#allocation8 + $0x3e8] sm:$0xff] }
 0x150   :  { %2323 = vmatpush1.bf16.msra.mxu1 %v2892_v63  ;;  %2409 = vmatpush1.bf16.msra.mxu0 %v2894_v0  ;;  %v868_v63 = vld [vmem:[#allocation8 + $0x2a0] sm:$0xff]  ;;  %v865_v0 = vld [vmem:[#allocation8 + $0x288] sm:$0xff] }
 0x151   :  { %2324 = vmatprep.subr.bf16.mxu1 %v2901_v1  ;;  %2410 = vmatprep.subr.bf16.mxu0 %v2903_v2  ;;  %v869_v1 = vld [vmem:[#allocation8 + $0x2a8] sm:$0xff]  ;;  %v2956_v2 = vcombine.low %v856_v54, %v860_v55  ;;  %v2965_v4 = vcombine.high %v864_v62, %v868_v63 }
 0x152   :  { %v2967_v5 = vcombine.high %v865_v0, %v869_v1  ;;  %v2966_v11 = vcombine.low %v865_v0, %v869_v1  ;;  %v3538_v55 = vld [vmem:[#allocation8 + $0x428] sm:$0xff] }
 0x154   :  { %2325 = vmatpush1.bf16.msra.mxu1 %v2900_v7  ;;  %2411 = vmatpush1.bf16.msra.mxu0 %v2902_v8  ;;  %v876_v7 = vld [vmem:[#allocation8 + $0x2e0] sm:$0xff]  ;;  %v873_v8 = vld [vmem:[#allocation8 + $0x2c8] sm:$0xff] }
 0x155   :  { %2326 = vmatprep.subr.bf16.mxu1 %v2909_v9  ;;  %2412 = vmatprep.subr.bf16.mxu0 %v2911_v10  ;;  %v877_v9 = vld [vmem:[#allocation8 + $0x2e8] sm:$0xff]  ;;  %v2964_v10 = vcombine.low %v864_v62, %v868_v63  ;;  %v2973_v12 = vcombine.high %v872_v6, %v876_v7 }
 0x156   :  { %v2975_v13 = vcombine.high %v873_v8, %v877_v9  ;;  %v2974_v19 = vcombine.low %v873_v8, %v877_v9 }
 0x158   :  { %2327 = vmatpush1.bf16.msra.mxu1 %v2908_v15  ;;  %2413 = vmatpush1.bf16.msra.mxu0 %v2910_v16  ;;  %v884_v15 = vld [vmem:[#allocation8 + $0x320] sm:$0xff]  ;;  %v881_v16 = vld [vmem:[#allocation8 + $0x308] sm:$0xff] }
 0x159   :  { %2328 = vmatprep.subr.bf16.mxu1 %v2917_v17  ;;  %2414 = vmatprep.subr.bf16.mxu0 %v2919_v18  ;;  %v885_v17 = vld [vmem:[#allocation8 + $0x328] sm:$0xff]  ;;  %v2972_v18 = vcombine.low %v872_v6, %v876_v7  ;;  %v2981_v20 = vcombine.high %v880_v14, %v884_v15 }
 0x15a   :  { %v2983_v21 = vcombine.high %v881_v16, %v885_v17  ;;  %v2982_v27 = vcombine.low %v881_v16, %v885_v17 }
 0x15c   :  { %2329 = vmatpush1.bf16.msra.mxu1 %v2916_v23  ;;  %2415 = vmatpush1.bf16.msra.mxu0 %v2918_v24  ;;  %v892_v23 = vld [vmem:[#allocation8 + $0x360] sm:$0xff]  ;;  %v889_v24 = vld [vmem:[#allocation8 + $0x348] sm:$0xff] }
 0x15d   :  { %2330 = vmatprep.subr.bf16.mxu1 %v2925_v25  ;;  %2416 = vmatprep.subr.bf16.mxu0 %v2927_v26  ;;  %v893_v25 = vld [vmem:[#allocation8 + $0x368] sm:$0xff]  ;;  %v2980_v26 = vcombine.low %v880_v14, %v884_v15  ;;  %v2989_v28 = vcombine.high %v888_v22, %v892_v23  ;;  %v2988_v33 = vcombine.low %v888_v22, %v892_v23 }
 0x15e   :  { %v2991_v31 = vcombine.high %v889_v24, %v893_v25 }
 0x160   :  { %2331 = vmatpush1.bf16.msra.mxu1 %v2924_v34  ;;  %2417 = vmatpush1.bf16.msra.mxu0 %v2926_v35  ;;  %v2990_v34 = vcombine.low %v889_v24, %v893_v25  ;;  %v896_v35 = vld [vmem:[#allocation8 + $0x380] sm:$0xff] }
 0x161   :  { %2332 = vmatprep.subr.bf16.mxu1 %v2933_v36  ;;  %2418 = vmatprep.subr.bf16.mxu0 %v2935_v37  ;;  %v900_v36 = vld [vmem:[#allocation8 + $0x3a0] sm:$0xff]  ;;  %v897_v37 = vld [vmem:[#allocation8 + $0x388] sm:$0xff] }
 0x162   :  { %v2997_v38 = vcombine.high %v896_v35, %v900_v36  ;;  %v2996_v40 = vcombine.low %v896_v35, %v900_v36  ;;  %v2998_v41 = vcombine.low %v897_v37, %v901_v39  ;;  %v920_v35 = vld [vmem:[#allocation8 + $0x440] sm:$0xff] }
 0x164   :  { %2333 = vmatpush1.bf16.msra.mxu1 %v2932_v42  ;;  %2419 = vmatpush1.bf16.msra.mxu0 %v2934_v43  ;;  %v2999_v42 = vcombine.high %v897_v37, %v901_v39  ;;  %v904_v43 = vld [vmem:[#allocation8 + $0x3c0] sm:$0xff] }
 0x165   :  { %2334 = vmatprep.subr.bf16.mxu1 %v2941_v44  ;;  %2420 = vmatprep.subr.bf16.mxu0 %v2943_v45  ;;  %v908_v44 = vld [vmem:[#allocation8 + $0x3e0] sm:$0xff]  ;;  %v905_v45 = vld [vmem:[#allocation8 + $0x3c8] sm:$0xff] }
 0x166   :  { %v3005_v46 = vcombine.high %v904_v43, %v908_v44  ;;  %v3004_v48 = vcombine.low %v904_v43, %v908_v44  ;;  %v3006_v49 = vcombine.low %v905_v45, %v909_v47 }
 0x168   :  { %2335 = vmatpush1.bf16.msra.mxu1 %v2940_v50  ;;  %2421 = vmatpush1.bf16.msra.mxu0 %v2942_v51  ;;  %v3007_v50 = vcombine.high %v905_v45, %v909_v47  ;;  %v3530_v51 = vld [vmem:[#allocation8 + $0x400] sm:$0xff] }
 0x169   :  { %2336 = vmatprep.subr.bf16.mxu1 %v2949_v52  ;;  %2422 = vmatprep.subr.bf16.mxu0 %v2951_v53  ;;  %v3532_v52 = vld [vmem:[#allocation8 + $0x420] sm:$0xff]  ;;  %v3534_v53 = vld [vmem:[#allocation8 + $0x408] sm:$0xff] }
 0x16a   :  { %v3013_v54 = vcombine.high %v3530_v51, %v3532_v52  ;;  %v3012_v56 = vcombine.low %v3530_v51, %v3532_v52  ;;  %v3014_v57 = vcombine.low %v3534_v53, %v3538_v55  ;;  %v928_v45 = vld [vmem:[#allocation8 + $0x480] sm:$0xff] }
 0x16c   :  { %2337 = vmatpush1.bf16.msra.mxu1 %v2948_v58  ;;  %2423 = vmatpush1.bf16.msra.mxu0 %v2950_v59  ;;  %v3015_v58 = vcombine.high %v3534_v53, %v3538_v55  ;;  %v737_v59 = vsub.s32 2, %v3517_v29 }
 0x16d   :  { %2338 = vmatprep.subr.bf16.mxu1 %v2957_v60  ;;  %2424 = vmatprep.subr.bf16.mxu0 %v2959_v61  ;;  %v253_v60 = vld [vmem:[%s3618_s4] sm:$0xf]  ;;  %v741_v61 = vsub.s32 3, %v3517_v29 }
 0x16e   :  { %v730_v62 = vrot.slane %v253_v60, %v3520_v30  ;;  %v738_v63 = vrot.slane %v253_v60, %v737_v59  ;;  %v734_v0 = vrot.slane %v253_v60, %v3526_v32 }
 0x16f   :  { %v742_v1 = vrot.slane %v253_v60, %v741_v61 }
 0x170   :  { %2339 = vmatpush1.bf16.msra.mxu1 %v2956_v2  ;;  %2425 = vmatpush1.bf16.msra.mxu0 %v2958_v3 }
 0x171   :  { %2340 = vmatprep.subr.bf16.mxu1 %v2965_v4  ;;  %2426 = vmatprep.subr.bf16.mxu0 %v2967_v5 }
 0x174   :  { %2341 = vmatpush1.bf16.msra.mxu1 %v2964_v10  ;;  %2427 = vmatpush1.bf16.msra.mxu0 %v2966_v11 }
 0x175   :  { %2342 = vmatprep.subr.bf16.mxu1 %v2973_v12  ;;  %2428 = vmatprep.subr.bf16.mxu0 %v2975_v13 }
 0x178   :  { %2343 = vmatpush1.bf16.msra.mxu1 %v2972_v18  ;;  %2429 = vmatpush1.bf16.msra.mxu0 %v2974_v19 }
 0x179   :  { %2344 = vmatprep.subr.bf16.mxu1 %v2981_v20  ;;  %2430 = vmatprep.subr.bf16.mxu0 %v2983_v21 }
 0x17c   :  { %2345 = vmatpush1.bf16.msra.mxu1 %v2980_v26  ;;  %2431 = vmatpush1.bf16.msra.mxu0 %v2982_v27 }
 0x17d   :  { %2346 = vmatprep.subr.bf16.mxu1 %v2989_v28  ;;  %2432 = vmatprep.subr.bf16.mxu0 %v2991_v31 }
 0x180   :  { %2347 = vmatpush1.bf16.msra.mxu1 %v2988_v33  ;;  %2433 = vmatpush1.bf16.msra.mxu0 %v2990_v34 }
 0x181   :  { %2348 = vmatprep.subr.bf16.mxu1 %v2997_v38  ;;  %2434 = vmatprep.subr.bf16.mxu0 %v2999_v42  ;;  %v925_v42 = vld [vmem:[#allocation8 + $0x468] sm:$0xff] }
 0x184   :  { %2349 = vmatpush1.bf16.msra.mxu1 %v2996_v40  ;;  %2435 = vmatpush1.bf16.msra.mxu0 %v2998_v41  ;;  %v924_v40 = vld [vmem:[#allocation8 + $0x460] sm:$0xff]  ;;  %v921_v41 = vld [vmem:[#allocation8 + $0x448] sm:$0xff] }
 0x185   :  { %2350 = vmatprep.subr.bf16.mxu1 %v3005_v46  ;;  %2436 = vmatprep.subr.bf16.mxu0 %v3007_v50  ;;  %v3021_v46 = vcombine.high %v920_v35, %v924_v40  ;;  %v3023_v47 = vcombine.high %v921_v41, %v925_v42  ;;  %v933_v50 = vld [vmem:[#allocation8 + $0x4a8] sm:$0xff] }
 0x188   :  { %2351 = vmatpush1.bf16.msra.mxu1 %v3004_v48  ;;  %2437 = vmatpush1.bf16.msra.mxu0 %v3006_v49  ;;  %v932_v48 = vld [vmem:[#allocation8 + $0x4a0] sm:$0xff]  ;;  %v929_v49 = vld [vmem:[#allocation8 + $0x488] sm:$0xff] }
 0x189   :  { %2363 = vmatprep.subr.bf16.mxu1 %v3013_v54  ;;  %2449 = vmatprep.subr.bf16.mxu0 %v3015_v58  ;;  %v3020_v54 = vcombine.low %v920_v35, %v924_v40  ;;  %v3022_v58 = vcombine.low %v921_v41, %v925_v42  ;;  %v3029_v60 = vcombine.high %v928_v45, %v932_v48  ;;  %v977_v40 = vld [vmem:[#allocation8 + $0x608] sm:$0xff] }
 0x18a   :  { %v3028_v51 = vcombine.low %v928_v45, %v932_v48  ;;  %v3030_v52 = vcombine.low %v929_v49, %v933_v50  ;;  %v981_v41 = vld [vmem:[#allocation8 + $0x628] sm:$0xff]  ;;  %v984_v48 = vld [vmem:[#allocation8 + $0x640] sm:$0xff] }
 0x21e   :  { %v674_v2 = vpop.f32.mrb[0].mxu1  ;;  %v717_v3 = vpop.f32.mrb[4].mxu0 }
 0x21f   :  { %v747_v4 = vadd.f32 %v730_v62, %v674_v2  ;;  %v749_v5 = vadd.f32 %v738_v63, %v717_v3  ;;  %v676_v6 = vpop.f32.mrb[1].mxu1  ;;  %v719_v7 = vpop.f32.mrb[5].mxu0  ;;  %v941_v2 = vld [vmem:[#allocation8 + $0x4e8] sm:$0xff] }
 0x220   :  { %v748_v8 = vadd.f32 %v734_v0, %v676_v6  ;;  %v750_v9 = vadd.f32 %v742_v1, %v719_v7  ;;  %v678_v10 = vpop.f32.mrb[2].mxu1  ;;  %v721_v11 = vpop.f32.mrb[6].mxu0  ;;  %v945_v3 = vld [vmem:[#allocation8 + $0x508] sm:$0xff] }
 0x221   :  { %vm755_vm4 = vcmp.gt.f32.partialorder %v747_v4, 0.0  ;;  %v763_v12 = vmul.f32 0.01, %v747_v4  ;;  %vm757_vm5 = vcmp.gt.f32.partialorder %v749_v5, 0.0  ;;  %v765_v13 = vmul.f32 0.01, %v749_v5 }
 0x222   :  { %vm756_vm6 = vcmp.gt.f32.partialorder %v748_v8, 0.0  ;;  %v764_v14 = vmul.f32 0.01, %v748_v8  ;;  %vm758_vm7 = vcmp.gt.f32.partialorder %v750_v9, 0.0  ;;  %v766_v15 = vmul.f32 0.01, %v750_v9 }
 0x223   :  { %v751_v16 = vadd.f32 %v730_v62, %v678_v10  ;;  %v753_v17 = vadd.f32 %v738_v63, %v721_v11  ;;  %v680_v18 = vpop.f32.mrb[3].mxu1  ;;  %v723_v19 = vpop.f32.mrb[7].mxu0  ;;  %v771_v20 = vsel %vm755_vm4, %v747_v4, %v763_v12  ;;  %v773_v21 = vsel %vm757_vm5, %v749_v5, %v765_v13  ;;  %v936_v63 = vld [vmem:[#allocation8 + $0x4c0] sm:$0xff]  ;;  %v949_v4 = vld [vmem:[#allocation8 + $0x528] sm:$0xff] }
 0x224   :  { %v752_v22 = vadd.f32 %v734_v0, %v680_v18  ;;  %v754_v23 = vadd.f32 %v742_v1, %v723_v19  ;;  %v772_v28 = vsel %vm756_vm6, %v748_v8, %v764_v14  ;;  %v774_v31 = vsel %vm758_vm7, %v750_v9, %v766_v15  ;;  %v940_v0 = vld [vmem:[#allocation8 + $0x4e0] sm:$0xff]  ;;  %v937_v1 = vld [vmem:[#allocation8 + $0x4c8] sm:$0xff] }
 0x225   :  { %vm759_vm8 = vcmp.gt.f32.partialorder %v751_v16, 0.0  ;;  %v767_v24 = vmul.f32 0.01, %v751_v16  ;;  %vm761_vm9 = vcmp.gt.f32.partialorder %v753_v17, 0.0  ;;  %v769_v25 = vmul.f32 0.01, %v753_v17 }
 0x226   :  { %vm760_vm10 = vcmp.gt.f32.partialorder %v752_v22, 0.0  ;;  %v768_v26 = vmul.f32 0.01, %v752_v22  ;;  %vm762_vm11 = vcmp.gt.f32.partialorder %v754_v23, 0.0  ;;  %v770_v27 = vmul.f32 0.01, %v754_v23 }
 0x227   :  { %v775_v33 = vsel %vm759_vm8, %v751_v16, %v767_v24  ;;  %v777_v34 = vsel %vm761_vm9, %v753_v17, %v769_v25  ;;  %v3031_v62 = vcombine.high %v929_v49, %v933_v50  ;;  %v3037_v53 = vcombine.high %v936_v63, %v940_v0  ;;  %v952_v9 = vld [vmem:[#allocation8 + $0x540] sm:$0xff]  ;;  %v953_v11 = vld [vmem:[#allocation8 + $0x548] sm:$0xff] }
 0x228   :  { %v3559_v36 = vpack.c.bf16 %v775_v33, %v771_v20  ;;  %v3561_v37 = vpack.c.bf16 %v777_v34, %v773_v21  ;;  %v776_v38 = vsel %vm760_vm10, %v752_v22, %v768_v26  ;;  %v778_v39 = vsel %vm762_vm11, %v754_v23, %v770_v27  ;;  %v956_v10 = vld [vmem:[#allocation8 + $0x560] sm:$0xff]  ;;  %v957_v12 = vld [vmem:[#allocation8 + $0x568] sm:$0xff] }
 0x229   :  { %v3563_v43 = vpack.c.bf16 %v776_v38, %v772_v28  ;;  %v3565_v44 = vpack.c.bf16 %v778_v39, %v774_v31  ;;  %v3039_v55 = vcombine.high %v937_v1, %v941_v2  ;;  %v3036_v5 = vcombine.low %v936_v63, %v940_v0  ;;  %v960_v17 = vld [vmem:[#allocation8 + $0x580] sm:$0xff]  ;;  %v961_v19 = vld [vmem:[#allocation8 + $0x588] sm:$0xff] }
 0x22a   :  { %v3038_v6 = vcombine.low %v937_v1, %v941_v2  ;;  %v3047_v8 = vcombine.high %v945_v3, %v949_v4  ;;  %v3046_v14 = vcombine.low %v945_v3, %v949_v4  ;;  %v3053_v15 = vcombine.high %v952_v9, %v956_v10  ;;  %v964_v18 = vld [vmem:[#allocation8 + $0x5a0] sm:$0xff]  ;;  %v965_v20 = vld [vmem:[#allocation8 + $0x5a8] sm:$0xff] }
 0x22b   :  { %2352 = vmatprep.mubr.bf16.mxu1 %v3563_v43  ;;  %2438 = vmatprep.mubr.bf16.mxu0 %v3563_v43  ;;  %v3055_v16 = vcombine.high %v953_v11, %v957_v12  ;;  %v3052_v21 = vcombine.low %v952_v9, %v956_v10  ;;  %v3054_v22 = vcombine.low %v953_v11, %v957_v12  ;;  %v968_v25 = vld [vmem:[#allocation8 + $0x5c0] sm:$0xff]  ;;  %v969_v27 = vld [vmem:[#allocation8 + $0x5c8] sm:$0xff] }
 0x22c   :  { %2353 = vmatmul.mubr.bf16.vlgmr.msra.gmra.mrb[4].mxu1 %v3559_v36  ;;  %2439 = vmatmul.mubr.bf16.vlgmr.msra.gmra.mrb[8].mxu0 %v3559_v36  ;;  %v3061_v23 = vcombine.high %v960_v17, %v964_v18  ;;  %v3063_v24 = vcombine.high %v961_v19, %v965_v20  ;;  %v972_v26 = vld [vmem:[#allocation8 + $0x5e0] sm:$0xff]  ;;  %v973_v28 = vld [vmem:[#allocation8 + $0x5e8] sm:$0xff]  ;;  %v3060_v31 = vcombine.low %v960_v17, %v964_v18 }
 0x22d   :  { %2364 = vmatpush1.bf16.msra.mxu1 %v3012_v56  ;;  %2450 = vmatpush1.bf16.msra.mxu0 %v3014_v57  ;;  %v944_v56 = vld [vmem:[#allocation8 + $0x500] sm:$0xff]  ;;  %v3062_v33 = vcombine.low %v961_v19, %v965_v20  ;;  %v3069_v34 = vcombine.high %v968_v25, %v972_v26  ;;  %v3071_v35 = vcombine.high %v969_v27, %v973_v28  ;;  %v985_v50 = vld [vmem:[#allocation8 + $0x648] sm:$0xff] }
 0x22e   :  { %2395 = vmatprep.mubr.bf16.mxu1 %v3565_v44  ;;  %2481 = vmatprep.mubr.bf16.mxu0 %v3565_v44  ;;  %v948_v57 = vld [vmem:[#allocation8 + $0x520] sm:$0xff]  ;;  %v3068_v42 = vcombine.low %v968_v25, %v972_v26  ;;  %v3070_v45 = vcombine.low %v969_v27, %v973_v28  ;;  %v993_v2 = vld [vmem:[#allocation8 + $0x688] sm:$0xff] }
 0x22f   :  { %2365 = vmatprep.subr.bf16.mxu1 %v3021_v46  ;;  %2451 = vmatprep.subr.bf16.mxu0 %v3023_v47  ;;  %v3045_v7 = vcombine.high %v944_v56, %v948_v57  ;;  %v3044_v13 = vcombine.low %v944_v56, %v948_v57  ;;  %v976_v38 = vld [vmem:[#allocation8 + $0x600] sm:$0xff]  ;;  %v3079_v47 = vcombine.high %v977_v40, %v981_v41  ;;  %v1001_v4 = vld [vmem:[#allocation8 + $0x6c8] sm:$0xff] }
 0x230   :  { %v980_v39 = vld [vmem:[#allocation8 + $0x620] sm:$0xff]  ;;  %v1009_v12 = vld [vmem:[#allocation8 + $0x708] sm:$0xff] }
 0x231   :  { %2366 = vmatpush1.bf16.msra.mxu1 %v3020_v54  ;;  %2452 = vmatpush1.bf16.msra.mxu0 %v3022_v58  ;;  %v3077_v46 = vcombine.high %v976_v38, %v980_v39  ;;  %v988_v49 = vld [vmem:[#allocation8 + $0x660] sm:$0xff]  ;;  %v989_v54 = vld [vmem:[#allocation8 + $0x668] sm:$0xff]  ;;  %v3076_v58 = vcombine.low %v976_v38, %v980_v39 }
 0x232   :  { %2367 = vmatprep.subr.bf16.mxu1 %v3029_v60  ;;  %2453 = vmatprep.subr.bf16.mxu0 %v3031_v62  ;;  %v3078_v60 = vcombine.low %v977_v40, %v981_v41  ;;  %v3085_v62 = vcombine.high %v984_v48, %v988_v49  ;;  %v3087_v63 = vcombine.high %v985_v50, %v989_v54  ;;  %v992_v0 = vld [vmem:[#allocation8 + $0x680] sm:$0xff]  ;;  %v1017_v20 = vld [vmem:[#allocation8 + $0x748] sm:$0xff] }
 0x233   :  { %v996_v1 = vld [vmem:[#allocation8 + $0x6a0] sm:$0xff]  ;;  %v1025_v28 = vld [vmem:[#allocation8 + $0x788] sm:$0xff] }
 0x234   :  { %v1000_v57 = vld [vmem:[#allocation8 + $0x6c0] sm:$0xff]  ;;  %v1033_v41 = vld [vmem:[#allocation8 + $0x7c8] sm:$0xff] }
 0x235   :  { %2368 = vmatpush1.bf16.msra.mxu1 %v3028_v51  ;;  %2454 = vmatpush1.bf16.msra.mxu0 %v3030_v52  ;;  %v997_v51 = vld [vmem:[#allocation8 + $0x6a8] sm:$0xff]  ;;  %v3084_v52 = vcombine.low %v984_v48, %v988_v49  ;;  %v1004_v3 = vld [vmem:[#allocation8 + $0x6e0] sm:$0xff]  ;;  %v786_v49 = vld [vmem:[#allocation8 + $0x10] sm:$0xff] }
 0x236   :  { %2369 = vmatprep.subr.bf16.mxu1 %v3037_v53  ;;  %2455 = vmatprep.subr.bf16.mxu0 %v3039_v55  ;;  %v3086_v53 = vcombine.low %v985_v50, %v989_v54  ;;  %v3093_v55 = vcombine.high %v992_v0, %v996_v1  ;;  %v3095_v56 = vcombine.high %v993_v2, %v997_v51  ;;  %v1008_v10 = vld [vmem:[#allocation8 + $0x700] sm:$0xff]  ;;  %v790_v50 = vld [vmem:[#allocation8 + $0x30] sm:$0xff]  ;;  %v787_v54 = vld [vmem:[#allocation8 + $0x18] sm:$0xff] }
 0x237   :  { %v1012_v11 = vld [vmem:[#allocation8 + $0x720] sm:$0xff] }
 0x238   :  { %v1016_v18 = vld [vmem:[#allocation8 + $0x740] sm:$0xff] }
 0x239   :  { %2370 = vmatpush1.bf16.msra.mxu1 %v3036_v5  ;;  %2456 = vmatpush1.bf16.msra.mxu0 %v3038_v6  ;;  %v1005_v5 = vld [vmem:[#allocation8 + $0x6e8] sm:$0xff]  ;;  %v3092_v6 = vcombine.low %v992_v0, %v996_v1  ;;  %v1020_v19 = vld [vmem:[#allocation8 + $0x760] sm:$0xff]  ;;  %v794_v1 = vld [vmem:[#allocation8 + $0x50] sm:$0xff] }
 0x23a   :  { %2371 = vmatprep.subr.bf16.mxu1 %v3045_v7  ;;  %2457 = vmatprep.subr.bf16.mxu0 %v3047_v8  ;;  %v3094_v7 = vcombine.low %v993_v2, %v997_v51  ;;  %v3101_v8 = vcombine.high %v1000_v57, %v1004_v3  ;;  %v3103_v9 = vcombine.high %v1001_v4, %v1005_v5  ;;  %v1024_v26 = vld [vmem:[#allocation8 + $0x780] sm:$0xff]  ;;  %v798_v2 = vld [vmem:[#allocation8 + $0x70] sm:$0xff]  ;;  %v795_v51 = vld [vmem:[#allocation8 + $0x58] sm:$0xff] }
 0x23b   :  { %v1028_v27 = vld [vmem:[#allocation8 + $0x7a0] sm:$0xff] }
 0x23c   :  { %v1032_v39 = vld [vmem:[#allocation8 + $0x7c0] sm:$0xff] }
 0x23d   :  { %2372 = vmatpush1.bf16.msra.mxu1 %v3044_v13  ;;  %2458 = vmatpush1.bf16.msra.mxu0 %v3046_v14  ;;  %v1013_v13 = vld [vmem:[#allocation8 + $0x728] sm:$0xff]  ;;  %v3100_v14 = vcombine.low %v1000_v57, %v1004_v3  ;;  %v1036_v40 = vld [vmem:[#allocation8 + $0x7e0] sm:$0xff]  ;;  %v802_v3 = vld [vmem:[#allocation8 + $0x90] sm:$0xff] }
 0x23e   :  { %2373 = vmatprep.subr.bf16.mxu1 %v3053_v15  ;;  %2459 = vmatprep.subr.bf16.mxu0 %v3055_v16  ;;  %v3102_v15 = vcombine.low %v1001_v4, %v1005_v5  ;;  %v3109_v16 = vcombine.high %v1008_v10, %v1012_v11  ;;  %v3111_v17 = vcombine.high %v1009_v12, %v1013_v13  ;;  %v806_v4 = vld [vmem:[#allocation8 + $0xb0] sm:$0xff]  ;;  %v803_v5 = vld [vmem:[#allocation8 + $0x98] sm:$0xff] }
 0x241   :  { %2374 = vmatpush1.bf16.msra.mxu1 %v3052_v21  ;;  %2460 = vmatpush1.bf16.msra.mxu0 %v3054_v22  ;;  %v1021_v21 = vld [vmem:[#allocation8 + $0x768] sm:$0xff]  ;;  %v3108_v22 = vcombine.low %v1008_v10, %v1012_v11  ;;  %v810_v11 = vld [vmem:[#allocation8 + $0xd0] sm:$0xff] }
 0x242   :  { %2375 = vmatprep.subr.bf16.mxu1 %v3061_v23  ;;  %2461 = vmatprep.subr.bf16.mxu0 %v3063_v24  ;;  %v3110_v23 = vcombine.low %v1009_v12, %v1013_v13  ;;  %v3117_v24 = vcombine.high %v1016_v18, %v1020_v19  ;;  %v3119_v25 = vcombine.high %v1017_v20, %v1021_v21  ;;  %v814_v12 = vld [vmem:[#allocation8 + $0xf0] sm:$0xff]  ;;  %v811_v13 = vld [vmem:[#allocation8 + $0xd8] sm:$0xff] }
 0x245   :  { %2376 = vmatpush1.bf16.msra.mxu1 %v3060_v31  ;;  %2462 = vmatpush1.bf16.msra.mxu0 %v3062_v33  ;;  %v1029_v31 = vld [vmem:[#allocation8 + $0x7a8] sm:$0xff]  ;;  %v3116_v33 = vcombine.low %v1016_v18, %v1020_v19  ;;  %v818_v19 = vld [vmem:[#allocation8 + $0x110] sm:$0xff] }
 0x246   :  { %2377 = vmatprep.subr.bf16.mxu1 %v3069_v34  ;;  %2463 = vmatprep.subr.bf16.mxu0 %v3071_v35  ;;  %v3118_v34 = vcombine.low %v1017_v20, %v1021_v21  ;;  %v3125_v35 = vcombine.high %v1024_v26, %v1028_v27  ;;  %v3127_v38 = vcombine.high %v1025_v28, %v1029_v31  ;;  %v822_v20 = vld [vmem:[#allocation8 + $0x130] sm:$0xff]  ;;  %v823_v21 = vld [vmem:[#allocation8 + $0x138] sm:$0xff] }
 0x249   :  { %2378 = vmatpush1.bf16.msra.mxu1 %v3068_v42  ;;  %2464 = vmatpush1.bf16.msra.mxu0 %v3070_v45  ;;  %v1037_v42 = vld [vmem:[#allocation8 + $0x7e8] sm:$0xff]  ;;  %v3124_v45 = vcombine.low %v1024_v26, %v1028_v27  ;;  %v826_v26 = vld [vmem:[#allocation8 + $0x150] sm:$0xff] }
 0x24a   :  { %2379 = vmatprep.subr.bf16.mxu1 %v3077_v46  ;;  %2465 = vmatprep.subr.bf16.mxu0 %v3079_v47  ;;  %v3126_v46 = vcombine.low %v1025_v28, %v1029_v31  ;;  %v3133_v47 = vcombine.high %v1032_v39, %v1036_v40  ;;  %v3135_v48 = vcombine.high %v1033_v41, %v1037_v42  ;;  %v830_v27 = vld [vmem:[#allocation8 + $0x170] sm:$0xff]  ;;  %v827_v28 = vld [vmem:[#allocation8 + $0x158] sm:$0xff] }
 0x24b   :  { %v831_v31 = vld [vmem:[#allocation8 + $0x178] sm:$0xff] }
 0x24d   :  { %2380 = vmatpush1.bf16.msra.mxu1 %v3076_v58  ;;  %2466 = vmatpush1.bf16.msra.mxu0 %v3078_v60  ;;  %v791_v58 = vld [vmem:[#allocation8 + $0x38] sm:$0xff]  ;;  %v3132_v60 = vcombine.low %v1032_v39, %v1036_v40  ;;  %v834_v39 = vld [vmem:[#allocation8 + $0x190] sm:$0xff] }
 0x24e   :  { %2381 = vmatprep.subr.bf16.mxu1 %v3085_v62  ;;  %2467 = vmatprep.subr.bf16.mxu0 %v3087_v63  ;;  %v3134_v62 = vcombine.low %v1033_v41, %v1037_v42  ;;  %v2889_v63 = vcombine.high %v786_v49, %v790_v50  ;;  %v2891_v0 = vcombine.high %v787_v54, %v791_v58  ;;  %v838_v40 = vld [vmem:[#allocation8 + $0x1b0] sm:$0xff]  ;;  %v835_v41 = vld [vmem:[#allocation8 + $0x198] sm:$0xff] }
 0x24f   :  { %v839_v42 = vld [vmem:[#allocation8 + $0x1b8] sm:$0xff] }
 0x251   :  { %2382 = vmatpush1.bf16.msra.mxu1 %v3084_v52  ;;  %2468 = vmatpush1.bf16.msra.mxu0 %v3086_v53  ;;  %v799_v52 = vld [vmem:[#allocation8 + $0x78] sm:$0xff]  ;;  %v2888_v53 = vcombine.low %v786_v49, %v790_v50  ;;  %v842_v49 = vld [vmem:[#allocation8 + $0x1d0] sm:$0xff] }
 0x252   :  { %2383 = vmatprep.subr.bf16.mxu1 %v3093_v55  ;;  %2469 = vmatprep.subr.bf16.mxu0 %v3095_v56  ;;  %v2890_v55 = vcombine.low %v787_v54, %v791_v58  ;;  %v2897_v56 = vcombine.high %v794_v1, %v798_v2  ;;  %v2899_v57 = vcombine.high %v795_v51, %v799_v52  ;;  %v846_v50 = vld [vmem:[#allocation8 + $0x1f0] sm:$0xff]  ;;  %v843_v54 = vld [vmem:[#allocation8 + $0x1d8] sm:$0xff] }
 0x253   :  { %v847_v58 = vld [vmem:[#allocation8 + $0x1f8] sm:$0xff] }
 0x255   :  { %2384 = vmatpush1.bf16.msra.mxu1 %v3092_v6  ;;  %2470 = vmatpush1.bf16.msra.mxu0 %v3094_v7  ;;  %v807_v6 = vld [vmem:[#allocation8 + $0xb8] sm:$0xff]  ;;  %v2896_v7 = vcombine.low %v794_v1, %v798_v2  ;;  %v850_v1 = vld [vmem:[#allocation8 + $0x210] sm:$0xff] }
 0x256   :  { %2385 = vmatprep.subr.bf16.mxu1 %v3101_v8  ;;  %2471 = vmatprep.subr.bf16.mxu0 %v3103_v9  ;;  %v2898_v8 = vcombine.low %v795_v51, %v799_v52  ;;  %v2905_v9 = vcombine.high %v802_v3, %v806_v4  ;;  %v2907_v10 = vcombine.high %v803_v5, %v807_v6  ;;  %v854_v2 = vld [vmem:[#allocation8 + $0x230] sm:$0xff]  ;;  %v851_v51 = vld [vmem:[#allocation8 + $0x218] sm:$0xff] }
 0x257   :  { %v855_v52 = vld [vmem:[#allocation8 + $0x238] sm:$0xff] }
 0x259   :  { %2386 = vmatpush1.bf16.msra.mxu1 %v3100_v14  ;;  %2472 = vmatpush1.bf16.msra.mxu0 %v3102_v15  ;;  %v815_v14 = vld [vmem:[#allocation8 + $0xf8] sm:$0xff]  ;;  %v2904_v15 = vcombine.low %v802_v3, %v806_v4  ;;  %v858_v3 = vld [vmem:[#allocation8 + $0x250] sm:$0xff] }
 0x25a   :  { %2387 = vmatprep.subr.bf16.mxu1 %v3109_v16  ;;  %2473 = vmatprep.subr.bf16.mxu0 %v3111_v17  ;;  %v2906_v16 = vcombine.low %v803_v5, %v807_v6  ;;  %v2913_v17 = vcombine.high %v810_v11, %v814_v12  ;;  %v2915_v18 = vcombine.high %v811_v13, %v815_v14  ;;  %v862_v4 = vld [vmem:[#allocation8 + $0x270] sm:$0xff]  ;;  %v859_v5 = vld [vmem:[#allocation8 + $0x258] sm:$0xff] }
 0x25b   :  { %v863_v6 = vld [vmem:[#allocation8 + $0x278] sm:$0xff] }
 0x25d   :  { %2388 = vmatpush1.bf16.msra.mxu1 %v3108_v22  ;;  %2474 = vmatpush1.bf16.msra.mxu0 %v3110_v23  ;;  %v2912_v22 = vcombine.low %v810_v11, %v814_v12  ;;  %v2914_v23 = vcombine.low %v811_v13, %v815_v14  ;;  %v866_v11 = vld [vmem:[#allocation8 + $0x290] sm:$0xff]  ;;  %v867_v13 = vld [vmem:[#allocation8 + $0x298] sm:$0xff] }
 0x25e   :  { %2389 = vmatprep.subr.bf16.mxu1 %v3117_v24  ;;  %2475 = vmatprep.subr.bf16.mxu0 %v3119_v25  ;;  %v2921_v24 = vcombine.high %v818_v19, %v822_v20  ;;  %v870_v12 = vld [vmem:[#allocation8 + $0x2b0] sm:$0xff]  ;;  %v871_v14 = vld [vmem:[#allocation8 + $0x2b8] sm:$0xff] }
 0x261   :  { %2390 = vmatpush1.bf16.msra.mxu1 %v3116_v33  ;;  %2476 = vmatpush1.bf16.msra.mxu0 %v3118_v34  ;;  %v2920_v33 = vcombine.low %v818_v19, %v822_v20  ;;  %v874_v19 = vld [vmem:[#allocation8 + $0x2d0] sm:$0xff] }
 0x262   :  { %2391 = vmatprep.subr.bf16.mxu1 %v3125_v35  ;;  %2477 = vmatprep.subr.bf16.mxu0 %v3127_v38  ;;  %v2929_v35 = vcombine.high %v826_v26, %v830_v27  ;;  %v2931_v38 = vcombine.high %v827_v28, %v831_v31  ;;  %v878_v20 = vld [vmem:[#allocation8 + $0x2f0] sm:$0xff] }
 0x265   :  { %2392 = vmatpush1.bf16.msra.mxu1 %v3124_v45  ;;  %2478 = vmatpush1.bf16.msra.mxu0 %v3126_v46  ;;  %v2928_v45 = vcombine.low %v826_v26, %v830_v27  ;;  %v2930_v46 = vcombine.low %v827_v28, %v831_v31  ;;  %v882_v26 = vld [vmem:[#allocation8 + $0x310] sm:$0xff]  ;;  %v883_v28 = vld [vmem:[#allocation8 + $0x318] sm:$0xff] }
 0x266   :  { %2393 = vmatprep.subr.bf16.mxu1 %v3133_v47  ;;  %2479 = vmatprep.subr.bf16.mxu0 %v3135_v48  ;;  %v2937_v47 = vcombine.high %v834_v39, %v838_v40  ;;  %v2939_v48 = vcombine.high %v835_v41, %v839_v42  ;;  %v886_v27 = vld [vmem:[#allocation8 + $0x330] sm:$0xff]  ;;  %v887_v31 = vld [vmem:[#allocation8 + $0x338] sm:$0xff] }
 0x269   :  { %2394 = vmatpush1.bf16.msra.mxu1 %v3132_v60  ;;  %2480 = vmatpush1.bf16.msra.mxu0 %v3134_v62  ;;  %v2936_v60 = vcombine.low %v834_v39, %v838_v40  ;;  %v2938_v62 = vcombine.low %v835_v41, %v839_v42  ;;  %v890_v39 = vld [vmem:[#allocation8 + $0x350] sm:$0xff]  ;;  %v891_v41 = vld [vmem:[#allocation8 + $0x358] sm:$0xff] }
 0x26a   :  { %2492 = vmatprep.subr.bf16.mxu1 %v2889_v63  ;;  %2578 = vmatprep.subr.bf16.mxu0 %v2891_v0  ;;  %v2945_v63 = vcombine.high %v842_v49, %v846_v50  ;;  %v2947_v0 = vcombine.high %v843_v54, %v847_v58  ;;  %v894_v40 = vld [vmem:[#allocation8 + $0x370] sm:$0xff]  ;;  %v895_v42 = vld [vmem:[#allocation8 + $0x378] sm:$0xff] }
 0x26c   :  { %2396 = vmatmul.mubr.bf16.vlgmr.msra.gmra.mrb[4].mxu1 %v3561_v37  ;;  %2482 = vmatmul.mubr.bf16.vlgmr.msra.gmra.mrb[8].mxu0 %v3561_v37 }
 0x26d   :  { %2493 = vmatpush1.bf16.msra.mxu1 %v2888_v53  ;;  %2524 = vmatprep.mubr.bf16.mxu1 %v3563_v43  ;;  %v2944_v53 = vcombine.low %v842_v49, %v846_v50  ;;  %v898_v49 = vld [vmem:[#allocation8 + $0x390] sm:$0xff] }
 0x26e   :  { %2579 = vmatpush1.bf16.msra.mxu0 %v2890_v55  ;;  %2610 = vmatprep.mubr.bf16.mxu0 %v3563_v43  ;;  %v819_v43 = vld [vmem:[#allocation8 + $0x118] sm:$0xff]  ;;  %v2946_v55 = vcombine.low %v843_v54, %v847_v58  ;;  %v902_v50 = vld [vmem:[#allocation8 + $0x3b0] sm:$0xff] }
 0x26f   :  { %2494 = vmatprep.subr.bf16.mxu1 %v2897_v56  ;;  %2580 = vmatprep.subr.bf16.mxu0 %v2899_v57  ;;  %v2923_v25 = vcombine.high %v819_v43, %v823_v21  ;;  %v2922_v34 = vcombine.low %v819_v43, %v823_v21  ;;  %v2953_v56 = vcombine.high %v850_v1, %v854_v2  ;;  %v875_v43 = vld [vmem:[#allocation8 + $0x2d8] sm:$0xff] }
 0x270   :  { %v2955_v57 = vcombine.high %v851_v51, %v855_v52  ;;  %v879_v21 = vld [vmem:[#allocation8 + $0x2f8] sm:$0xff] }
 0x271   :  { %2495 = vmatpush1.bf16.msra.mxu1 %v2896_v7  ;;  %v2952_v7 = vcombine.low %v850_v1, %v854_v2  ;;  %v899_v54 = vld [vmem:[#allocation8 + $0x398] sm:$0xff]  ;;  %v906_v1 = vld [vmem:[#allocation8 + $0x3d0] sm:$0xff] }
 0x272   :  { %2581 = vmatpush1.bf16.msra.mxu0 %v2898_v8  ;;  %2496 = vmatprep.subr.bf16.mxu1 %v2905_v9  ;;  %v2954_v8 = vcombine.low %v851_v51, %v855_v52  ;;  %v2961_v9 = vcombine.high %v858_v3, %v862_v4  ;;  %v903_v58 = vld [vmem:[#allocation8 + $0x3b8] sm:$0xff]  ;;  %v910_v2 = vld [vmem:[#allocation8 + $0x3f0] sm:$0xff] }
 0x273   :  { %2582 = vmatprep.subr.bf16.mxu0 %v2907_v10  ;;  %v2963_v10 = vcombine.high %v859_v5, %v863_v6  ;;  %v907_v51 = vld [vmem:[#allocation8 + $0x3d8] sm:$0xff] }
 0x274   :  { %v911_v52 = vld [vmem:[#allocation8 + $0x3f8] sm:$0xff] }
 0x275   :  { %2497 = vmatpush1.bf16.msra.mxu1 %v2904_v15  ;;  %v2960_v15 = vcombine.low %v858_v3, %v862_v4  ;;  %v914_v3 = vld [vmem:[#allocation8 + $0x410] sm:$0xff] }
 0x276   :  { %2583 = vmatpush1.bf16.msra.mxu0 %v2906_v16  ;;  %2498 = vmatprep.subr.bf16.mxu1 %v2913_v17  ;;  %v2962_v16 = vcombine.low %v859_v5, %v863_v6  ;;  %v2969_v17 = vcombine.high %v866_v11, %v870_v12  ;;  %v918_v4 = vld [vmem:[#allocation8 + $0x430] sm:$0xff]  ;;  %v915_v5 = vld [vmem:[#allocation8 + $0x418] sm:$0xff] }
 0x277   :  { %2584 = vmatprep.subr.bf16.mxu0 %v2915_v18  ;;  %v2971_v18 = vcombine.high %v867_v13, %v871_v14  ;;  %v919_v6 = vld [vmem:[#allocation8 + $0x438] sm:$0xff] }
 0x279   :  { %2499 = vmatpush1.bf16.msra.mxu1 %v2912_v22  ;;  %v2968_v22 = vcombine.low %v866_v11, %v870_v12  ;;  %v922_v11 = vld [vmem:[#allocation8 + $0x450] sm:$0xff] }
 0x27a   :  { %2585 = vmatpush1.bf16.msra.mxu0 %v2914_v23  ;;  %2500 = vmatprep.subr.bf16.mxu1 %v2921_v24  ;;  %v2970_v23 = vcombine.low %v867_v13, %v871_v14  ;;  %v2977_v24 = vcombine.high %v874_v19, %v878_v20  ;;  %v926_v12 = vld [vmem:[#allocation8 + $0x470] sm:$0xff]  ;;  %v3016_v13 = vcombine.low %v914_v3, %v918_v4  ;;  %v923_v14 = vld [vmem:[#allocation8 + $0x458] sm:$0xff] }
 0x27b   :  { %2586 = vmatprep.subr.bf16.mxu0 %v2923_v25  ;;  %v2979_v25 = vcombine.high %v875_v43, %v879_v21 }
 0x27d   :  { %2501 = vmatpush1.bf16.msra.mxu1 %v2920_v33  ;;  %v2976_v33 = vcombine.low %v874_v19, %v878_v20  ;;  %v934_v19 = vld [vmem:[#allocation8 + $0x4b0] sm:$0xff] }
 0x27e   :  { %2587 = vmatpush1.bf16.msra.mxu0 %v2922_v34  ;;  %2502 = vmatprep.subr.bf16.mxu1 %v2929_v35  ;;  %v2978_v34 = vcombine.low %v875_v43, %v879_v21  ;;  %v2985_v35 = vcombine.high %v882_v26, %v886_v27  ;;  %v931_v43 = vld [vmem:[#allocation8 + $0x498] sm:$0xff] }
 0x27f   :  { %2588 = vmatprep.subr.bf16.mxu0 %v2931_v38  ;;  %v2987_v38 = vcombine.high %v883_v28, %v887_v31  ;;  %v935_v21 = vld [vmem:[#allocation8 + $0x4b8] sm:$0xff] }
 0x281   :  { %2503 = vmatpush1.bf16.msra.mxu1 %v2928_v45  ;;  %v2984_v45 = vcombine.low %v882_v26, %v886_v27  ;;  %v938_v26 = vld [vmem:[#allocation8 + $0x4d0] sm:$0xff] }
 0x282   :  { %2589 = vmatpush1.bf16.msra.mxu0 %v2930_v46  ;;  %2504 = vmatprep.subr.bf16.mxu1 %v2937_v47  ;;  %v2986_v46 = vcombine.low %v883_v28, %v887_v31  ;;  %v2993_v47 = vcombine.high %v890_v39, %v894_v40  ;;  %v942_v27 = vld [vmem:[#allocation8 + $0x4f0] sm:$0xff]  ;;  %v939_v28 = vld [vmem:[#allocation8 + $0x4d8] sm:$0xff] }
 0x283   :  { %2590 = vmatprep.subr.bf16.mxu0 %v2939_v48  ;;  %v2995_v48 = vcombine.high %v891_v41, %v895_v42  ;;  %v943_v31 = vld [vmem:[#allocation8 + $0x4f8] sm:$0xff] }
 0x285   :  { %2505 = vmatpush1.bf16.msra.mxu1 %v2936_v60  ;;  %v2992_v60 = vcombine.low %v890_v39, %v894_v40  ;;  %v950_v39 = vld [vmem:[#allocation8 + $0x530] sm:$0xff]  ;;  %v947_v40 = vld [vmem:[#allocation8 + $0x518] sm:$0xff] }
 0x286   :  { %2591 = vmatpush1.bf16.msra.mxu0 %v2938_v62  ;;  %2506 = vmatprep.subr.bf16.mxu1 %v2945_v63  ;;  %v2994_v62 = vcombine.low %v891_v41, %v895_v42  ;;  %v3001_v63 = vcombine.high %v898_v49, %v902_v50  ;;  %v951_v41 = vld [vmem:[#allocation8 + $0x538] sm:$0xff]  ;;  %v3042_v42 = vcombine.low %v939_v28, %v943_v31 }
 0x287   :  { %2592 = vmatprep.subr.bf16.mxu0 %v2947_v0  ;;  %v3003_v0 = vcombine.high %v899_v54, %v903_v58 }
 0x289   :  { %2507 = vmatpush1.bf16.msra.mxu1 %v2944_v53  ;;  %v3000_v53 = vcombine.low %v898_v49, %v902_v50  ;;  %v955_v49 = vld [vmem:[#allocation8 + $0x558] sm:$0xff] }
 0x28a   :  { %2593 = vmatpush1.bf16.msra.mxu0 %v2946_v55  ;;  %2508 = vmatprep.subr.bf16.mxu1 %v2953_v56  ;;  %v3002_v55 = vcombine.low %v899_v54, %v903_v58  ;;  %v3009_v56 = vcombine.high %v906_v1, %v910_v2  ;;  %v959_v50 = vld [vmem:[#allocation8 + $0x578] sm:$0xff]  ;;  %v3050_v58 = vcombine.low %v947_v40, %v951_v41 }
 0x28b   :  { %2594 = vmatprep.subr.bf16.mxu0 %v2955_v57  ;;  %v3011_v57 = vcombine.high %v907_v51, %v911_v52 }
 0x28d   :  { %2509 = vmatpush1.bf16.msra.mxu1 %v2952_v7  ;;  %v3008_v7 = vcombine.low %v906_v1, %v910_v2  ;;  %v963_v1 = vld [vmem:[#allocation8 + $0x598] sm:$0xff] }
 0x28e   :  { %2595 = vmatpush1.bf16.msra.mxu0 %v2954_v8  ;;  %2510 = vmatprep.subr.bf16.mxu1 %v2961_v9  ;;  %v3010_v8 = vcombine.low %v907_v51, %v911_v52  ;;  %v3017_v9 = vcombine.high %v914_v3, %v918_v4  ;;  %v967_v2 = vld [vmem:[#allocation8 + $0x5b8] sm:$0xff]  ;;  %v3058_v52 = vcombine.low %v955_v49, %v959_v50 }
 0x28f   :  { %2596 = vmatprep.subr.bf16.mxu0 %v2963_v10  ;;  %v3019_v10 = vcombine.high %v915_v5, %v919_v6  ;;  %v971_v3 = vld [vmem:[#allocation8 + $0x5d8] sm:$0xff] }
 0x290   :  { %v975_v4 = vld [vmem:[#allocation8 + $0x5f8] sm:$0xff] }
 0x291   :  { %2511 = vmatpush1.bf16.msra.mxu1 %v2960_v15  ;;  %v927_v15 = vld [vmem:[#allocation8 + $0x478] sm:$0xff] }
 0x292   :  { %2597 = vmatpush1.bf16.msra.mxu0 %v2962_v16  ;;  %2512 = vmatprep.subr.bf16.mxu1 %v2969_v17  ;;  %v3018_v16 = vcombine.low %v915_v5, %v919_v6  ;;  %v3025_v17 = vcombine.high %v922_v11, %v926_v12  ;;  %v3027_v20 = vcombine.high %v923_v14, %v927_v15 }
 0x293   :  { %2598 = vmatprep.subr.bf16.mxu0 %v2971_v18  ;;  %v930_v18 = vld [vmem:[#allocation8 + $0x490] sm:$0xff]  ;;  %v3066_v6 = vcombine.low %v963_v1, %v967_v2 }
 0x295   :  { %2513 = vmatpush1.bf16.msra.mxu1 %v2968_v22  ;;  %v3024_v22 = vcombine.low %v922_v11, %v926_v12  ;;  %v979_v11 = vld [vmem:[#allocation8 + $0x618] sm:$0xff] }
 0x296   :  { %2599 = vmatpush1.bf16.msra.mxu0 %v2970_v23  ;;  %2514 = vmatprep.subr.bf16.mxu1 %v2977_v24  ;;  %v3026_v23 = vcombine.low %v923_v14, %v927_v15  ;;  %v3033_v24 = vcombine.high %v930_v18, %v934_v19  ;;  %v983_v12 = vld [vmem:[#allocation8 + $0x638] sm:$0xff]  ;;  %v3074_v14 = vcombine.low %v971_v3, %v975_v4 }
 0x297   :  { %2600 = vmatprep.subr.bf16.mxu0 %v2979_v25  ;;  %v3035_v25 = vcombine.high %v931_v43, %v935_v21 }
 0x299   :  { %2515 = vmatpush1.bf16.msra.mxu1 %v2976_v33  ;;  %v3032_v33 = vcombine.low %v930_v18, %v934_v19  ;;  %v990_v18 = vld [vmem:[#allocation8 + $0x670] sm:$0xff]  ;;  %v987_v19 = vld [vmem:[#allocation8 + $0x658] sm:$0xff] }
 0x29a   :  { %2601 = vmatpush1.bf16.msra.mxu0 %v2978_v34  ;;  %2516 = vmatprep.subr.bf16.mxu1 %v2985_v35  ;;  %v3041_v34 = vcombine.high %v938_v26, %v942_v27  ;;  %v3043_v35 = vcombine.high %v939_v28, %v943_v31 }
 0x29b   :  { %2602 = vmatprep.subr.bf16.mxu0 %v2987_v38  ;;  %v946_v38 = vld [vmem:[#allocation8 + $0x510] sm:$0xff] }
 0x29c   :  { %v3048_v54 = vcombine.low %v946_v38, %v950_v39 }
 0x29d   :  { %2517 = vmatpush1.bf16.msra.mxu1 %v2984_v45  ;;  %v3049_v45 = vcombine.high %v946_v38, %v950_v39  ;;  %v1003_v38 = vld [vmem:[#allocation8 + $0x6d8] sm:$0xff] }
 0x29e   :  { %2603 = vmatpush1.bf16.msra.mxu0 %v2986_v46  ;;  %2518 = vmatprep.subr.bf16.mxu1 %v2993_v47  ;;  %v3051_v46 = vcombine.high %v947_v40, %v951_v41  ;;  %v954_v47 = vld [vmem:[#allocation8 + $0x550] sm:$0xff]  ;;  %v1007_v39 = vld [vmem:[#allocation8 + $0x6f8] sm:$0xff] }
 0x29f   :  { %2604 = vmatprep.subr.bf16.mxu0 %v2995_v48  ;;  %v958_v48 = vld [vmem:[#allocation8 + $0x570] sm:$0xff] }
 0x2a0   :  { %v3056_v51 = vcombine.low %v954_v47, %v958_v48 }
 0x2a1   :  { %2519 = vmatpush1.bf16.msra.mxu1 %v2992_v60  ;;  %v3057_v60 = vcombine.high %v954_v47, %v958_v48  ;;  %v1011_v47 = vld [vmem:[#allocation8 + $0x718] sm:$0xff] }
 0x2a2   :  { %2605 = vmatpush1.bf16.msra.mxu0 %v2994_v62  ;;  %2520 = vmatprep.subr.bf16.mxu1 %v3001_v63  ;;  %v3059_v62 = vcombine.high %v955_v49, %v959_v50  ;;  %v962_v63 = vld [vmem:[#allocation8 + $0x590] sm:$0xff]  ;;  %v1015_v48 = vld [vmem:[#allocation8 + $0x738] sm:$0xff]  ;;  %v3106_v50 = vcombine.low %v1003_v38, %v1007_v39 }
 0x2a3   :  { %2606 = vmatprep.subr.bf16.mxu0 %v3003_v0  ;;  %v966_v0 = vld [vmem:[#allocation8 + $0x5b0] sm:$0xff] }
 0x2a4   :  { %v3064_v5 = vcombine.low %v962_v63, %v966_v0 }
 0x2a5   :  { %2521 = vmatpush1.bf16.msra.mxu1 %v3000_v53  ;;  %v3065_v53 = vcombine.high %v962_v63, %v966_v0  ;;  %v1019_v63 = vld [vmem:[#allocation8 + $0x758] sm:$0xff] }
 0x2a6   :  { %2607 = vmatpush1.bf16.msra.mxu0 %v3002_v55  ;;  %2522 = vmatprep.subr.bf16.mxu1 %v3009_v56  ;;  %v3067_v55 = vcombine.high %v963_v1, %v967_v2  ;;  %v970_v56 = vld [vmem:[#allocation8 + $0x5d0] sm:$0xff]  ;;  %v1023_v0 = vld [vmem:[#allocation8 + $0x778] sm:$0xff]  ;;  %v3114_v2 = vcombine.low %v1011_v47, %v1015_v48 }
 0x2a7   :  { %2608 = vmatprep.subr.bf16.mxu0 %v3011_v57  ;;  %v974_v57 = vld [vmem:[#allocation8 + $0x5f0] sm:$0xff] }
 0x2a9   :  { %2523 = vmatpush1.bf16.msra.mxu1 %v3008_v7  ;;  %v3073_v7 = vcombine.high %v970_v56, %v974_v57 }
 0x2aa   :  { %2609 = vmatpush1.bf16.msra.mxu0 %v3010_v8  ;;  %2535 = vmatprep.subr.bf16.mxu1 %v3017_v9  ;;  %v3075_v8 = vcombine.high %v971_v3, %v975_v4  ;;  %v978_v9 = vld [vmem:[#allocation8 + $0x610] sm:$0xff]  ;;  %v3122_v4 = vcombine.low %v1019_v63, %v1023_v0 }
 0x2ab   :  { %2621 = vmatprep.subr.bf16.mxu0 %v3019_v10  ;;  %v982_v10 = vld [vmem:[#allocation8 + $0x630] sm:$0xff] }
 0x2ac   :  { %2525 = vmatmul.mubr.bf16.vlgmr.msra.gmra.mrb[8].mxu1 %v3559_v36  ;;  %v3081_v15 = vcombine.high %v978_v9, %v982_v10 }
 0x2ad   :  { %2611 = vmatmul.mubr.bf16.vlgmr.msra.gmra.mrb[12].mxu0 %v3559_v36  ;;  %2536 = vmatpush1.bf16.msra.mxu1 %v3016_v13  ;;  %v3034_v36 = vcombine.low %v931_v43, %v935_v21  ;;  %v3072_v13 = vcombine.low %v970_v56, %v974_v57  ;;  %v3080_v43 = vcombine.low %v978_v9, %v982_v10  ;;  %v1027_v56 = vld [vmem:[#allocation8 + $0x798] sm:$0xff] }
 0x2ae   :  { %2567 = vmatprep.mubr.bf16.mxu1 %v3565_v44  ;;  %2622 = vmatpush1.bf16.msra.mxu0 %v3018_v16  ;;  %v3083_v16 = vcombine.high %v979_v11, %v983_v12  ;;  %v3082_v21 = vcombine.low %v979_v11, %v983_v12  ;;  %v1031_v57 = vld [vmem:[#allocation8 + $0x7b8] sm:$0xff] }
 0x2af   :  { %2653 = vmatprep.mubr.bf16.mxu0 %v3565_v44  ;;  %2537 = vmatprep.subr.bf16.mxu1 %v3025_v17  ;;  %v3040_v44 = vcombine.low %v938_v26, %v942_v27  ;;  %v986_v17 = vld [vmem:[#allocation8 + $0x650] sm:$0xff]  ;;  %v995_v26 = vld [vmem:[#allocation8 + $0x698] sm:$0xff]  ;;  %v3130_v12 = vcombine.low %v1027_v56, %v1031_v57 }
 0x2b0   :  { %2623 = vmatprep.subr.bf16.mxu0 %v3027_v20  ;;  %v991_v20 = vld [vmem:[#allocation8 + $0x678] sm:$0xff]  ;;  %v3088_v28 = vcombine.low %v986_v17, %v990_v18 }
 0x2b1   :  { %2538 = vmatpush1.bf16.msra.mxu1 %v3024_v22  ;;  %v3089_v22 = vcombine.high %v986_v17, %v990_v18  ;;  %v999_v27 = vld [vmem:[#allocation8 + $0x6b8] sm:$0xff]  ;;  %v3090_v31 = vcombine.low %v987_v19, %v991_v20  ;;  %v779_v17 = vld [vmem:[%s3620_s6] sm:$0xff]  ;;  %s3419_s6 = smov [#allocation10]  }
 0x2b2   :  { %2624 = vmatpush1.bf16.msra.mxu0 %v3026_v23  ;;  %2539 = vmatprep.subr.bf16.mxu1 %v3033_v24  ;;  %v3091_v23 = vcombine.high %v987_v19, %v991_v20  ;;  %v994_v24 = vld [vmem:[#allocation8 + $0x690] sm:$0xff]  ;;  %v3098_v41 = vcombine.low %v995_v26, %v999_v27  ;;  %v1035_v9 = vld [vmem:[#allocation8 + $0x7d8] sm:$0xff]  ;;  %v2668_v18 = vrot.slane %v779_v17, %v3520_v30  ;;  %s2790_s9 = sshll.u32 %s3419_s6, 4  ;;  %s2791_s9 = int_to_ptr.vmem [resolvable:$true] %s2790_s9 }
 0x2b3   :  { %2625 = vmatprep.subr.bf16.mxu0 %v3035_v25  ;;  %v998_v25 = vld [vmem:[#allocation8 + $0x6b0] sm:$0xff]  ;;  %v1039_v10 = vld [vmem:[#allocation8 + $0x7f8] sm:$0xff]  ;;  %v2676_v19 = vrot.slane %v779_v17, %v737_v59  ;;  %v2672_v20 = vrot.slane %v779_v17, %v3526_v32  ;;  %s3378_s10 = scalar_lea.vmem %s2791_s9, 2048  ;;  %p3383_p5 = scmp.lt.s32.totalorder %s2791_s9, %s2791_s9 }
 0x2b4   :  { %v3096_v40 = vcombine.low %v994_v24, %v998_v25  ;;  %p3379_p4 = scmp.ne.s32.totalorder %s2791_s9, %s3378_s10  ;;  %p3384_p6 = scmp.lt.s32.totalorder %s3378_s10, %s3378_s10 }
 0x2b5   :  { %2540 = vmatpush1.bf16.msra.mxu1 %v3032_v33  ;;  %v3097_v33 = vcombine.high %v994_v24, %v998_v25 }
 0x2b6   :  { %2626 = vmatpush1.bf16.msra.mxu0 %v3034_v36  ;;  %2541 = vmatprep.subr.bf16.mxu1 %v3041_v34  ;;  %v3099_v36 = vcombine.high %v995_v26, %v999_v27  ;;  %v1002_v34 = vld [vmem:[#allocation8 + $0x6d0] sm:$0xff]  ;;  %p3385_p7 = por %p3384_p6, %p3383_p5 }
 0x2b7   :  { %2627 = vmatprep.subr.bf16.mxu0 %v3043_v35  ;;  %v1006_v35 = vld [vmem:[#allocation8 + $0x6f0] sm:$0xff] }
 0x2b8   :  { %v3104_v49 = vcombine.low %v1002_v34, %v1006_v35  ;;  %p3386_p8 = pnand %p3385_p7, %p3379_p4 }
 0x2b9   :  { %2542 = vmatpush1.bf16.msra.mxu1 %v3040_v44  ;;  %v3105_v44 = vcombine.high %v1002_v34, %v1006_v35 }
 0x2ba   :  { %2628 = vmatpush1.bf16.msra.mxu0 %v3042_v42  ;;  %2543 = vmatprep.subr.bf16.mxu1 %v3049_v45  ;;  %v3107_v42 = vcombine.high %v1003_v38, %v1007_v39  ;;  %v1010_v45 = vld [vmem:[#allocation8 + $0x710] sm:$0xff] }
 0x2bb   :  { %2629 = vmatprep.subr.bf16.mxu0 %v3051_v46  ;;  %v1014_v46 = vld [vmem:[#allocation8 + $0x730] sm:$0xff] }
 0x2bc   :  { %v3112_v1 = vcombine.low %v1010_v45, %v1014_v46 }
 0x2bd   :  { %2544 = vmatpush1.bf16.msra.mxu1 %v3048_v54  ;;  %v3113_v54 = vcombine.high %v1010_v45, %v1014_v46 }
 0x2be   :  { %2630 = vmatpush1.bf16.msra.mxu0 %v3050_v58  ;;  %2545 = vmatprep.subr.bf16.mxu1 %v3057_v60  ;;  %v3115_v58 = vcombine.high %v1011_v47, %v1015_v48  ;;  %v1018_v60 = vld [vmem:[#allocation8 + $0x750] sm:$0xff] }
 0x2bf   :  { %2631 = vmatprep.subr.bf16.mxu0 %v3059_v62  ;;  %v1022_v62 = vld [vmem:[#allocation8 + $0x770] sm:$0xff] }
 0x2c0   :  { %v3120_v3 = vcombine.low %v1018_v60, %v1022_v62 }
 0x2c1   :  { %2546 = vmatpush1.bf16.msra.mxu1 %v3056_v51  ;;  %v3121_v51 = vcombine.high %v1018_v60, %v1022_v62  ;;  %v2683_v60 = vsub.s32 4, %v3517_v29  ;;  %v2691_v62 = vsub.s32 6, %v3517_v29 }
 0x2c2   :  { %2632 = vmatpush1.bf16.msra.mxu0 %v3058_v52  ;;  %2547 = vmatprep.subr.bf16.mxu1 %v3065_v53  ;;  %v3123_v52 = vcombine.high %v1019_v63, %v1023_v0  ;;  %v1026_v53 = vld [vmem:[#allocation8 + $0x790] sm:$0xff]  ;;  %v2687_v63 = vsub.s32 5, %v3517_v29  ;;  %v2695_v0 = vsub.s32 7, %v3517_v29 }
 0x2c3   :  { %2633 = vmatprep.subr.bf16.mxu0 %v3067_v55  ;;  %v1030_v55 = vld [vmem:[#allocation8 + $0x7b0] sm:$0xff] }
 0x2c4   :  { %v3128_v11 = vcombine.low %v1026_v53, %v1030_v55 }
 0x2c5   :  { %2548 = vmatpush1.bf16.msra.mxu1 %v3064_v5  ;;  %v3129_v5 = vcombine.high %v1026_v53, %v1030_v55 }
 0x2c6   :  { %2634 = vmatpush1.bf16.msra.mxu0 %v3066_v6  ;;  %2549 = vmatprep.subr.bf16.mxu1 %v3073_v7  ;;  %v3131_v6 = vcombine.high %v1027_v56, %v1031_v57  ;;  %v1034_v7 = vld [vmem:[#allocation8 + $0x7d0] sm:$0xff] }
 0x2c7   :  { %2635 = vmatprep.subr.bf16.mxu0 %v3075_v8  ;;  %v1038_v8 = vld [vmem:[#allocation8 + $0x7f0] sm:$0xff] }
 0x2c9   :  { %2550 = vmatpush1.bf16.msra.mxu1 %v3072_v13  ;;  %v3137_v13 = vcombine.high %v1034_v7, %v1038_v8 }
 0x2ca   :  { %2636 = vmatpush1.bf16.msra.mxu0 %v3074_v14  ;;  %2551 = vmatprep.subr.bf16.mxu1 %v3081_v15  ;;  %v3139_v14 = vcombine.high %v1035_v9, %v1039_v10  ;;  %v3136_v15 = vcombine.low %v1034_v7, %v1038_v8 }
 0x2cb   :  { %2637 = vmatprep.subr.bf16.mxu0 %v3083_v16  ;;  %v3138_v16 = vcombine.low %v1035_v9, %v1039_v10 }
 0x2cd   :  { %2552 = vmatpush1.bf16.msra.mxu1 %v3080_v43  ;;  %v2680_v43 = vrot.slane %v779_v17, %v741_v61 }
 0x2ce   :  { %2638 = vmatpush1.bf16.msra.mxu0 %v3082_v21  ;;  %2553 = vmatprep.subr.bf16.mxu1 %v3089_v22 }
 0x2cf   :  { %2639 = vmatprep.subr.bf16.mxu0 %v3091_v23 }
 0x2d1   :  { %2554 = vmatpush1.bf16.msra.mxu1 %v3088_v28 }
 0x2d2   :  { %2640 = vmatpush1.bf16.msra.mxu0 %v3090_v31  ;;  %2555 = vmatprep.subr.bf16.mxu1 %v3097_v33 }
 0x2d3   :  { %2641 = vmatprep.subr.bf16.mxu0 %v3099_v36 }
 0x2d5   :  { %2556 = vmatpush1.bf16.msra.mxu1 %v3096_v40 }
 0x2d6   :  { %2642 = vmatpush1.bf16.msra.mxu0 %v3098_v41  ;;  %2557 = vmatprep.subr.bf16.mxu1 %v3105_v44 }
 0x2d7   :  { %2643 = vmatprep.subr.bf16.mxu0 %v3107_v42 }
 0x2d9   :  { %2558 = vmatpush1.bf16.msra.mxu1 %v3104_v49 }
 0x2da   :  { %2644 = vmatpush1.bf16.msra.mxu0 %v3106_v50  ;;  %2559 = vmatprep.subr.bf16.mxu1 %v3113_v54 }
 0x2db   :  { %2645 = vmatprep.subr.bf16.mxu0 %v3115_v58 }
 0x2dd   :  { %2560 = vmatpush1.bf16.msra.mxu1 %v3112_v1  ;;  %v2684_v1 = vrot.slane %v779_v17, %v2683_v60 }
 0x2de   :  { %2646 = vmatpush1.bf16.msra.mxu0 %v3114_v2  ;;  %2561 = vmatprep.subr.bf16.mxu1 %v3121_v51  ;;  %v2692_v2 = vrot.slane %v779_v17, %v2691_v62  ;;  %v2688_v51 = vrot.slane %v779_v17, %v2687_v63 }
 0x2df   :  { %2647 = vmatprep.subr.bf16.mxu0 %v3123_v52  ;;  %v2696_v52 = vrot.slane %v779_v17, %v2695_v0 }
 0x2e1   :  { %2562 = vmatpush1.bf16.msra.mxu1 %v3120_v3 }
 0x2e2   :  { %2648 = vmatpush1.bf16.msra.mxu0 %v3122_v4  ;;  %2563 = vmatprep.subr.bf16.mxu1 %v3129_v5 }
 0x2e3   :  { %2649 = vmatprep.subr.bf16.mxu0 %v3131_v6 }
 0x2e5   :  { %2564 = vmatpush1.bf16.msra.mxu1 %v3128_v11 }
 0x2e6   :  { %2650 = vmatpush1.bf16.msra.mxu0 %v3130_v12  ;;  %2565 = vmatprep.subr.bf16.mxu1 %v3137_v13 }
 0x2e7   :  { %2651 = vmatprep.subr.bf16.mxu0 %v3139_v14 }
 0x2e9   :  { %2566 = vmatpush1.bf16.msra.mxu1 %v3136_v15 }
 0x2ea   :  { %2652 = vmatpush1.bf16.msra.mxu0 %v3138_v16 }
 0x2ec   :  { %2568 = vmatmul.mubr.bf16.vlgmr.msra.gmra.mrb[8].mxu1 %v3561_v37 }
 0x2ed   :  { %2654 = vmatmul.mubr.bf16.vlgmr.msra.gmra.mrb[12].mxu0 %v3561_v37 }
 0x33f   :  { %v2397_v21 = vpop.f32.mrb[4].mxu1  ;;  %v2483_v22 = vpop.f32.mrb[8].mxu0 }
 0x340   :  { %v2705_v23 = vadd.f32 %v2668_v18, %v2397_v21  ;;  %v2707_v24 = vadd.f32 %v2676_v19, %v2483_v22  ;;  %v2399_v25 = vpop.f32.mrb[5].mxu1  ;;  %v2485_v37 = vpop.f32.mrb[9].mxu0 }
 0x341   :  { %v2706_v26 = vadd.f32 %v2672_v20, %v2399_v25  ;;  %v2708_v27 = vadd.f32 %v2680_v43, %v2485_v37  ;;  %v2401_v28 = vpop.f32.mrb[6].mxu1  ;;  %v2487_v31 = vpop.f32.mrb[10].mxu0 }
 0x342   :  { %vm2721_vm12 = vcmp.gt.f32.partialorder %v2705_v23, 0.0  ;;  %v2737_v30 = vmul.f32 0.01, %v2705_v23  ;;  %vm2723_vm13 = vcmp.gt.f32.partialorder %v2707_v24, 0.0  ;;  %v2739_v33 = vmul.f32 0.01, %v2707_v24 }
 0x343   :  { %vm2722_vm14 = vcmp.gt.f32.partialorder %v2706_v26, 0.0  ;;  %v2738_v59 = vmul.f32 0.01, %v2706_v26  ;;  %vm2724_vm15 = vcmp.gt.f32.partialorder %v2708_v27, 0.0  ;;  %v2740_v32 = vmul.f32 0.01, %v2708_v27 }
 0x344   :  { %v2753_v36 = vsel %vm2721_vm12, %v2705_v23, %v2737_v30  ;;  %v2755_v61 = vsel %vm2723_vm13, %v2707_v24, %v2739_v33  ;;  %v2713_v34 = vadd.f32 %v2668_v18, %v2401_v28  ;;  %v2715_v35 = vadd.f32 %v2676_v19, %v2487_v31  ;;  %v2403_v38 = vpop.f32.mrb[7].mxu1  ;;  %v2489_v39 = vpop.f32.mrb[11].mxu0 }
 0x345   :  { %2769 = vst [vmem:[#allocation10] sm:$0xff] %v2753_v36  ;;  %2771 = vst [vmem:[#allocation10 + $0x10] sm:$0xff] %v2755_v61  ;;  %v2754_v40 = vsel %vm2722_vm14, %v2706_v26, %v2738_v59  ;;  %v2756_v41 = vsel %vm2724_vm15, %v2708_v27, %v2740_v32  ;;  %v2714_v44 = vadd.f32 %v2672_v20, %v2403_v38 }
 0x346   :  { %v2716_v42 = vadd.f32 %v2680_v43, %v2489_v39  ;;  %2770 = vst [vmem:[#allocation10 + $0x8] sm:$0xff] %v2754_v40  ;;  %2772 = vst [vmem:[#allocation10 + $0x18] sm:$0xff] %v2756_v41  ;;  %vm2729_vm0 = vcmp.gt.f32.partialorder %v2713_v34, 0.0  ;;  %v2745_v45 = vmul.f32 0.01, %v2713_v34  ;;  %vm2731_vm1 = vcmp.gt.f32.partialorder %v2715_v35, 0.0 }
 0x347   :  { %v2747_v46 = vmul.f32 0.01, %v2715_v35  ;;  %vm2730_vm2 = vcmp.gt.f32.partialorder %v2714_v44, 0.0  ;;  %v2746_v47 = vmul.f32 0.01, %v2714_v44 }
 0x348   :  { %vm2732_vm3 = vcmp.gt.f32.partialorder %v2716_v42, 0.0  ;;  %v2748_v48 = vmul.f32 0.01, %v2716_v42  ;;  %v2761_v49 = vsel %vm2729_vm0, %v2713_v34, %v2745_v45 }
 0x349   :  { %v2763_v50 = vsel %vm2731_vm1, %v2715_v35, %v2747_v46  ;;  %2777 = vst [vmem:[#allocation10 + $0x40] sm:$0xff] %v2761_v49  ;;  %v2762_v54 = vsel %vm2730_vm2, %v2714_v44, %v2746_v47 }
 0x34a   :  { %2779 = vst [vmem:[#allocation10 + $0x50] sm:$0xff] %v2763_v50  ;;  %v2764_v58 = vsel %vm2732_vm3, %v2716_v42, %v2748_v48  ;;  %2778 = vst [vmem:[#allocation10 + $0x48] sm:$0xff] %v2762_v54 }
 0x34b   :  { %2780 = vst [vmem:[#allocation10 + $0x58] sm:$0xff] %v2764_v58 }
 0x3bf   :  { %v2569_v53 = vpop.f32.mrb[8].mxu1 }
 0x3c0   :  { %v2709_v55 = vadd.f32 %v2684_v1, %v2569_v53  ;;  %v2655_v56 = vpop.f32.mrb[12].mxu0  ;;  %v2571_v57 = vpop.f32.mrb[9].mxu1 }
 0x3c1   :  { %v2711_v3 = vadd.f32 %v2692_v2, %v2655_v56  ;;  %v2710_v4 = vadd.f32 %v2688_v51, %v2571_v57  ;;  %v2657_v5 = vpop.f32.mrb[13].mxu0  ;;  %v2573_v6 = vpop.f32.mrb[10].mxu1 }
 0x3c2   :  { %vm2725_vm4 = vcmp.gt.f32.partialorder %v2709_v55, 0.0  ;;  %v2741_v7 = vmul.f32 0.01, %v2709_v55  ;;  %v2712_v8 = vadd.f32 %v2696_v52, %v2657_v5  ;;  %v2717_v9 = vadd.f32 %v2684_v1, %v2573_v6  ;;  %v2659_v10 = vpop.f32.mrb[14].mxu0  ;;  %v2575_v11 = vpop.f32.mrb[11].mxu1 }
 0x3c3   :  { %vm2727_vm5 = vcmp.gt.f32.partialorder %v2711_v3, 0.0  ;;  %v2743_v29 = vmul.f32 0.01, %v2711_v3  ;;  %vm2726_vm6 = vcmp.gt.f32.partialorder %v2710_v4, 0.0  ;;  %v2742_v12 = vmul.f32 0.01, %v2710_v4 }
 0x3c4   :  { %v2757_v13 = vsel %vm2725_vm4, %v2709_v55, %v2741_v7  ;;  %vm2728_vm7 = vcmp.gt.f32.partialorder %v2712_v8, 0.0  ;;  %v2744_v14 = vmul.f32 0.01, %v2712_v8  ;;  %vm2733_vm8 = vcmp.gt.f32.partialorder %v2717_v9, 0.0  ;;  %v2661_v15 = vpop.f32.mrb[15].mxu0 }
 0x3c5   :  { %2773 = vst [vmem:[#allocation10 + $0x20] sm:$0xff] %v2757_v13  ;;  %v2759_v16 = vsel %vm2727_vm5, %v2711_v3, %v2743_v29  ;;  %v2758_v17 = vsel %vm2726_vm6, %v2710_v4, %v2742_v12  ;;  %v2749_v18 = vmul.f32 0.01, %v2717_v9  ;;  %v2719_v19 = vadd.f32 %v2692_v2, %v2659_v10 }
 0x3c6   :  { %2775 = vst [vmem:[#allocation10 + $0x30] sm:$0xff] %v2759_v16  ;;  %2774 = vst [vmem:[#allocation10 + $0x28] sm:$0xff] %v2758_v17  ;;  %v2760_v20 = vsel %vm2728_vm7, %v2712_v8, %v2744_v14  ;;  %v2718_v43 = vadd.f32 %v2688_v51, %v2575_v11  ;;  %v2720_v21 = vadd.f32 %v2696_v52, %v2661_v15 }
 0x3c7   :  { %2776 = vst [vmem:[#allocation10 + $0x38] sm:$0xff] %v2760_v20  ;;  %v2765_v22 = vsel %vm2733_vm8, %v2717_v9, %v2749_v18  ;;  %vm2735_vm9 = vcmp.gt.f32.partialorder %v2719_v19, 0.0  ;;  %v2751_v23 = vmul.f32 0.01, %v2719_v19 }
 0x3c8   :  { %2781 = vst [vmem:[#allocation10 + $0x60] sm:$0xff] %v2765_v22  ;;  %vm2734_vm10 = vcmp.gt.f32.partialorder %v2718_v43, 0.0  ;;  %v2750_v24 = vmul.f32 0.01, %v2718_v43  ;;  %vm2736_vm11 = vcmp.gt.f32.partialorder %v2720_v21, 0.0 }
 0x3c9   :  { %v2752_v25 = vmul.f32 0.01, %v2720_v21  ;;  %v2767_v37 = vsel %vm2735_vm9, %v2719_v19, %v2751_v23 }
 0x3ca   :  { %2783 = vst [vmem:[#allocation10 + $0x70] sm:$0xff] %v2767_v37  ;;  %v2766_v26 = vsel %vm2734_vm10, %v2718_v43, %v2750_v24 }
 0x3cb   :  { %v2768_v27 = vsel %vm2736_vm11, %v2720_v21, %v2752_v25  ;;  %2782 = vst [vmem:[#allocation10 + $0x68] sm:$0xff] %v2766_v26 }
 0x3cc   :  { %2784 = vst [vmem:[#allocation10 + $0x78] sm:$0xff] %v2768_v27 }
 0x3cd   :  { %3389 = shalt.err (!%p3386_p8)
}
 0x3ce   :  { %s3390_s15 = scalar_lea.hbm %s3621_s7, 2048 }
 0x3cf   :  { %p3391_p9 = scmp.ne.s32.totalorder %s3621_s7, %s3390_s15  ;;  %p3394_p10 = scmp.lt.u32.totalorder %s3390_s15, %s3621_s7 }
 0x3d1   :  { %p3396_p11 = pnand %p3394_p10, %p3391_p9 }
 0x3d3   :  { %3399 = shalt.err (!%p3396_p11)
}
 0x3d4   :  { %s3420_s16 = smov 1024   ;;  %s3421_s17 = smov 64  }
 0x3d5   :  { %2796 = dma.vmem_to_hbm [thread:$0]  %s2791_s9, 2048, %s3621_s7, [#allocation4], %s3420_s16, %s3420_s16, %s3421_s17  }
 0x3d6   :  { %3406 = dma.done.wait [#allocation4], 2048  }
 0x3d7   :  { %3407 = vsyncadd [#allocation4], 4294965248 }
 0x3d8   :  { %2800 = vsyncpa [#allocation3], 1 }
 0x3d9   :  { %2801 = vsyncpa [#allocation6], 1 }
 0x3da   :  { %2802 = vsyncpa [#allocation9], 1 }
 0x3db   :  { %2803 = vsyncpa [#allocation4], 1 }

// kernel: decoder_forward.1
= control target key start
LH: loop header
LB: loop body
LE: loop exit
PB: predicated region body
PF: predicated region fallthrough
CT: control target
= control target key end

     0   :  { %12 = vsyncpa [#allocation3], 0  ;;  %s3614_s0 = inlined_call_operand.hbm [shape: f32[16,128], index: 0, kind: input, shape index: {}]   ;;  %s3615_s1 = inlined_call_operand.hbm [shape: bf16[128,256], index: 1, kind: input, shape index: {}]   ;;  %s3616_s2 = inlined_call_operand.vmem [shape: f32[1,256], index: 2, kind: input, shape index: {}]   ;;  %s3617_s3 = inlined_call_operand.hbm [shape: bf16[256,512], index: 3, kind: input, shape index: {}]   ;;  %s3618_s4 = inlined_call_operand.vmem [shape: f32[1,512], index: 4, kind: input, shape index: {}]   ;;  %s3619_s5 = inlined_call_operand.hbm [shape: bf16[512,1024], index: 5, kind: input, shape index: {}]   ;;  %s3620_s6 = inlined_call_operand.vmem [shape: f32[1,1024], index: 6, kind: input, shape index: {}]   ;;  %s3621_s7 = inlined_call_operand.hbm [shape: f32[16,1024], index: 7, kind: output, shape index: {}]  }
   0x1   :  { %13 = vsyncpa [#allocation6], 0 }
   0x2   :  { %14 = vsyncpa [#allocation9], 0 }
   0x3   :  { %15 = vsyncpa [#allocation4], 0  ;;  %s3408_s24 = smov [#allocation5]   ;;  %s3409_s26 = smov [#allocation2]  }
   0x4   :  { %s33_s25 = sshll.u32 %s3408_s24, 4  ;;  %s21_s27 = sshll.u32 %s3409_s26, 4  ;;  %s34_s25 = int_to_ptr.vmem [resolvable:$true] %s33_s25  ;;  %s3462_s27 = int_to_ptr.vmem [resolvable:$true] %s21_s27 }
   0x5   :  { %s3290_s30 = scalar_lea.hbm %s3615_s1, 2048 }
   0x6   :  { %p3291_p0 = scmp.ne.s32.totalorder %s3615_s1, %s3290_s30  ;;  %p3294_p1 = scmp.lt.u32.totalorder %s3290_s30, %s3615_s1 }
   0x8   :  { %p3296_p2 = pnand %p3294_p1, %p3291_p0 }
   0xa   :  { %3299 = shalt.err (!%p3296_p2)
}
   0xb   :  { %s3300_s12 = scalar_lea.vmem %s34_s25, 2048  ;;  %p3305_p4 = scmp.lt.s32.totalorder %s34_s25, %s34_s25 }
   0xc   :  { %p3301_p3 = scmp.ne.s32.totalorder %s34_s25, %s3300_s12  ;;  %p3306_p5 = scmp.lt.s32.totalorder %s3300_s12, %s3300_s12 }
   0xe   :  { %p3307_p6 = por %p3306_p5, %p3305_p4 }
  0x10   :  { %p3308_p7 = pnand %p3307_p6, %p3301_p3 }
  0x12   :  { %3311 = shalt.err (!%p3308_p7)
}
  0x13   :  { %s3410_s13 = smov 128   ;;  %s3411_s14 = smov 8  }
  0x14   :  { %39 = dma.hbm_to_vmem [thread:$0]  %s3615_s1, 2048, %s34_s25, [#allocation6], %s3410_s13, %s3410_s13, %s3411_s14  }
  0x15   :  { %s3312_s19 = scalar_lea.hbm %s3614_s0, 256 }
  0x16   :  { %p3313_p8 = scmp.ne.s32.totalorder %s3614_s0, %s3312_s19  ;;  %p3316_p9 = scmp.lt.u32.totalorder %s3312_s19, %s3614_s0 }
  0x18   :  { %p3318_p10 = pnand %p3316_p9, %p3313_p8 }
  0x1a   :  { %3321 = shalt.err (!%p3318_p10)
}
  0x1b   :  { %s3322_s24 = scalar_lea.vmem %s3462_s27, 256  ;;  %p3327_p12 = scmp.lt.s32.totalorder %s3462_s27, %s3462_s27 }
  0x1c   :  { %p3323_p11 = scmp.ne.s32.totalorder %s3462_s27, %s3322_s24  ;;  %p3328_p13 = scmp.lt.s32.totalorder %s3322_s24, %s3322_s24 }
  0x1e   :  { %p3329_p0 = por %p3328_p13, %p3327_p12 }
  0x20   :  { %p3330_p1 = pnand %p3329_p0, %p3323_p11 }
  0x22   :  { %3333 = shalt.err (!%p3330_p1)
}
  0x23   :  { %27 = dma.hbm_to_vmem [thread:$0]  %s3614_s0, 256, %s3462_s27, [#allocation3], %s3410_s13, %s3410_s13, %s3411_s14  }
  0x24   :  { %s3412_s26 = smov [#allocation7]   ;;  %s3334_s8 = scalar_lea.hbm %s3617_s3, 8192 }
  0x25   :  { %s47_s28 = sshll.u32 %s3412_s26, 4  ;;  %p3335_p2 = scmp.ne.s32.totalorder %s3617_s3, %s3334_s8  ;;  %s48_s28 = int_to_ptr.vmem [resolvable:$true] %s47_s28 }
  0x26   :  { %p3338_p3 = scmp.lt.u32.totalorder %s3334_s8, %s3617_s3 }
  0x28   :  { %p3340_p4 = pnand %p3338_p3, %p3335_p2 }
  0x2a   :  { %3343 = shalt.err (!%p3340_p4)
}
  0x2b   :  { %s3344_s15 = scalar_lea.vmem %s48_s28, 8192  ;;  %p3349_p6 = scmp.lt.s32.totalorder %s48_s28, %s48_s28 }
  0x2c   :  { %p3345_p5 = scmp.ne.s32.totalorder %s48_s28, %s3344_s15  ;;  %p3350_p7 = scmp.lt.s32.totalorder %s3344_s15, %s3344_s15 }
  0x2e   :  { %p3351_p8 = por %p3350_p7, %p3349_p6 }
  0x30   :  { %p3352_p9 = pnand %p3351_p8, %p3345_p5 }
  0x32   :  { %3355 = shalt.err (!%p3352_p9)
}
  0x33   :  { %s3413_s0 = smov 256   ;;  %s3414_s27 = smov 16  }
  0x34   :  { %53 = dma.hbm_to_vmem [thread:$0]  %s3617_s3, 8192, %s48_s28, [#allocation6], %s3413_s0, %s3413_s0, %s3414_s27  }
  0x35   :  { %s3415_s16 = smov [#allocation8]   ;;  %s3356_s20 = scalar_lea.hbm %s3619_s5, 32768 }
  0x36   :  { %s61_s17 = sshll.u32 %s3415_s16, 4  ;;  %p3357_p10 = scmp.ne.s32.totalorder %s3619_s5, %s3356_s20  ;;  %s62_s17 = int_to_ptr.vmem [resolvable:$true] %s61_s17 }
  0x37   :  { %p3360_p11 = scmp.lt.u32.totalorder %s3356_s20, %s3619_s5 }
  0x39   :  { %p3362_p12 = pnand %p3360_p11, %p3357_p10 }
  0x3b   :  { %3365 = shalt.err (!%p3362_p12)
}
  0x3c   :  { %s3366_s1 = scalar_lea.vmem %s62_s17, 32768  ;;  %p3371_p0 = scmp.lt.s32.totalorder %s62_s17, %s62_s17 }
  0x3d   :  { %p3367_p13 = scmp.ne.s32.totalorder %s62_s17, %s3366_s1  ;;  %p3372_p1 = scmp.lt.s32.totalorder %s3366_s1, %s3366_s1 }
  0x3f   :  { %p3373_p2 = por %p3372_p1, %p3371_p0 }
  0x41   :  { %p3374_p3 = pnand %p3373_p2, %p3367_p13 }
  0x43   :  { %3377 = shalt.err (!%p3374_p3)
}
  0x44   :  { %s3416_s3 = smov 512   ;;  %s3417_s25 = smov 32  }
  0x45   :  { %67 = dma.hbm_to_vmem [thread:$0]  %s3619_s5, 32768, %s62_s17, [#allocation9], %s3416_s3, %s3416_s3, %s3417_s25  }
  0x46   :  { %3400 = dma.done.wait [#allocation3], 256  }
  0x47   :  { %3401 = vsyncadd [#allocation3], 4294967040 }
  0x48   :  { %3402 = dma.done.wait [#allocation6], 10240  }
  0x49   :  { %3403 = vsyncadd [#allocation6], 4294957056 }
  0x4a   :  { %3404 = dma.done.wait [#allocation9], 32768  }
  0x4b   :  { %3405 = vsyncadd [#allocation9], 4294934528  ;;  %v3418_v0 = vmov 0   ;;  %v3170_v1 = vld [vmem:[#allocation5 + $0x4] ss:$8 sps:$4 sm:$0xff]   ;;  %v83_v26 = vld [vmem:[#allocation2] sm:$0xff] }
  0x4c   :  { %215 = vmatprep.mubr.bf16.mxu0 %v3418_v0  ;;  %v3172_v2 = vld [vmem:[#allocation5] ss:$8 sps:$4 sm:$0xff]   ;;  %183 = vmatprep.subr.bf16.mxu0 %v3170_v1  ;;  %v3173_v3 = vld [vmem:[#allocation5 + $0x14] ss:$8 sps:$4 sm:$0xff]   ;;  %v3175_v4 = vld [vmem:[#allocation5 + $0x10] ss:$8 sps:$4 sm:$0xff]  }
  0x4d   :  { %184 = vmatpush1.bf16.msra.mxu0 %v3172_v2  ;;  %v3176_v5 = vld [vmem:[#allocation5 + $0x24] ss:$8 sps:$4 sm:$0xff]   ;;  %v3178_v6 = vld [vmem:[#allocation5 + $0x20] ss:$8 sps:$4 sm:$0xff]   ;;  %v3179_v7 = vld [vmem:[#allocation5 + $0x34] ss:$8 sps:$4 sm:$0xff]  }
  0x4e   :  { %185 = vmatprep.subr.bf16.mxu0 %v3173_v3  ;;  %v3181_v8 = vld [vmem:[#allocation5 + $0x30] ss:$8 sps:$4 sm:$0xff]   ;;  %v3182_v9 = vld [vmem:[#allocation5 + $0x44] ss:$8 sps:$4 sm:$0xff]   ;;  %v3184_v13 = vld [vmem:[#allocation5 + $0x40] ss:$8 sps:$4 sm:$0xff]  }
  0x4f   :  { %v3194_v10 = vld [vmem:[#allocation7 + $0x4] ss:$16 sps:$4 sm:$0xff]   ;;  %v3199_v11 = vld [vmem:[#allocation7] ss:$16 sps:$4 sm:$0xff]   ;;  %v84_v27 = vld [vmem:[#allocation2 + $0x8] sm:$0xff] }
  0x50   :  { %640 = vmatprep.subr.bf16.mxu1 %v3194_v10  ;;  %v3200_v12 = vld [vmem:[#allocation7 + $0x24] ss:$16 sps:$4 sm:$0xff]   ;;  %v3205_v15 = vld [vmem:[#allocation7 + $0x20] ss:$16 sps:$4 sm:$0xff]   ;;  %v3198_v28 = vld [vmem:[#allocation7 + $0xc] ss:$16 sps:$4 sm:$0xff]   ;;  %v85_v31 = vpack.c.bf16 %v84_v27, %v83_v26 }
  0x51   :  { %186 = vmatpush1.bf16.msra.mxu0 %v3175_v4  ;;  %641 = vmatpush1.bf16.msra.mxu1 %v3199_v11  ;;  %v3185_v14 = vld [vmem:[#allocation5 + $0x54] ss:$8 sps:$4 sm:$0xff]   ;;  %v3187_v17 = vld [vmem:[#allocation5 + $0x50] ss:$8 sps:$4 sm:$0xff]   ;;  %v3188_v18 = vld [vmem:[#allocation5 + $0x64] ss:$8 sps:$4 sm:$0xff]  }
  0x52   :  { %187 = vmatprep.subr.bf16.mxu0 %v3176_v5  ;;  %642 = vmatprep.subr.bf16.mxu1 %v3200_v12  ;;  %v3206_v16 = vld [vmem:[#allocation7 + $0x44] ss:$16 sps:$4 sm:$0xff]   ;;  %v3211_v19 = vld [vmem:[#allocation7 + $0x40] ss:$16 sps:$4 sm:$0xff]   ;;  %v3196_v32 = vld [vmem:[#allocation7 + $0x8] ss:$16 sps:$4 sm:$0xff]  }
  0x53   :  { %v3212_v20 = vld [vmem:[#allocation7 + $0x64] ss:$16 sps:$4 sm:$0xff]   ;;  %v3190_v21 = vld [vmem:[#allocation5 + $0x60] ss:$8 sps:$4 sm:$0xff]   ;;  %v3193_v25 = vld [vmem:[#allocation5 + $0x70] ss:$8 sps:$4 sm:$0xff]  }
  0x54   :  { %v3217_v22 = vld [vmem:[#allocation7 + $0x60] ss:$16 sps:$4 sm:$0xff]   ;;  %v3191_v23 = vld [vmem:[#allocation5 + $0x74] ss:$8 sps:$4 sm:$0xff]   ;;  %v3202_v36 = vld [vmem:[#allocation7 + $0x28] ss:$16 sps:$4 sm:$0xff]  }
  0x55   :  { %188 = vmatpush1.bf16.msra.mxu0 %v3178_v6  ;;  %643 = vmatpush1.bf16.msra.mxu1 %v3205_v15  ;;  %v3218_v24 = vld [vmem:[#allocation7 + $0x84] ss:$16 sps:$4 sm:$0xff]   ;;  %v3223_v29 = vld [vmem:[#allocation7 + $0x80] ss:$16 sps:$4 sm:$0xff]   ;;  %v3204_v34 = vld [vmem:[#allocation7 + $0x2c] ss:$16 sps:$4 sm:$0xff]  }
  0x56   :  { %189 = vmatprep.subr.bf16.mxu0 %v3179_v7  ;;  %644 = vmatprep.subr.bf16.mxu1 %v3206_v16  ;;  %v3224_v30 = vld [vmem:[#allocation7 + $0xa4] ss:$16 sps:$4 sm:$0xff]   ;;  %v3229_v33 = vld [vmem:[#allocation7 + $0xa0] ss:$16 sps:$4 sm:$0xff]   ;;  %v3210_v37 = vld [vmem:[#allocation7 + $0x4c] ss:$16 sps:$4 sm:$0xff]  }
  0x57   :  { %v3230_v35 = vld [vmem:[#allocation7 + $0xc4] ss:$16 sps:$4 sm:$0xff]   ;;  %v3235_v38 = vld [vmem:[#allocation7 + $0xc0] ss:$16 sps:$4 sm:$0xff]   ;;  %v3208_v40 = vld [vmem:[#allocation7 + $0x48] ss:$16 sps:$4 sm:$0xff]  }
  0x58   :  { %v3236_v39 = vld [vmem:[#allocation7 + $0xe4] ss:$16 sps:$4 sm:$0xff]   ;;  %v3241_v41 = vld [vmem:[#allocation7 + $0xe0] ss:$16 sps:$4 sm:$0xff]   ;;  %v3216_v42 = vld [vmem:[#allocation7 + $0x6c] ss:$16 sps:$4 sm:$0xff]  }
  0x59   :  { %190 = vmatpush1.bf16.msra.mxu0 %v3181_v8  ;;  %645 = vmatpush1.bf16.msra.mxu1 %v3211_v19  ;;  %v3242_v43 = vld [vmem:[#allocation7 + $0x104] ss:$16 sps:$4 sm:$0xff]   ;;  %v3214_v44 = vld [vmem:[#allocation7 + $0x68] ss:$16 sps:$4 sm:$0xff]   ;;  %v3222_v45 = vld [vmem:[#allocation7 + $0x8c] ss:$16 sps:$4 sm:$0xff]  }
  0x5a   :  { %191 = vmatprep.subr.bf16.mxu0 %v3182_v9  ;;  %646 = vmatprep.subr.bf16.mxu1 %v3212_v20  ;;  %v3247_v46 = vld [vmem:[#allocation7 + $0x100] ss:$16 sps:$4 sm:$0xff]   ;;  %v3248_v47 = vld [vmem:[#allocation7 + $0x124] ss:$16 sps:$4 sm:$0xff]   ;;  %v3220_v48 = vld [vmem:[#allocation7 + $0x88] ss:$16 sps:$4 sm:$0xff]  }
  0x5b   :  { %v3253_v49 = vld [vmem:[#allocation7 + $0x120] ss:$16 sps:$4 sm:$0xff]   ;;  %v3228_v50 = vld [vmem:[#allocation7 + $0xac] ss:$16 sps:$4 sm:$0xff]   ;;  %v3254_v51 = vld [vmem:[#allocation7 + $0x144] ss:$16 sps:$4 sm:$0xff]  }
  0x5c   :  { %v3226_v52 = vld [vmem:[#allocation7 + $0xa8] ss:$16 sps:$4 sm:$0xff]   ;;  %v3259_v53 = vld [vmem:[#allocation7 + $0x140] ss:$16 sps:$4 sm:$0xff]   ;;  %v3234_v54 = vld [vmem:[#allocation7 + $0xcc] ss:$16 sps:$4 sm:$0xff]  }
  0x5d   :  { %192 = vmatpush1.bf16.msra.mxu0 %v3184_v13  ;;  %647 = vmatpush1.bf16.msra.mxu1 %v3217_v22  ;;  %v3260_v55 = vld [vmem:[#allocation7 + $0x164] ss:$16 sps:$4 sm:$0xff]   ;;  %v3232_v56 = vld [vmem:[#allocation7 + $0xc8] ss:$16 sps:$4 sm:$0xff]   ;;  %v3265_v57 = vld [vmem:[#allocation7 + $0x160] ss:$16 sps:$4 sm:$0xff]  }
  0x5e   :  { %193 = vmatprep.subr.bf16.mxu0 %v3185_v14  ;;  %648 = vmatprep.subr.bf16.mxu1 %v3218_v24  ;;  %v3240_v58 = vld [vmem:[#allocation7 + $0xec] ss:$16 sps:$4 sm:$0xff]   ;;  %v3266_v59 = vld [vmem:[#allocation7 + $0x184] ss:$16 sps:$4 sm:$0xff]   ;;  %v3238_v60 = vld [vmem:[#allocation7 + $0xe8] ss:$16 sps:$4 sm:$0xff]  }
  0x5f   :  { %v3271_v61 = vld [vmem:[#allocation7 + $0x180] ss:$16 sps:$4 sm:$0xff]   ;;  %v3246_v62 = vld [vmem:[#allocation7 + $0x10c] ss:$16 sps:$4 sm:$0xff]   ;;  %v3244_v63 = vld [vmem:[#allocation7 + $0x108] ss:$16 sps:$4 sm:$0xff]  }
  0x60   :  { %v3252_v0 = vld [vmem:[#allocation7 + $0x12c] ss:$16 sps:$4 sm:$0xff]   ;;  %v3250_v1 = vld [vmem:[#allocation7 + $0x128] ss:$16 sps:$4 sm:$0xff]   ;;  %v3272_v8 = vld [vmem:[#allocation7 + $0x1a4] ss:$16 sps:$4 sm:$0xff]  }
  0x61   :  { %194 = vmatpush1.bf16.msra.mxu0 %v3187_v17  ;;  %649 = vmatpush1.bf16.msra.mxu1 %v3223_v29  ;;  %v3258_v2 = vld [vmem:[#allocation7 + $0x14c] ss:$16 sps:$4 sm:$0xff]   ;;  %v3256_v3 = vld [vmem:[#allocation7 + $0x148] ss:$16 sps:$4 sm:$0xff]   ;;  %v3277_v11 = vld [vmem:[#allocation7 + $0x1a0] ss:$16 sps:$4 sm:$0xff]  }
  0x62   :  { %195 = vmatprep.subr.bf16.mxu0 %v3188_v18  ;;  %650 = vmatprep.subr.bf16.mxu1 %v3224_v30  ;;  %v3264_v4 = vld [vmem:[#allocation7 + $0x16c] ss:$16 sps:$4 sm:$0xff]   ;;  %v3262_v5 = vld [vmem:[#allocation7 + $0x168] ss:$16 sps:$4 sm:$0xff]   ;;  %v3278_v12 = vld [vmem:[#allocation7 + $0x1c4] ss:$16 sps:$4 sm:$0xff]  }
  0x63   :  { %v3270_v6 = vld [vmem:[#allocation7 + $0x18c] ss:$16 sps:$4 sm:$0xff]   ;;  %v3268_v7 = vld [vmem:[#allocation7 + $0x188] ss:$16 sps:$4 sm:$0xff]   ;;  %v3283_v15 = vld [vmem:[#allocation7 + $0x1c0] ss:$16 sps:$4 sm:$0xff]  }
  0x64   :  { %v3276_v9 = vld [vmem:[#allocation7 + $0x1ac] ss:$16 sps:$4 sm:$0xff]   ;;  %v3274_v10 = vld [vmem:[#allocation7 + $0x1a8] ss:$16 sps:$4 sm:$0xff]   ;;  %v3284_v16 = vld [vmem:[#allocation7 + $0x1e4] ss:$16 sps:$4 sm:$0xff]  }
  0x65   :  { %196 = vmatpush1.bf16.msra.mxu0 %v3190_v21  ;;  %651 = vmatpush1.bf16.msra.mxu1 %v3229_v33  ;;  %v3282_v13 = vld [vmem:[#allocation7 + $0x1cc] ss:$16 sps:$4 sm:$0xff]   ;;  %v3280_v14 = vld [vmem:[#allocation7 + $0x1c8] ss:$16 sps:$4 sm:$0xff]   ;;  %v3289_v19 = vld [vmem:[#allocation7 + $0x1e0] ss:$16 sps:$4 sm:$0xff]  }
  0x66   :  { %197 = vmatprep.subr.bf16.mxu0 %v3191_v23  ;;  %652 = vmatprep.subr.bf16.mxu1 %v3230_v35  ;;  %v3286_v17 = vld [vmem:[#allocation7 + $0x1e8] ss:$16 sps:$4 sm:$0xff]   ;;  %v3288_v18 = vld [vmem:[#allocation7 + $0x1ec] ss:$16 sps:$4 sm:$0xff]   ;;  %v784_v20 = vld [vmem:[#allocation8] sm:$0xff] }
  0x67   :  { %v788_v21 = vld [vmem:[#allocation8 + $0x20] sm:$0xff]  ;;  %v785_v22 = vld [vmem:[#allocation8 + $0x8] sm:$0xff] }
  0x68   :  { %v2884_v23 = vcombine.low %v784_v20, %v788_v21  ;;  %v2885_v24 = vcombine.high %v784_v20, %v788_v21  ;;  %v828_v20 = vld [vmem:[#allocation8 + $0x160] sm:$0xff]  ;;  %v825_v21 = vld [vmem:[#allocation8 + $0x148] sm:$0xff] }
  0x69   :  { %198 = vmatpush1.bf16.msra.mxu0 %v3193_v25  ;;  %653 = vmatpush1.bf16.msra.mxu1 %v3235_v38  ;;  %v789_v25 = vld [vmem:[#allocation8 + $0x28] sm:$0xff] }
  0x6a   :  { %683 = vmatprep.subr.bf16.mxu0 %v3198_v28  ;;  %654 = vmatprep.subr.bf16.mxu1 %v3236_v39  ;;  %v2886_v26 = vcombine.low %v785_v22, %v789_v25  ;;  %v2887_v27 = vcombine.high %v785_v22, %v789_v25  ;;  %v227_v28 = vlaneseq  ;;  %v829_v22 = vld [vmem:[#allocation8 + $0x168] sm:$0xff] }
  0x6c   :  { %216 = vmatmul.mubr.bf16.vlgmr.msra.gmra.mrb[0].mxu0 %v85_v31  ;;  %v3517_v29 = vshrl.u32 %v227_v28, 7  ;;  %v86_v31 = vld [vmem:[%s3616_s2] sm:$0x3]  ;;  %v836_v28 = vld [vmem:[#allocation8 + $0x1a0] sm:$0xff] }
  0x6d   :  { %684 = vmatpush1.bf16.msra.mxu0 %v3196_v32  ;;  %655 = vmatpush1.bf16.msra.mxu1 %v3241_v41 }
  0x6e   :  { %685 = vmatprep.subr.bf16.mxu0 %v3204_v34  ;;  %656 = vmatprep.subr.bf16.mxu1 %v3242_v43  ;;  %v3520_v30 = vsub.s32 0, %v3517_v29  ;;  %v3526_v32 = vsub.s32 1, %v3517_v29 }
  0x70   :  { %v230_v33 = vrot.slane %v86_v31, %v3520_v30  ;;  %v234_v34 = vrot.slane %v86_v31, %v3526_v32  ;;  %v833_v31 = vld [vmem:[#allocation8 + $0x188] sm:$0xff] }
  0x71   :  { %686 = vmatpush1.bf16.msra.mxu0 %v3202_v36  ;;  %657 = vmatpush1.bf16.msra.mxu1 %v3247_v46 }
  0x72   :  { %687 = vmatprep.subr.bf16.mxu0 %v3210_v37  ;;  %658 = vmatprep.subr.bf16.mxu1 %v3248_v47  ;;  %v792_v47 = vld [vmem:[#allocation8 + $0x40] sm:$0xff] }
  0x75   :  { %688 = vmatpush1.bf16.msra.mxu0 %v3208_v40  ;;  %659 = vmatpush1.bf16.msra.mxu1 %v3253_v49 }
  0x76   :  { %689 = vmatprep.subr.bf16.mxu0 %v3216_v42  ;;  %660 = vmatprep.subr.bf16.mxu1 %v3254_v51  ;;  %v793_v51 = vld [vmem:[#allocation8 + $0x48] sm:$0xff] }
  0x79   :  { %690 = vmatpush1.bf16.msra.mxu0 %v3214_v44  ;;  %661 = vmatpush1.bf16.msra.mxu1 %v3259_v53 }
  0x7a   :  { %691 = vmatprep.subr.bf16.mxu0 %v3222_v45  ;;  %662 = vmatprep.subr.bf16.mxu1 %v3260_v55 }
  0x7d   :  { %692 = vmatpush1.bf16.msra.mxu0 %v3220_v48  ;;  %663 = vmatpush1.bf16.msra.mxu1 %v3265_v57 }
  0x7e   :  { %693 = vmatprep.subr.bf16.mxu0 %v3228_v50  ;;  %664 = vmatprep.subr.bf16.mxu1 %v3266_v59  ;;  %v796_v50 = vld [vmem:[#allocation8 + $0x60] sm:$0xff] }
  0x7f   :  { %v2893_v57 = vcombine.high %v792_v47, %v796_v50  ;;  %v800_v59 = vld [vmem:[#allocation8 + $0x80] sm:$0xff] }
  0x81   :  { %694 = vmatpush1.bf16.msra.mxu0 %v3226_v52  ;;  %665 = vmatpush1.bf16.msra.mxu1 %v3271_v61  ;;  %v797_v52 = vld [vmem:[#allocation8 + $0x68] sm:$0xff] }
  0x82   :  { %695 = vmatprep.subr.bf16.mxu0 %v3234_v54  ;;  %666 = vmatprep.subr.bf16.mxu1 %v3272_v8  ;;  %v801_v61 = vld [vmem:[#allocation8 + $0x88] sm:$0xff] }
  0x85   :  { %696 = vmatpush1.bf16.msra.mxu0 %v3232_v56  ;;  %667 = vmatpush1.bf16.msra.mxu1 %v3277_v11  ;;  %v816_v11 = vld [vmem:[#allocation8 + $0x100] sm:$0xff] }
  0x86   :  { %697 = vmatprep.subr.bf16.mxu0 %v3240_v58  ;;  %668 = vmatprep.subr.bf16.mxu1 %v3278_v12  ;;  %v2895_v58 = vcombine.high %v793_v51, %v797_v52  ;;  %v820_v12 = vld [vmem:[#allocation8 + $0x120] sm:$0xff] }
  0x89   :  { %698 = vmatpush1.bf16.msra.mxu0 %v3238_v60  ;;  %669 = vmatpush1.bf16.msra.mxu1 %v3283_v15  ;;  %v804_v60 = vld [vmem:[#allocation8 + $0xa0] sm:$0xff] }
  0x8a   :  { %699 = vmatprep.subr.bf16.mxu0 %v3246_v62  ;;  %670 = vmatprep.subr.bf16.mxu1 %v3284_v16  ;;  %v805_v62 = vld [vmem:[#allocation8 + $0xa8] sm:$0xff] }
  0x8b   :  { %v2902_v8 = vcombine.low %v801_v61, %v805_v62 }
  0x8d   :  { %700 = vmatpush1.bf16.msra.mxu0 %v3244_v63  ;;  %671 = vmatpush1.bf16.msra.mxu1 %v3289_v19  ;;  %v2892_v63 = vcombine.low %v792_v47, %v796_v50  ;;  %v824_v19 = vld [vmem:[#allocation8 + $0x140] sm:$0xff] }
  0x8e   :  { %701 = vmatprep.subr.bf16.mxu0 %v3252_v0  ;;  %2320 = vmatprep.subr.bf16.mxu1 %v2885_v24  ;;  %v2894_v0 = vcombine.low %v793_v51, %v797_v52  ;;  %v2925_v25 = vcombine.high %v824_v19, %v828_v20  ;;  %v852_v47 = vld [vmem:[#allocation8 + $0x220] sm:$0xff] }
  0x91   :  { %702 = vmatpush1.bf16.msra.mxu0 %v3250_v1  ;;  %v2901_v1 = vcombine.high %v800_v59, %v804_v60 }
  0x92   :  { %703 = vmatprep.subr.bf16.mxu0 %v3258_v2  ;;  %v2903_v2 = vcombine.high %v801_v61, %v805_v62  ;;  %v864_v62 = vld [vmem:[#allocation8 + $0x280] sm:$0xff] }
  0x95   :  { %704 = vmatpush1.bf16.msra.mxu0 %v3256_v3  ;;  %v808_v3 = vld [vmem:[#allocation8 + $0xc0] sm:$0xff] }
  0x96   :  { %705 = vmatprep.subr.bf16.mxu0 %v3264_v4  ;;  %v812_v4 = vld [vmem:[#allocation8 + $0xe0] sm:$0xff] }
  0x97   :  { %v2908_v15 = vcombine.low %v808_v3, %v812_v4 }
  0x99   :  { %706 = vmatpush1.bf16.msra.mxu0 %v3262_v5  ;;  %v809_v5 = vld [vmem:[#allocation8 + $0xc8] sm:$0xff] }
  0x9a   :  { %707 = vmatprep.subr.bf16.mxu0 %v3270_v6  ;;  %v813_v6 = vld [vmem:[#allocation8 + $0xe8] sm:$0xff] }
  0x9b   :  { %v2910_v16 = vcombine.low %v809_v5, %v813_v6 }
  0x9d   :  { %708 = vmatpush1.bf16.msra.mxu0 %v3268_v7  ;;  %v2900_v7 = vcombine.low %v800_v59, %v804_v60 }
  0x9e   :  { %709 = vmatprep.subr.bf16.mxu0 %v3276_v9  ;;  %v2909_v9 = vcombine.high %v808_v3, %v812_v4 }
  0xa1   :  { %710 = vmatpush1.bf16.msra.mxu0 %v3274_v10  ;;  %v2911_v10 = vcombine.high %v809_v5, %v813_v6  ;;  %v872_v6 = vld [vmem:[#allocation8 + $0x2c0] sm:$0xff] }
  0xa2   :  { %711 = vmatprep.subr.bf16.mxu0 %v3282_v13  ;;  %v817_v13 = vld [vmem:[#allocation8 + $0x108] sm:$0xff] }
  0xa5   :  { %712 = vmatpush1.bf16.msra.mxu0 %v3280_v14  ;;  %v821_v14 = vld [vmem:[#allocation8 + $0x128] sm:$0xff] }
  0xa6   :  { %713 = vmatprep.subr.bf16.mxu0 %v3288_v18  ;;  %v2919_v18 = vcombine.high %v817_v13, %v821_v14  ;;  %v2918_v24 = vcombine.low %v817_v13, %v821_v14  ;;  %v880_v14 = vld [vmem:[#allocation8 + $0x300] sm:$0xff] }
  0xa9   :  { %714 = vmatpush1.bf16.msra.mxu0 %v3286_v17  ;;  %v2917_v17 = vcombine.high %v816_v11, %v820_v12 }
  0xaa   :  { %2406 = vmatprep.subr.bf16.mxu0 %v2887_v27  ;;  %v832_v27 = vld [vmem:[#allocation8 + $0x180] sm:$0xff] }
 0x13f   :  { %v217_v35 = vpop.f32.mrb[0].mxu0 }
 0x140   :  { %v237_v36 = vadd.f32 %v230_v33, %v217_v35  ;;  %v219_v37 = vpop.f32.mrb[1].mxu0  ;;  %v2926_v35 = vcombine.low %v825_v21, %v829_v22 }
 0x141   :  { %v238_v38 = vadd.f32 %v234_v34, %v219_v37  ;;  %v221_v39 = vpop.f32.mrb[2].mxu0 }
 0x142   :  { %v245_v40 = vmul.f32 0.01, %v237_v36  ;;  %v239_v41 = vadd.f32 %v230_v33, %v221_v39  ;;  %v223_v42 = vpop.f32.mrb[3].mxu0  ;;  %vm241_vm0 = vcmp.gt.f32.partialorder %v237_v36, 0.0  ;;  %v837_v33 = vld [vmem:[#allocation8 + $0x1a8] sm:$0xff]  ;;  %v844_v39 = vld [vmem:[#allocation8 + $0x1e0] sm:$0xff] }
 0x143   :  { %v246_v43 = vmul.f32 0.01, %v238_v38  ;;  %v240_v44 = vadd.f32 %v234_v34, %v223_v42  ;;  %vm242_vm2 = vcmp.gt.f32.partialorder %v238_v38, 0.0  ;;  %v2924_v34 = vcombine.low %v824_v19, %v828_v20 }
 0x144   :  { %vm243_vm1 = vcmp.gt.f32.partialorder %v239_v41, 0.0  ;;  %v247_v45 = vmul.f32 0.01, %v239_v41  ;;  %v249_v48 = vsel %vm241_vm0, %v237_v36, %v245_v40  ;;  %v2933_v36 = vcombine.high %v832_v27, %v836_v28  ;;  %v841_v40 = vld [vmem:[#allocation8 + $0x1c8] sm:$0xff] }
 0x145   :  { %v248_v46 = vmul.f32 0.01, %v240_v44  ;;  %vm244_vm3 = vcmp.gt.f32.partialorder %v240_v44, 0.0  ;;  %v250_v53 = vsel %vm242_vm2, %v238_v38, %v246_v43  ;;  %v2935_v37 = vcombine.high %v833_v31, %v837_v33  ;;  %v840_v38 = vld [vmem:[#allocation8 + $0x1c0] sm:$0xff] }
 0x146   :  { %v251_v49 = vsel %vm243_vm1, %v239_v41, %v247_v45  ;;  %v845_v41 = vld [vmem:[#allocation8 + $0x1e8] sm:$0xff]  ;;  %v2932_v42 = vcombine.low %v832_v27, %v836_v28  ;;  %v2934_v43 = vcombine.low %v833_v31, %v837_v33  ;;  %v2940_v50 = vcombine.low %v840_v38, %v844_v39 }
 0x147   :  { %v252_v54 = vsel %vm244_vm3, %v240_v44, %v248_v46  ;;  %v254_v55 = vpack.c.bf16 %v251_v49, %v249_v48  ;;  %v2941_v44 = vcombine.high %v840_v38, %v844_v39  ;;  %v2943_v45 = vcombine.high %v841_v40, %v845_v41  ;;  %v848_v46 = vld [vmem:[#allocation8 + $0x200] sm:$0xff]  ;;  %v849_v48 = vld [vmem:[#allocation8 + $0x208] sm:$0xff] }
 0x148   :  { %v255_v56 = vpack.c.bf16 %v252_v54, %v250_v53  ;;  %v853_v49 = vld [vmem:[#allocation8 + $0x228] sm:$0xff]  ;;  %v2942_v51 = vcombine.low %v841_v40, %v845_v41  ;;  %v2949_v52 = vcombine.high %v848_v46, %v852_v47  ;;  %v856_v54 = vld [vmem:[#allocation8 + $0x240] sm:$0xff] }
 0x149   :  { %v2951_v53 = vcombine.high %v849_v48, %v853_v49  ;;  %v2950_v59 = vcombine.low %v849_v48, %v853_v49  ;;  %v901_v39 = vld [vmem:[#allocation8 + $0x3a8] sm:$0xff] }
 0x14a   :  { %672 = vmatprep.mubr.bf16.mxu1 %v255_v56  ;;  %715 = vmatprep.mubr.bf16.mxu0 %v255_v56  ;;  %v857_v56 = vld [vmem:[#allocation8 + $0x248] sm:$0xff] }
 0x14b   :  { %673 = vmatmul.mubr.bf16.vlgmr.msra.gmra.mrb[0].mxu1 %v254_v55  ;;  %716 = vmatmul.mubr.bf16.vlgmr.msra.gmra.mrb[4].mxu0 %v254_v55  ;;  %v860_v55 = vld [vmem:[#allocation8 + $0x260] sm:$0xff] }
 0x14c   :  { %2321 = vmatpush1.bf16.msra.mxu1 %v2884_v23  ;;  %2407 = vmatpush1.bf16.msra.mxu0 %v2886_v26  ;;  %v2916_v23 = vcombine.low %v816_v11, %v820_v12  ;;  %v2927_v26 = vcombine.high %v825_v21, %v829_v22  ;;  %v2957_v60 = vcombine.high %v856_v54, %v860_v55  ;;  %v888_v22 = vld [vmem:[#allocation8 + $0x340] sm:$0xff] }
 0x14d   :  { %2322 = vmatprep.subr.bf16.mxu1 %v2893_v57  ;;  %2408 = vmatprep.subr.bf16.mxu0 %v2895_v58  ;;  %v861_v57 = vld [vmem:[#allocation8 + $0x268] sm:$0xff]  ;;  %v2948_v58 = vcombine.low %v848_v46, %v852_v47 }
 0x14e   :  { %v2959_v61 = vcombine.high %v857_v56, %v861_v57  ;;  %v2958_v3 = vcombine.low %v857_v56, %v861_v57  ;;  %v909_v47 = vld [vmem:[#allocation8 + $0x3e8] sm:$0xff] }
 0x150   :  { %2323 = vmatpush1.bf16.msra.mxu1 %v2892_v63  ;;  %2409 = vmatpush1.bf16.msra.mxu0 %v2894_v0  ;;  %v868_v63 = vld [vmem:[#allocation8 + $0x2a0] sm:$0xff]  ;;  %v865_v0 = vld [vmem:[#allocation8 + $0x288] sm:$0xff] }
 0x151   :  { %2324 = vmatprep.subr.bf16.mxu1 %v2901_v1  ;;  %2410 = vmatprep.subr.bf16.mxu0 %v2903_v2  ;;  %v869_v1 = vld [vmem:[#allocation8 + $0x2a8] sm:$0xff]  ;;  %v2956_v2 = vcombine.low %v856_v54, %v860_v55  ;;  %v2965_v4 = vcombine.high %v864_v62, %v868_v63 }
 0x152   :  { %v2967_v5 = vcombine.high %v865_v0, %v869_v1  ;;  %v2966_v11 = vcombine.low %v865_v0, %v869_v1  ;;  %v3538_v55 = vld [vmem:[#allocation8 + $0x428] sm:$0xff] }
 0x154   :  { %2325 = vmatpush1.bf16.msra.mxu1 %v2900_v7  ;;  %2411 = vmatpush1.bf16.msra.mxu0 %v2902_v8  ;;  %v876_v7 = vld [vmem:[#allocation8 + $0x2e0] sm:$0xff]  ;;  %v873_v8 = vld [vmem:[#allocation8 + $0x2c8] sm:$0xff] }
 0x155   :  { %2326 = vmatprep.subr.bf16.mxu1 %v2909_v9  ;;  %2412 = vmatprep.subr.bf16.mxu0 %v2911_v10  ;;  %v877_v9 = vld [vmem:[#allocation8 + $0x2e8] sm:$0xff]  ;;  %v2964_v10 = vcombine.low %v864_v62, %v868_v63  ;;  %v2973_v12 = vcombine.high %v872_v6, %v876_v7 }
 0x156   :  { %v2975_v13 = vcombine.high %v873_v8, %v877_v9  ;;  %v2974_v19 = vcombine.low %v873_v8, %v877_v9 }
 0x158   :  { %2327 = vmatpush1.bf16.msra.mxu1 %v2908_v15  ;;  %2413 = vmatpush1.bf16.msra.mxu0 %v2910_v16  ;;  %v884_v15 = vld [vmem:[#allocation8 + $0x320] sm:$0xff]  ;;  %v881_v16 = vld [vmem:[#allocation8 + $0x308] sm:$0xff] }
 0x159   :  { %2328 = vmatprep.subr.bf16.mxu1 %v2917_v17  ;;  %2414 = vmatprep.subr.bf16.mxu0 %v2919_v18  ;;  %v885_v17 = vld [vmem:[#allocation8 + $0x328] sm:$0xff]  ;;  %v2972_v18 = vcombine.low %v872_v6, %v876_v7  ;;  %v2981_v20 = vcombine.high %v880_v14, %v884_v15 }
 0x15a   :  { %v2983_v21 = vcombine.high %v881_v16, %v885_v17  ;;  %v2982_v27 = vcombine.low %v881_v16, %v885_v17 }
 0x15c   :  { %2329 = vmatpush1.bf16.msra.mxu1 %v2916_v23  ;;  %2415 = vmatpush1.bf16.msra.mxu0 %v2918_v24  ;;  %v892_v23 = vld [vmem:[#allocation8 + $0x360] sm:$0xff]  ;;  %v889_v24 = vld [vmem:[#allocation8 + $0x348] sm:$0xff] }
 0x15d   :  { %2330 = vmatprep.subr.bf16.mxu1 %v2925_v25  ;;  %2416 = vmatprep.subr.bf16.mxu0 %v2927_v26  ;;  %v893_v25 = vld [vmem:[#allocation8 + $0x368] sm:$0xff]  ;;  %v2980_v26 = vcombine.low %v880_v14, %v884_v15  ;;  %v2989_v28 = vcombine.high %v888_v22, %v892_v23  ;;  %v2988_v33 = vcombine.low %v888_v22, %v892_v23 }
 0x15e   :  { %v2991_v31 = vcombine.high %v889_v24, %v893_v25 }
 0x160   :  { %2331 = vmatpush1.bf16.msra.mxu1 %v2924_v34  ;;  %2417 = vmatpush1.bf16.msra.mxu0 %v2926_v35  ;;  %v2990_v34 = vcombine.low %v889_v24, %v893_v25  ;;  %v896_v35 = vld [vmem:[#allocation8 + $0x380] sm:$0xff] }
 0x161   :  { %2332 = vmatprep.subr.bf16.mxu1 %v2933_v36  ;;  %2418 = vmatprep.subr.bf16.mxu0 %v2935_v37  ;;  %v900_v36 = vld [vmem:[#allocation8 + $0x3a0] sm:$0xff]  ;;  %v897_v37 = vld [vmem:[#allocation8 + $0x388] sm:$0xff] }
 0x162   :  { %v2997_v38 = vcombine.high %v896_v35, %v900_v36  ;;  %v2996_v40 = vcombine.low %v896_v35, %v900_v36  ;;  %v2998_v41 = vcombine.low %v897_v37, %v901_v39  ;;  %v920_v35 = vld [vmem:[#allocation8 + $0x440] sm:$0xff] }
 0x164   :  { %2333 = vmatpush1.bf16.msra.mxu1 %v2932_v42  ;;  %2419 = vmatpush1.bf16.msra.mxu0 %v2934_v43  ;;  %v2999_v42 = vcombine.high %v897_v37, %v901_v39  ;;  %v904_v43 = vld [vmem:[#allocation8 + $0x3c0] sm:$0xff] }
 0x165   :  { %2334 = vmatprep.subr.bf16.mxu1 %v2941_v44  ;;  %2420 = vmatprep.subr.bf16.mxu0 %v2943_v45  ;;  %v908_v44 = vld [vmem:[#allocation8 + $0x3e0] sm:$0xff]  ;;  %v905_v45 = vld [vmem:[#allocation8 + $0x3c8] sm:$0xff] }
 0x166   :  { %v3005_v46 = vcombine.high %v904_v43, %v908_v44  ;;  %v3004_v48 = vcombine.low %v904_v43, %v908_v44  ;;  %v3006_v49 = vcombine.low %v905_v45, %v909_v47 }
 0x168   :  { %2335 = vmatpush1.bf16.msra.mxu1 %v2940_v50  ;;  %2421 = vmatpush1.bf16.msra.mxu0 %v2942_v51  ;;  %v3007_v50 = vcombine.high %v905_v45, %v909_v47  ;;  %v3530_v51 = vld [vmem:[#allocation8 + $0x400] sm:$0xff] }
 0x169   :  { %2336 = vmatprep.subr.bf16.mxu1 %v2949_v52  ;;  %2422 = vmatprep.subr.bf16.mxu0 %v2951_v53  ;;  %v3532_v52 = vld [vmem:[#allocation8 + $0x420] sm:$0xff]  ;;  %v3534_v53 = vld [vmem:[#allocation8 + $0x408] sm:$0xff] }
 0x16a   :  { %v3013_v54 = vcombine.high %v3530_v51, %v3532_v52  ;;  %v3012_v56 = vcombine.low %v3530_v51, %v3532_v52  ;;  %v3014_v57 = vcombine.low %v3534_v53, %v3538_v55  ;;  %v928_v45 = vld [vmem:[#allocation8 + $0x480] sm:$0xff] }
 0x16c   :  { %2337 = vmatpush1.bf16.msra.mxu1 %v2948_v58  ;;  %2423 = vmatpush1.bf16.msra.mxu0 %v2950_v59  ;;  %v3015_v58 = vcombine.high %v3534_v53, %v3538_v55  ;;  %v737_v59 = vsub.s32 2, %v3517_v29 }
 0x16d   :  { %2338 = vmatprep.subr.bf16.mxu1 %v2957_v60  ;;  %2424 = vmatprep.subr.bf16.mxu0 %v2959_v61  ;;  %v253_v60 = vld [vmem:[%s3618_s4] sm:$0xf]  ;;  %v741_v61 = vsub.s32 3, %v3517_v29 }
 0x16e   :  { %v730_v62 = vrot.slane %v253_v60, %v3520_v30  ;;  %v738_v63 = vrot.slane %v253_v60, %v737_v59  ;;  %v734_v0 = vrot.slane %v253_v60, %v3526_v32 }
 0x16f   :  { %v742_v1 = vrot.slane %v253_v60, %v741_v61 }
 0x170   :  { %2339 = vmatpush1.bf16.msra.mxu1 %v2956_v2  ;;  %2425 = vmatpush1.bf16.msra.mxu0 %v2958_v3 }
 0x171   :  { %2340 = vmatprep.subr.bf16.mxu1 %v2965_v4  ;;  %2426 = vmatprep.subr.bf16.mxu0 %v2967_v5 }
 0x174   :  { %2341 = vmatpush1.bf16.msra.mxu1 %v2964_v10  ;;  %2427 = vmatpush1.bf16.msra.mxu0 %v2966_v11 }
 0x175   :  { %2342 = vmatprep.subr.bf16.mxu1 %v2973_v12  ;;  %2428 = vmatprep.subr.bf16.mxu0 %v2975_v13 }
 0x178   :  { %2343 = vmatpush1.bf16.msra.mxu1 %v2972_v18  ;;  %2429 = vmatpush1.bf16.msra.mxu0 %v2974_v19 }
 0x179   :  { %2344 = vmatprep.subr.bf16.mxu1 %v2981_v20  ;;  %2430 = vmatprep.subr.bf16.mxu0 %v2983_v21 }
 0x17c   :  { %2345 = vmatpush1.bf16.msra.mxu1 %v2980_v26  ;;  %2431 = vmatpush1.bf16.msra.mxu0 %v2982_v27 }
 0x17d   :  { %2346 = vmatprep.subr.bf16.mxu1 %v2989_v28  ;;  %2432 = vmatprep.subr.bf16.mxu0 %v2991_v31 }
 0x180   :  { %2347 = vmatpush1.bf16.msra.mxu1 %v2988_v33  ;;  %2433 = vmatpush1.bf16.msra.mxu0 %v2990_v34 }
 0x181   :  { %2348 = vmatprep.subr.bf16.mxu1 %v2997_v38  ;;  %2434 = vmatprep.subr.bf16.mxu0 %v2999_v42  ;;  %v925_v42 = vld [vmem:[#allocation8 + $0x468] sm:$0xff] }
 0x184   :  { %2349 = vmatpush1.bf16.msra.mxu1 %v2996_v40  ;;  %2435 = vmatpush1.bf16.msra.mxu0 %v2998_v41  ;;  %v924_v40 = vld [vmem:[#allocation8 + $0x460] sm:$0xff]  ;;  %v921_v41 = vld [vmem:[#allocation8 + $0x448] sm:$0xff] }
 0x185   :  { %2350 = vmatprep.subr.bf16.mxu1 %v3005_v46  ;;  %2436 = vmatprep.subr.bf16.mxu0 %v3007_v50  ;;  %v3021_v46 = vcombine.high %v920_v35, %v924_v40  ;;  %v3023_v47 = vcombine.high %v921_v41, %v925_v42  ;;  %v933_v50 = vld [vmem:[#allocation8 + $0x4a8] sm:$0xff] }
 0x188   :  { %2351 = vmatpush1.bf16.msra.mxu1 %v3004_v48  ;;  %2437 = vmatpush1.bf16.msra.mxu0 %v3006_v49  ;;  %v932_v48 = vld [vmem:[#allocation8 + $0x4a0] sm:$0xff]  ;;  %v929_v49 = vld [vmem:[#allocation8 + $0x488] sm:$0xff] }
 0x189   :  { %2363 = vmatprep.subr.bf16.mxu1 %v3013_v54  ;;  %2449 = vmatprep.subr.bf16.mxu0 %v3015_v58  ;;  %v3020_v54 = vcombine.low %v920_v35, %v924_v40  ;;  %v3022_v58 = vcombine.low %v921_v41, %v925_v42  ;;  %v3029_v60 = vcombine.high %v928_v45, %v932_v48  ;;  %v977_v40 = vld [vmem:[#allocation8 + $0x608] sm:$0xff] }
 0x18a   :  { %v3028_v51 = vcombine.low %v928_v45, %v932_v48  ;;  %v3030_v52 = vcombine.low %v929_v49, %v933_v50  ;;  %v981_v41 = vld [vmem:[#allocation8 + $0x628] sm:$0xff]  ;;  %v984_v48 = vld [vmem:[#allocation8 + $0x640] sm:$0xff] }
 0x21e   :  { %v674_v2 = vpop.f32.mrb[0].mxu1  ;;  %v717_v3 = vpop.f32.mrb[4].mxu0 }
 0x21f   :  { %v747_v4 = vadd.f32 %v730_v62, %v674_v2  ;;  %v749_v5 = vadd.f32 %v738_v63, %v717_v3  ;;  %v676_v6 = vpop.f32.mrb[1].mxu1  ;;  %v719_v7 = vpop.f32.mrb[5].mxu0  ;;  %v941_v2 = vld [vmem:[#allocation8 + $0x4e8] sm:$0xff] }
 0x220   :  { %v748_v8 = vadd.f32 %v734_v0, %v676_v6  ;;  %v750_v9 = vadd.f32 %v742_v1, %v719_v7  ;;  %v678_v10 = vpop.f32.mrb[2].mxu1  ;;  %v721_v11 = vpop.f32.mrb[6].mxu0  ;;  %v945_v3 = vld [vmem:[#allocation8 + $0x508] sm:$0xff] }
 0x221   :  { %vm755_vm4 = vcmp.gt.f32.partialorder %v747_v4, 0.0  ;;  %v763_v12 = vmul.f32 0.01, %v747_v4  ;;  %vm757_vm5 = vcmp.gt.f32.partialorder %v749_v5, 0.0  ;;  %v765_v13 = vmul.f32 0.01, %v749_v5 }
 0x222   :  { %vm756_vm6 = vcmp.gt.f32.partialorder %v748_v8, 0.0  ;;  %v764_v14 = vmul.f32 0.01, %v748_v8  ;;  %vm758_vm7 = vcmp.gt.f32.partialorder %v750_v9, 0.0  ;;  %v766_v15 = vmul.f32 0.01, %v750_v9 }
 0x223   :  { %v751_v16 = vadd.f32 %v730_v62, %v678_v10  ;;  %v753_v17 = vadd.f32 %v738_v63, %v721_v11  ;;  %v680_v18 = vpop.f32.mrb[3].mxu1  ;;  %v723_v19 = vpop.f32.mrb[7].mxu0  ;;  %v771_v20 = vsel %vm755_vm4, %v747_v4, %v763_v12  ;;  %v773_v21 = vsel %vm757_vm5, %v749_v5, %v765_v13  ;;  %v936_v63 = vld [vmem:[#allocation8 + $0x4c0] sm:$0xff]  ;;  %v949_v4 = vld [vmem:[#allocation8 + $0x528] sm:$0xff] }
 0x224   :  { %v752_v22 = vadd.f32 %v734_v0, %v680_v18  ;;  %v754_v23 = vadd.f32 %v742_v1, %v723_v19  ;;  %v772_v28 = vsel %vm756_vm6, %v748_v8, %v764_v14  ;;  %v774_v31 = vsel %vm758_vm7, %v750_v9, %v766_v15  ;;  %v940_v0 = vld [vmem:[#allocation8 + $0x4e0] sm:$0xff]  ;;  %v937_v1 = vld [vmem:[#allocation8 + $0x4c8] sm:$0xff] }
 0x225   :  { %vm759_vm8 = vcmp.gt.f32.partialorder %v751_v16, 0.0  ;;  %v767_v24 = vmul.f32 0.01, %v751_v16  ;;  %vm761_vm9 = vcmp.gt.f32.partialorder %v753_v17, 0.0  ;;  %v769_v25 = vmul.f32 0.01, %v753_v17 }
 0x226   :  { %vm760_vm10 = vcmp.gt.f32.partialorder %v752_v22, 0.0  ;;  %v768_v26 = vmul.f32 0.01, %v752_v22  ;;  %vm762_vm11 = vcmp.gt.f32.partialorder %v754_v23, 0.0  ;;  %v770_v27 = vmul.f32 0.01, %v754_v23 }
 0x227   :  { %v775_v33 = vsel %vm759_vm8, %v751_v16, %v767_v24  ;;  %v777_v34 = vsel %vm761_vm9, %v753_v17, %v769_v25  ;;  %v3031_v62 = vcombine.high %v929_v49, %v933_v50  ;;  %v3037_v53 = vcombine.high %v936_v63, %v940_v0  ;;  %v952_v9 = vld [vmem:[#allocation8 + $0x540] sm:$0xff]  ;;  %v953_v11 = vld [vmem:[#allocation8 + $0x548] sm:$0xff] }
 0x228   :  { %v3559_v36 = vpack.c.bf16 %v775_v33, %v771_v20  ;;  %v3561_v37 = vpack.c.bf16 %v777_v34, %v773_v21  ;;  %v776_v38 = vsel %vm760_vm10, %v752_v22, %v768_v26  ;;  %v778_v39 = vsel %vm762_vm11, %v754_v23, %v770_v27  ;;  %v956_v10 = vld [vmem:[#allocation8 + $0x560] sm:$0xff]  ;;  %v957_v12 = vld [vmem:[#allocation8 + $0x568] sm:$0xff] }
 0x229   :  { %v3563_v43 = vpack.c.bf16 %v776_v38, %v772_v28  ;;  %v3565_v44 = vpack.c.bf16 %v778_v39, %v774_v31  ;;  %v3039_v55 = vcombine.high %v937_v1, %v941_v2  ;;  %v3036_v5 = vcombine.low %v936_v63, %v940_v0  ;;  %v960_v17 = vld [vmem:[#allocation8 + $0x580] sm:$0xff]  ;;  %v961_v19 = vld [vmem:[#allocation8 + $0x588] sm:$0xff] }
 0x22a   :  { %v3038_v6 = vcombine.low %v937_v1, %v941_v2  ;;  %v3047_v8 = vcombine.high %v945_v3, %v949_v4  ;;  %v3046_v14 = vcombine.low %v945_v3, %v949_v4  ;;  %v3053_v15 = vcombine.high %v952_v9, %v956_v10  ;;  %v964_v18 = vld [vmem:[#allocation8 + $0x5a0] sm:$0xff]  ;;  %v965_v20 = vld [vmem:[#allocation8 + $0x5a8] sm:$0xff] }
 0x22b   :  { %2352 = vmatprep.mubr.bf16.mxu1 %v3563_v43  ;;  %2438 = vmatprep.mubr.bf16.mxu0 %v3563_v43  ;;  %v3055_v16 = vcombine.high %v953_v11, %v957_v12  ;;  %v3052_v21 = vcombine.low %v952_v9, %v956_v10  ;;  %v3054_v22 = vcombine.low %v953_v11, %v957_v12  ;;  %v968_v25 = vld [vmem:[#allocation8 + $0x5c0] sm:$0xff]  ;;  %v969_v27 = vld [vmem:[#allocation8 + $0x5c8] sm:$0xff] }
 0x22c   :  { %2353 = vmatmul.mubr.bf16.vlgmr.msra.gmra.mrb[4].mxu1 %v3559_v36  ;;  %2439 = vmatmul.mubr.bf16.vlgmr.msra.gmra.mrb[8].mxu0 %v3559_v36  ;;  %v3061_v23 = vcombine.high %v960_v17, %v964_v18  ;;  %v3063_v24 = vcombine.high %v961_v19, %v965_v20  ;;  %v972_v26 = vld [vmem:[#allocation8 + $0x5e0] sm:$0xff]  ;;  %v973_v28 = vld [vmem:[#allocation8 + $0x5e8] sm:$0xff]  ;;  %v3060_v31 = vcombine.low %v960_v17, %v964_v18 }
 0x22d   :  { %2364 = vmatpush1.bf16.msra.mxu1 %v3012_v56  ;;  %2450 = vmatpush1.bf16.msra.mxu0 %v3014_v57  ;;  %v944_v56 = vld [vmem:[#allocation8 + $0x500] sm:$0xff]  ;;  %v3062_v33 = vcombine.low %v961_v19, %v965_v20  ;;  %v3069_v34 = vcombine.high %v968_v25, %v972_v26  ;;  %v3071_v35 = vcombine.high %v969_v27, %v973_v28  ;;  %v985_v50 = vld [vmem:[#allocation8 + $0x648] sm:$0xff] }
 0x22e   :  { %2395 = vmatprep.mubr.bf16.mxu1 %v3565_v44  ;;  %2481 = vmatprep.mubr.bf16.mxu0 %v3565_v44  ;;  %v948_v57 = vld [vmem:[#allocation8 + $0x520] sm:$0xff]  ;;  %v3068_v42 = vcombine.low %v968_v25, %v972_v26  ;;  %v3070_v45 = vcombine.low %v969_v27, %v973_v28  ;;  %v993_v2 = vld [vmem:[#allocation8 + $0x688] sm:$0xff] }
 0x22f   :  { %2365 = vmatprep.subr.bf16.mxu1 %v3021_v46  ;;  %2451 = vmatprep.subr.bf16.mxu0 %v3023_v47  ;;  %v3045_v7 = vcombine.high %v944_v56, %v948_v57  ;;  %v3044_v13 = vcombine.low %v944_v56, %v948_v57  ;;  %v976_v38 = vld [vmem:[#allocation8 + $0x600] sm:$0xff]  ;;  %v3079_v47 = vcombine.high %v977_v40, %v981_v41  ;;  %v1001_v4 = vld [vmem:[#allocation8 + $0x6c8] sm:$0xff] }
 0x230   :  { %v980_v39 = vld [vmem:[#allocation8 + $0x620] sm:$0xff]  ;;  %v1009_v12 = vld [vmem:[#allocation8 + $0x708] sm:$0xff] }
 0x231   :  { %2366 = vmatpush1.bf16.msra.mxu1 %v3020_v54  ;;  %2452 = vmatpush1.bf16.msra.mxu0 %v3022_v58  ;;  %v3077_v46 = vcombine.high %v976_v38, %v980_v39  ;;  %v988_v49 = vld [vmem:[#allocation8 + $0x660] sm:$0xff]  ;;  %v989_v54 = vld [vmem:[#allocation8 + $0x668] sm:$0xff]  ;;  %v3076_v58 = vcombine.low %v976_v38, %v980_v39 }
 0x232   :  { %2367 = vmatprep.subr.bf16.mxu1 %v3029_v60  ;;  %2453 = vmatprep.subr.bf16.mxu0 %v3031_v62  ;;  %v3078_v60 = vcombine.low %v977_v40, %v981_v41  ;;  %v3085_v62 = vcombine.high %v984_v48, %v988_v49  ;;  %v3087_v63 = vcombine.high %v985_v50, %v989_v54  ;;  %v992_v0 = vld [vmem:[#allocation8 + $0x680] sm:$0xff]  ;;  %v1017_v20 = vld [vmem:[#allocation8 + $0x748] sm:$0xff] }
 0x233   :  { %v996_v1 = vld [vmem:[#allocation8 + $0x6a0] sm:$0xff]  ;;  %v1025_v28 = vld [vmem:[#allocation8 + $0x788] sm:$0xff] }
 0x234   :  { %v1000_v57 = vld [vmem:[#allocation8 + $0x6c0] sm:$0xff]  ;;  %v1033_v41 = vld [vmem:[#allocation8 + $0x7c8] sm:$0xff] }
 0x235   :  { %2368 = vmatpush1.bf16.msra.mxu1 %v3028_v51  ;;  %2454 = vmatpush1.bf16.msra.mxu0 %v3030_v52  ;;  %v997_v51 = vld [vmem:[#allocation8 + $0x6a8] sm:$0xff]  ;;  %v3084_v52 = vcombine.low %v984_v48, %v988_v49  ;;  %v1004_v3 = vld [vmem:[#allocation8 + $0x6e0] sm:$0xff]  ;;  %v786_v49 = vld [vmem:[#allocation8 + $0x10] sm:$0xff] }
 0x236   :  { %2369 = vmatprep.subr.bf16.mxu1 %v3037_v53  ;;  %2455 = vmatprep.subr.bf16.mxu0 %v3039_v55  ;;  %v3086_v53 = vcombine.low %v985_v50, %v989_v54  ;;  %v3093_v55 = vcombine.high %v992_v0, %v996_v1  ;;  %v3095_v56 = vcombine.high %v993_v2, %v997_v51  ;;  %v1008_v10 = vld [vmem:[#allocation8 + $0x700] sm:$0xff]  ;;  %v790_v50 = vld [vmem:[#allocation8 + $0x30] sm:$0xff]  ;;  %v787_v54 = vld [vmem:[#allocation8 + $0x18] sm:$0xff] }
 0x237   :  { %v1012_v11 = vld [vmem:[#allocation8 + $0x720] sm:$0xff] }
 0x238   :  { %v1016_v18 = vld [vmem:[#allocation8 + $0x740] sm:$0xff] }
 0x239   :  { %2370 = vmatpush1.bf16.msra.mxu1 %v3036_v5  ;;  %2456 = vmatpush1.bf16.msra.mxu0 %v3038_v6  ;;  %v1005_v5 = vld [vmem:[#allocation8 + $0x6e8] sm:$0xff]  ;;  %v3092_v6 = vcombine.low %v992_v0, %v996_v1  ;;  %v1020_v19 = vld [vmem:[#allocation8 + $0x760] sm:$0xff]  ;;  %v794_v1 = vld [vmem:[#allocation8 + $0x50] sm:$0xff] }
 0x23a   :  { %2371 = vmatprep.subr.bf16.mxu1 %v3045_v7  ;;  %2457 = vmatprep.subr.bf16.mxu0 %v3047_v8  ;;  %v3094_v7 = vcombine.low %v993_v2, %v997_v51  ;;  %v3101_v8 = vcombine.high %v1000_v57, %v1004_v3  ;;  %v3103_v9 = vcombine.high %v1001_v4, %v1005_v5  ;;  %v1024_v26 = vld [vmem:[#allocation8 + $0x780] sm:$0xff]  ;;  %v798_v2 = vld [vmem:[#allocation8 + $0x70] sm:$0xff]  ;;  %v795_v51 = vld [vmem:[#allocation8 + $0x58] sm:$0xff] }
 0x23b   :  { %v1028_v27 = vld [vmem:[#allocation8 + $0x7a0] sm:$0xff] }
 0x23c   :  { %v1032_v39 = vld [vmem:[#allocation8 + $0x7c0] sm:$0xff] }
 0x23d   :  { %2372 = vmatpush1.bf16.msra.mxu1 %v3044_v13  ;;  %2458 = vmatpush1.bf16.msra.mxu0 %v3046_v14  ;;  %v1013_v13 = vld [vmem:[#allocation8 + $0x728] sm:$0xff]  ;;  %v3100_v14 = vcombine.low %v1000_v57, %v1004_v3  ;;  %v1036_v40 = vld [vmem:[#allocation8 + $0x7e0] sm:$0xff]  ;;  %v802_v3 = vld [vmem:[#allocation8 + $0x90] sm:$0xff] }
 0x23e   :  { %2373 = vmatprep.subr.bf16.mxu1 %v3053_v15  ;;  %2459 = vmatprep.subr.bf16.mxu0 %v3055_v16  ;;  %v3102_v15 = vcombine.low %v1001_v4, %v1005_v5  ;;  %v3109_v16 = vcombine.high %v1008_v10, %v1012_v11  ;;  %v3111_v17 = vcombine.high %v1009_v12, %v1013_v13  ;;  %v806_v4 = vld [vmem:[#allocation8 + $0xb0] sm:$0xff]  ;;  %v803_v5 = vld [vmem:[#allocation8 + $0x98] sm:$0xff] }
 0x241   :  { %2374 = vmatpush1.bf16.msra.mxu1 %v3052_v21  ;;  %2460 = vmatpush1.bf16.msra.mxu0 %v3054_v22  ;;  %v1021_v21 = vld [vmem:[#allocation8 + $0x768] sm:$0xff]  ;;  %v3108_v22 = vcombine.low %v1008_v10, %v1012_v11  ;;  %v810_v11 = vld [vmem:[#allocation8 + $0xd0] sm:$0xff] }
 0x242   :  { %2375 = vmatprep.subr.bf16.mxu1 %v3061_v23  ;;  %2461 = vmatprep.subr.bf16.mxu0 %v3063_v24  ;;  %v3110_v23 = vcombine.low %v1009_v12, %v1013_v13  ;;  %v3117_v24 = vcombine.high %v1016_v18, %v1020_v19  ;;  %v3119_v25 = vcombine.high %v1017_v20, %v1021_v21  ;;  %v814_v12 = vld [vmem:[#allocation8 + $0xf0] sm:$0xff]  ;;  %v811_v13 = vld [vmem:[#allocation8 + $0xd8] sm:$0xff] }
 0x245   :  { %2376 = vmatpush1.bf16.msra.mxu1 %v3060_v31  ;;  %2462 = vmatpush1.bf16.msra.mxu0 %v3062_v33  ;;  %v1029_v31 = vld [vmem:[#allocation8 + $0x7a8] sm:$0xff]  ;;  %v3116_v33 = vcombine.low %v1016_v18, %v1020_v19  ;;  %v818_v19 = vld [vmem:[#allocation8 + $0x110] sm:$0xff] }
 0x246   :  { %2377 = vmatprep.subr.bf16.mxu1 %v3069_v34  ;;  %2463 = vmatprep.subr.bf16.mxu0 %v3071_v35  ;;  %v3118_v34 = vcombine.low %v1017_v20, %v1021_v21  ;;  %v3125_v35 = vcombine.high %v1024_v26, %v1028_v27  ;;  %v3127_v38 = vcombine.high %v1025_v28, %v1029_v31  ;;  %v822_v20 = vld [vmem:[#allocation8 + $0x130] sm:$0xff]  ;;  %v823_v21 = vld [vmem:[#allocation8 + $0x138] sm:$0xff] }
 0x249   :  { %2378 = vmatpush1.bf16.msra.mxu1 %v3068_v42  ;;  %2464 = vmatpush1.bf16.msra.mxu0 %v3070_v45  ;;  %v1037_v42 = vld [vmem:[#allocation8 + $0x7e8] sm:$0xff]  ;;  %v3124_v45 = vcombine.low %v1024_v26, %v1028_v27  ;;  %v826_v26 = vld [vmem:[#allocation8 + $0x150] sm:$0xff] }
 0x24a   :  { %2379 = vmatprep.subr.bf16.mxu1 %v3077_v46  ;;  %2465 = vmatprep.subr.bf16.mxu0 %v3079_v47  ;;  %v3126_v46 = vcombine.low %v1025_v28, %v1029_v31  ;;  %v3133_v47 = vcombine.high %v1032_v39, %v1036_v40  ;;  %v3135_v48 = vcombine.high %v1033_v41, %v1037_v42  ;;  %v830_v27 = vld [vmem:[#allocation8 + $0x170] sm:$0xff]  ;;  %v827_v28 = vld [vmem:[#allocation8 + $0x158] sm:$0xff] }
 0x24b   :  { %v831_v31 = vld [vmem:[#allocation8 + $0x178] sm:$0xff] }
 0x24d   :  { %2380 = vmatpush1.bf16.msra.mxu1 %v3076_v58  ;;  %2466 = vmatpush1.bf16.msra.mxu0 %v3078_v60  ;;  %v791_v58 = vld [vmem:[#allocation8 + $0x38] sm:$0xff]  ;;  %v3132_v60 = vcombine.low %v1032_v39, %v1036_v40  ;;  %v834_v39 = vld [vmem:[#allocation8 + $0x190] sm:$0xff] }
 0x24e   :  { %2381 = vmatprep.subr.bf16.mxu1 %v3085_v62  ;;  %2467 = vmatprep.subr.bf16.mxu0 %v3087_v63  ;;  %v3134_v62 = vcombine.low %v1033_v41, %v1037_v42  ;;  %v2889_v63 = vcombine.high %v786_v49, %v790_v50  ;;  %v2891_v0 = vcombine.high %v787_v54, %v791_v58  ;;  %v838_v40 = vld [vmem:[#allocation8 + $0x1b0] sm:$0xff]  ;;  %v835_v41 = vld [vmem:[#allocation8 + $0x198] sm:$0xff] }
 0x24f   :  { %v839_v42 = vld [vmem:[#allocation8 + $0x1b8] sm:$0xff] }
 0x251   :  { %2382 = vmatpush1.bf16.msra.mxu1 %v3084_v52  ;;  %2468 = vmatpush1.bf16.msra.mxu0 %v3086_v53  ;;  %v799_v52 = vld [vmem:[#allocation8 + $0x78] sm:$0xff]  ;;  %v2888_v53 = vcombine.low %v786_v49, %v790_v50  ;;  %v842_v49 = vld [vmem:[#allocation8 + $0x1d0] sm:$0xff] }
 0x252   :  { %2383 = vmatprep.subr.bf16.mxu1 %v3093_v55  ;;  %2469 = vmatprep.subr.bf16.mxu0 %v3095_v56  ;;  %v2890_v55 = vcombine.low %v787_v54, %v791_v58  ;;  %v2897_v56 = vcombine.high %v794_v1, %v798_v2  ;;  %v2899_v57 = vcombine.high %v795_v51, %v799_v52  ;;  %v846_v50 = vld [vmem:[#allocation8 + $0x1f0] sm:$0xff]  ;;  %v843_v54 = vld [vmem:[#allocation8 + $0x1d8] sm:$0xff] }
 0x253   :  { %v847_v58 = vld [vmem:[#allocation8 + $0x1f8] sm:$0xff] }
 0x255   :  { %2384 = vmatpush1.bf16.msra.mxu1 %v3092_v6  ;;  %2470 = vmatpush1.bf16.msra.mxu0 %v3094_v7  ;;  %v807_v6 = vld [vmem:[#allocation8 + $0xb8] sm:$0xff]  ;;  %v2896_v7 = vcombine.low %v794_v1, %v798_v2  ;;  %v850_v1 = vld [vmem:[#allocation8 + $0x210] sm:$0xff] }
 0x256   :  { %2385 = vmatprep.subr.bf16.mxu1 %v3101_v8  ;;  %2471 = vmatprep.subr.bf16.mxu0 %v3103_v9  ;;  %v2898_v8 = vcombine.low %v795_v51, %v799_v52  ;;  %v2905_v9 = vcombine.high %v802_v3, %v806_v4  ;;  %v2907_v10 = vcombine.high %v803_v5, %v807_v6  ;;  %v854_v2 = vld [vmem:[#allocation8 + $0x230] sm:$0xff]  ;;  %v851_v51 = vld [vmem:[#allocation8 + $0x218] sm:$0xff] }
 0x257   :  { %v855_v52 = vld [vmem:[#allocation8 + $0x238] sm:$0xff] }
 0x259   :  { %2386 = vmatpush1.bf16.msra.mxu1 %v3100_v14  ;;  %2472 = vmatpush1.bf16.msra.mxu0 %v3102_v15  ;;  %v815_v14 = vld [vmem:[#allocation8 + $0xf8] sm:$0xff]  ;;  %v2904_v15 = vcombine.low %v802_v3, %v806_v4  ;;  %v858_v3 = vld [vmem:[#allocation8 + $0x250] sm:$0xff] }
 0x25a   :  { %2387 = vmatprep.subr.bf16.mxu1 %v3109_v16  ;;  %2473 = vmatprep.subr.bf16.mxu0 %v3111_v17  ;;  %v2906_v16 = vcombine.low %v803_v5, %v807_v6  ;;  %v2913_v17 = vcombine.high %v810_v11, %v814_v12  ;;  %v2915_v18 = vcombine.high %v811_v13, %v815_v14  ;;  %v862_v4 = vld [vmem:[#allocation8 + $0x270] sm:$0xff]  ;;  %v859_v5 = vld [vmem:[#allocation8 + $0x258] sm:$0xff] }
 0x25b   :  { %v863_v6 = vld [vmem:[#allocation8 + $0x278] sm:$0xff] }
 0x25d   :  { %2388 = vmatpush1.bf16.msra.mxu1 %v3108_v22  ;;  %2474 = vmatpush1.bf16.msra.mxu0 %v3110_v23  ;;  %v2912_v22 = vcombine.low %v810_v11, %v814_v12  ;;  %v2914_v23 = vcombine.low %v811_v13, %v815_v14  ;;  %v866_v11 = vld [vmem:[#allocation8 + $0x290] sm:$0xff]  ;;  %v867_v13 = vld [vmem:[#allocation8 + $0x298] sm:$0xff] }
 0x25e   :  { %2389 = vmatprep.subr.bf16.mxu1 %v3117_v24  ;;  %2475 = vmatprep.subr.bf16.mxu0 %v3119_v25  ;;  %v2921_v24 = vcombine.high %v818_v19, %v822_v20  ;;  %v870_v12 = vld [vmem:[#allocation8 + $0x2b0] sm:$0xff]  ;;  %v871_v14 = vld [vmem:[#allocation8 + $0x2b8] sm:$0xff] }
 0x261   :  { %2390 = vmatpush1.bf16.msra.mxu1 %v3116_v33  ;;  %2476 = vmatpush1.bf16.msra.mxu0 %v3118_v34  ;;  %v2920_v33 = vcombine.low %v818_v19, %v822_v20  ;;  %v874_v19 = vld [vmem:[#allocation8 + $0x2d0] sm:$0xff] }
 0x262   :  { %2391 = vmatprep.subr.bf16.mxu1 %v3125_v35  ;;  %2477 = vmatprep.subr.bf16.mxu0 %v3127_v38  ;;  %v2929_v35 = vcombine.high %v826_v26, %v830_v27  ;;  %v2931_v38 = vcombine.high %v827_v28, %v831_v31  ;;  %v878_v20 = vld [vmem:[#allocation8 + $0x2f0] sm:$0xff] }
 0x265   :  { %2392 = vmatpush1.bf16.msra.mxu1 %v3124_v45  ;;  %2478 = vmatpush1.bf16.msra.mxu0 %v3126_v46  ;;  %v2928_v45 = vcombine.low %v826_v26, %v830_v27  ;;  %v2930_v46 = vcombine.low %v827_v28, %v831_v31  ;;  %v882_v26 = vld [vmem:[#allocation8 + $0x310] sm:$0xff]  ;;  %v883_v28 = vld [vmem:[#allocation8 + $0x318] sm:$0xff] }
 0x266   :  { %2393 = vmatprep.subr.bf16.mxu1 %v3133_v47  ;;  %2479 = vmatprep.subr.bf16.mxu0 %v3135_v48  ;;  %v2937_v47 = vcombine.high %v834_v39, %v838_v40  ;;  %v2939_v48 = vcombine.high %v835_v41, %v839_v42  ;;  %v886_v27 = vld [vmem:[#allocation8 + $0x330] sm:$0xff]  ;;  %v887_v31 = vld [vmem:[#allocation8 + $0x338] sm:$0xff] }
 0x269   :  { %2394 = vmatpush1.bf16.msra.mxu1 %v3132_v60  ;;  %2480 = vmatpush1.bf16.msra.mxu0 %v3134_v62  ;;  %v2936_v60 = vcombine.low %v834_v39, %v838_v40  ;;  %v2938_v62 = vcombine.low %v835_v41, %v839_v42  ;;  %v890_v39 = vld [vmem:[#allocation8 + $0x350] sm:$0xff]  ;;  %v891_v41 = vld [vmem:[#allocation8 + $0x358] sm:$0xff] }
 0x26a   :  { %2492 = vmatprep.subr.bf16.mxu1 %v2889_v63  ;;  %2578 = vmatprep.subr.bf16.mxu0 %v2891_v0  ;;  %v2945_v63 = vcombine.high %v842_v49, %v846_v50  ;;  %v2947_v0 = vcombine.high %v843_v54, %v847_v58  ;;  %v894_v40 = vld [vmem:[#allocation8 + $0x370] sm:$0xff]  ;;  %v895_v42 = vld [vmem:[#allocation8 + $0x378] sm:$0xff] }
 0x26c   :  { %2396 = vmatmul.mubr.bf16.vlgmr.msra.gmra.mrb[4].mxu1 %v3561_v37  ;;  %2482 = vmatmul.mubr.bf16.vlgmr.msra.gmra.mrb[8].mxu0 %v3561_v37 }
 0x26d   :  { %2493 = vmatpush1.bf16.msra.mxu1 %v2888_v53  ;;  %2524 = vmatprep.mubr.bf16.mxu1 %v3563_v43  ;;  %v2944_v53 = vcombine.low %v842_v49, %v846_v50  ;;  %v898_v49 = vld [vmem:[#allocation8 + $0x390] sm:$0xff] }
 0x26e   :  { %2579 = vmatpush1.bf16.msra.mxu0 %v2890_v55  ;;  %2610 = vmatprep.mubr.bf16.mxu0 %v3563_v43  ;;  %v819_v43 = vld [vmem:[#allocation8 + $0x118] sm:$0xff]  ;;  %v2946_v55 = vcombine.low %v843_v54, %v847_v58  ;;  %v902_v50 = vld [vmem:[#allocation8 + $0x3b0] sm:$0xff] }
 0x26f   :  { %2494 = vmatprep.subr.bf16.mxu1 %v2897_v56  ;;  %2580 = vmatprep.subr.bf16.mxu0 %v2899_v57  ;;  %v2923_v25 = vcombine.high %v819_v43, %v823_v21  ;;  %v2922_v34 = vcombine.low %v819_v43, %v823_v21  ;;  %v2953_v56 = vcombine.high %v850_v1, %v854_v2  ;;  %v875_v43 = vld [vmem:[#allocation8 + $0x2d8] sm:$0xff] }
 0x270   :  { %v2955_v57 = vcombine.high %v851_v51, %v855_v52  ;;  %v879_v21 = vld [vmem:[#allocation8 + $0x2f8] sm:$0xff] }
 0x271   :  { %2495 = vmatpush1.bf16.msra.mxu1 %v2896_v7  ;;  %v2952_v7 = vcombine.low %v850_v1, %v854_v2  ;;  %v899_v54 = vld [vmem:[#allocation8 + $0x398] sm:$0xff]  ;;  %v906_v1 = vld [vmem:[#allocation8 + $0x3d0] sm:$0xff] }
 0x272   :  { %2581 = vmatpush1.bf16.msra.mxu0 %v2898_v8  ;;  %2496 = vmatprep.subr.bf16.mxu1 %v2905_v9  ;;  %v2954_v8 = vcombine.low %v851_v51, %v855_v52  ;;  %v2961_v9 = vcombine.high %v858_v3, %v862_v4  ;;  %v903_v58 = vld [vmem:[#allocation8 + $0x3b8] sm:$0xff]  ;;  %v910_v2 = vld [vmem:[#allocation8 + $0x3f0] sm:$0xff] }
 0x273   :  { %2582 = vmatprep.subr.bf16.mxu0 %v2907_v10  ;;  %v2963_v10 = vcombine.high %v859_v5, %v863_v6  ;;  %v907_v51 = vld [vmem:[#allocation8 + $0x3d8] sm:$0xff] }
 0x274   :  { %v911_v52 = vld [vmem:[#allocation8 + $0x3f8] sm:$0xff] }
 0x275   :  { %2497 = vmatpush1.bf16.msra.mxu1 %v2904_v15  ;;  %v2960_v15 = vcombine.low %v858_v3, %v862_v4  ;;  %v914_v3 = vld [vmem:[#allocation8 + $0x410] sm:$0xff] }
 0x276   :  { %2583 = vmatpush1.bf16.msra.mxu0 %v2906_v16  ;;  %2498 = vmatprep.subr.bf16.mxu1 %v2913_v17  ;;  %v2962_v16 = vcombine.low %v859_v5, %v863_v6  ;;  %v2969_v17 = vcombine.high %v866_v11, %v870_v12  ;;  %v918_v4 = vld [vmem:[#allocation8 + $0x430] sm:$0xff]  ;;  %v915_v5 = vld [vmem:[#allocation8 + $0x418] sm:$0xff] }
 0x277   :  { %2584 = vmatprep.subr.bf16.mxu0 %v2915_v18  ;;  %v2971_v18 = vcombine.high %v867_v13, %v871_v14  ;;  %v919_v6 = vld [vmem:[#allocation8 + $0x438] sm:$0xff] }
 0x279   :  { %2499 = vmatpush1.bf16.msra.mxu1 %v2912_v22  ;;  %v2968_v22 = vcombine.low %v866_v11, %v870_v12  ;;  %v922_v11 = vld [vmem:[#allocation8 + $0x450] sm:$0xff] }
 0x27a   :  { %2585 = vmatpush1.bf16.msra.mxu0 %v2914_v23  ;;  %2500 = vmatprep.subr.bf16.mxu1 %v2921_v24  ;;  %v2970_v23 = vcombine.low %v867_v13, %v871_v14  ;;  %v2977_v24 = vcombine.high %v874_v19, %v878_v20  ;;  %v926_v12 = vld [vmem:[#allocation8 + $0x470] sm:$0xff]  ;;  %v3016_v13 = vcombine.low %v914_v3, %v918_v4  ;;  %v923_v14 = vld [vmem:[#allocation8 + $0x458] sm:$0xff] }
 0x27b   :  { %2586 = vmatprep.subr.bf16.mxu0 %v2923_v25  ;;  %v2979_v25 = vcombine.high %v875_v43, %v879_v21 }
 0x27d   :  { %2501 = vmatpush1.bf16.msra.mxu1 %v2920_v33  ;;  %v2976_v33 = vcombine.low %v874_v19, %v878_v20  ;;  %v934_v19 = vld [vmem:[#allocation8 + $0x4b0] sm:$0xff] }
 0x27e   :  { %2587 = vmatpush1.bf16.msra.mxu0 %v2922_v34  ;;  %2502 = vmatprep.subr.bf16.mxu1 %v2929_v35  ;;  %v2978_v34 = vcombine.low %v875_v43, %v879_v21  ;;  %v2985_v35 = vcombine.high %v882_v26, %v886_v27  ;;  %v931_v43 = vld [vmem:[#allocation8 + $0x498] sm:$0xff] }
 0x27f   :  { %2588 = vmatprep.subr.bf16.mxu0 %v2931_v38  ;;  %v2987_v38 = vcombine.high %v883_v28, %v887_v31  ;;  %v935_v21 = vld [vmem:[#allocation8 + $0x4b8] sm:$0xff] }
 0x281   :  { %2503 = vmatpush1.bf16.msra.mxu1 %v2928_v45  ;;  %v2984_v45 = vcombine.low %v882_v26, %v886_v27  ;;  %v938_v26 = vld [vmem:[#allocation8 + $0x4d0] sm:$0xff] }
 0x282   :  { %2589 = vmatpush1.bf16.msra.mxu0 %v2930_v46  ;;  %2504 = vmatprep.subr.bf16.mxu1 %v2937_v47  ;;  %v2986_v46 = vcombine.low %v883_v28, %v887_v31  ;;  %v2993_v47 = vcombine.high %v890_v39, %v894_v40  ;;  %v942_v27 = vld [vmem:[#allocation8 + $0x4f0] sm:$0xff]  ;;  %v939_v28 = vld [vmem:[#allocation8 + $0x4d8] sm:$0xff] }
 0x283   :  { %2590 = vmatprep.subr.bf16.mxu0 %v2939_v48  ;;  %v2995_v48 = vcombine.high %v891_v41, %v895_v42  ;;  %v943_v31 = vld [vmem:[#allocation8 + $0x4f8] sm:$0xff] }
 0x285   :  { %2505 = vmatpush1.bf16.msra.mxu1 %v2936_v60  ;;  %v2992_v60 = vcombine.low %v890_v39, %v894_v40  ;;  %v950_v39 = vld [vmem:[#allocation8 + $0x530] sm:$0xff]  ;;  %v947_v40 = vld [vmem:[#allocation8 + $0x518] sm:$0xff] }
 0x286   :  { %2591 = vmatpush1.bf16.msra.mxu0 %v2938_v62  ;;  %2506 = vmatprep.subr.bf16.mxu1 %v2945_v63  ;;  %v2994_v62 = vcombine.low %v891_v41, %v895_v42  ;;  %v3001_v63 = vcombine.high %v898_v49, %v902_v50  ;;  %v951_v41 = vld [vmem:[#allocation8 + $0x538] sm:$0xff]  ;;  %v3042_v42 = vcombine.low %v939_v28, %v943_v31 }
 0x287   :  { %2592 = vmatprep.subr.bf16.mxu0 %v2947_v0  ;;  %v3003_v0 = vcombine.high %v899_v54, %v903_v58 }
 0x289   :  { %2507 = vmatpush1.bf16.msra.mxu1 %v2944_v53  ;;  %v3000_v53 = vcombine.low %v898_v49, %v902_v50  ;;  %v955_v49 = vld [vmem:[#allocation8 + $0x558] sm:$0xff] }
 0x28a   :  { %2593 = vmatpush1.bf16.msra.mxu0 %v2946_v55  ;;  %2508 = vmatprep.subr.bf16.mxu1 %v2953_v56  ;;  %v3002_v55 = vcombine.low %v899_v54, %v903_v58  ;;  %v3009_v56 = vcombine.high %v906_v1, %v910_v2  ;;  %v959_v50 = vld [vmem:[#allocation8 + $0x578] sm:$0xff]  ;;  %v3050_v58 = vcombine.low %v947_v40, %v951_v41 }
 0x28b   :  { %2594 = vmatprep.subr.bf16.mxu0 %v2955_v57  ;;  %v3011_v57 = vcombine.high %v907_v51, %v911_v52 }
 0x28d   :  { %2509 = vmatpush1.bf16.msra.mxu1 %v2952_v7  ;;  %v3008_v7 = vcombine.low %v906_v1, %v910_v2  ;;  %v963_v1 = vld [vmem:[#allocation8 + $0x598] sm:$0xff] }
 0x28e   :  { %2595 = vmatpush1.bf16.msra.mxu0 %v2954_v8  ;;  %2510 = vmatprep.subr.bf16.mxu1 %v2961_v9  ;;  %v3010_v8 = vcombine.low %v907_v51, %v911_v52  ;;  %v3017_v9 = vcombine.high %v914_v3, %v918_v4  ;;  %v967_v2 = vld [vmem:[#allocation8 + $0x5b8] sm:$0xff]  ;;  %v3058_v52 = vcombine.low %v955_v49, %v959_v50 }
 0x28f   :  { %2596 = vmatprep.subr.bf16.mxu0 %v2963_v10  ;;  %v3019_v10 = vcombine.high %v915_v5, %v919_v6  ;;  %v971_v3 = vld [vmem:[#allocation8 + $0x5d8] sm:$0xff] }
 0x290   :  { %v975_v4 = vld [vmem:[#allocation8 + $0x5f8] sm:$0xff] }
 0x291   :  { %2511 = vmatpush1.bf16.msra.mxu1 %v2960_v15  ;;  %v927_v15 = vld [vmem:[#allocation8 + $0x478] sm:$0xff] }
 0x292   :  { %2597 = vmatpush1.bf16.msra.mxu0 %v2962_v16  ;;  %2512 = vmatprep.subr.bf16.mxu1 %v2969_v17  ;;  %v3018_v16 = vcombine.low %v915_v5, %v919_v6  ;;  %v3025_v17 = vcombine.high %v922_v11, %v926_v12  ;;  %v3027_v20 = vcombine.high %v923_v14, %v927_v15 }
 0x293   :  { %2598 = vmatprep.subr.bf16.mxu0 %v2971_v18  ;;  %v930_v18 = vld [vmem:[#allocation8 + $0x490] sm:$0xff]  ;;  %v3066_v6 = vcombine.low %v963_v1, %v967_v2 }
 0x295   :  { %2513 = vmatpush1.bf16.msra.mxu1 %v2968_v22  ;;  %v3024_v22 = vcombine.low %v922_v11, %v926_v12  ;;  %v979_v11 = vld [vmem:[#allocation8 + $0x618] sm:$0xff] }
 0x296   :  { %2599 = vmatpush1.bf16.msra.mxu0 %v2970_v23  ;;  %2514 = vmatprep.subr.bf16.mxu1 %v2977_v24  ;;  %v3026_v23 = vcombine.low %v923_v14, %v927_v15  ;;  %v3033_v24 = vcombine.high %v930_v18, %v934_v19  ;;  %v983_v12 = vld [vmem:[#allocation8 + $0x638] sm:$0xff]  ;;  %v3074_v14 = vcombine.low %v971_v3, %v975_v4 }
 0x297   :  { %2600 = vmatprep.subr.bf16.mxu0 %v2979_v25  ;;  %v3035_v25 = vcombine.high %v931_v43, %v935_v21 }
 0x299   :  { %2515 = vmatpush1.bf16.msra.mxu1 %v2976_v33  ;;  %v3032_v33 = vcombine.low %v930_v18, %v934_v19  ;;  %v990_v18 = vld [vmem:[#allocation8 + $0x670] sm:$0xff]  ;;  %v987_v19 = vld [vmem:[#allocation8 + $0x658] sm:$0xff] }
 0x29a   :  { %2601 = vmatpush1.bf16.msra.mxu0 %v2978_v34  ;;  %2516 = vmatprep.subr.bf16.mxu1 %v2985_v35  ;;  %v3041_v34 = vcombine.high %v938_v26, %v942_v27  ;;  %v3043_v35 = vcombine.high %v939_v28, %v943_v31 }
 0x29b   :  { %2602 = vmatprep.subr.bf16.mxu0 %v2987_v38  ;;  %v946_v38 = vld [vmem:[#allocation8 + $0x510] sm:$0xff] }
 0x29c   :  { %v3048_v54 = vcombine.low %v946_v38, %v950_v39 }
 0x29d   :  { %2517 = vmatpush1.bf16.msra.mxu1 %v2984_v45  ;;  %v3049_v45 = vcombine.high %v946_v38, %v950_v39  ;;  %v1003_v38 = vld [vmem:[#allocation8 + $0x6d8] sm:$0xff] }
 0x29e   :  { %2603 = vmatpush1.bf16.msra.mxu0 %v2986_v46  ;;  %2518 = vmatprep.subr.bf16.mxu1 %v2993_v47  ;;  %v3051_v46 = vcombine.high %v947_v40, %v951_v41  ;;  %v954_v47 = vld [vmem:[#allocation8 + $0x550] sm:$0xff]  ;;  %v1007_v39 = vld [vmem:[#allocation8 + $0x6f8] sm:$0xff] }
 0x29f   :  { %2604 = vmatprep.subr.bf16.mxu0 %v2995_v48  ;;  %v958_v48 = vld [vmem:[#allocation8 + $0x570] sm:$0xff] }
 0x2a0   :  { %v3056_v51 = vcombine.low %v954_v47, %v958_v48 }
 0x2a1   :  { %2519 = vmatpush1.bf16.msra.mxu1 %v2992_v60  ;;  %v3057_v60 = vcombine.high %v954_v47, %v958_v48  ;;  %v1011_v47 = vld [vmem:[#allocation8 + $0x718] sm:$0xff] }
 0x2a2   :  { %2605 = vmatpush1.bf16.msra.mxu0 %v2994_v62  ;;  %2520 = vmatprep.subr.bf16.mxu1 %v3001_v63  ;;  %v3059_v62 = vcombine.high %v955_v49, %v959_v50  ;;  %v962_v63 = vld [vmem:[#allocation8 + $0x590] sm:$0xff]  ;;  %v1015_v48 = vld [vmem:[#allocation8 + $0x738] sm:$0xff]  ;;  %v3106_v50 = vcombine.low %v1003_v38, %v1007_v39 }
 0x2a3   :  { %2606 = vmatprep.subr.bf16.mxu0 %v3003_v0  ;;  %v966_v0 = vld [vmem:[#allocation8 + $0x5b0] sm:$0xff] }
 0x2a4   :  { %v3064_v5 = vcombine.low %v962_v63, %v966_v0 }
 0x2a5   :  { %2521 = vmatpush1.bf16.msra.mxu1 %v3000_v53  ;;  %v3065_v53 = vcombine.high %v962_v63, %v966_v0  ;;  %v1019_v63 = vld [vmem:[#allocation8 + $0x758] sm:$0xff] }
 0x2a6   :  { %2607 = vmatpush1.bf16.msra.mxu0 %v3002_v55  ;;  %2522 = vmatprep.subr.bf16.mxu1 %v3009_v56  ;;  %v3067_v55 = vcombine.high %v963_v1, %v967_v2  ;;  %v970_v56 = vld [vmem:[#allocation8 + $0x5d0] sm:$0xff]  ;;  %v1023_v0 = vld [vmem:[#allocation8 + $0x778] sm:$0xff]  ;;  %v3114_v2 = vcombine.low %v1011_v47, %v1015_v48 }
 0x2a7   :  { %2608 = vmatprep.subr.bf16.mxu0 %v3011_v57  ;;  %v974_v57 = vld [vmem:[#allocation8 + $0x5f0] sm:$0xff] }
 0x2a9   :  { %2523 = vmatpush1.bf16.msra.mxu1 %v3008_v7  ;;  %v3073_v7 = vcombine.high %v970_v56, %v974_v57 }
 0x2aa   :  { %2609 = vmatpush1.bf16.msra.mxu0 %v3010_v8  ;;  %2535 = vmatprep.subr.bf16.mxu1 %v3017_v9  ;;  %v3075_v8 = vcombine.high %v971_v3, %v975_v4  ;;  %v978_v9 = vld [vmem:[#allocation8 + $0x610] sm:$0xff]  ;;  %v3122_v4 = vcombine.low %v1019_v63, %v1023_v0 }
 0x2ab   :  { %2621 = vmatprep.subr.bf16.mxu0 %v3019_v10  ;;  %v982_v10 = vld [vmem:[#allocation8 + $0x630] sm:$0xff] }
 0x2ac   :  { %2525 = vmatmul.mubr.bf16.vlgmr.msra.gmra.mrb[8].mxu1 %v3559_v36  ;;  %v3081_v15 = vcombine.high %v978_v9, %v982_v10 }
 0x2ad   :  { %2611 = vmatmul.mubr.bf16.vlgmr.msra.gmra.mrb[12].mxu0 %v3559_v36  ;;  %2536 = vmatpush1.bf16.msra.mxu1 %v3016_v13  ;;  %v3034_v36 = vcombine.low %v931_v43, %v935_v21  ;;  %v3072_v13 = vcombine.low %v970_v56, %v974_v57  ;;  %v3080_v43 = vcombine.low %v978_v9, %v982_v10  ;;  %v1027_v56 = vld [vmem:[#allocation8 + $0x798] sm:$0xff] }
 0x2ae   :  { %2567 = vmatprep.mubr.bf16.mxu1 %v3565_v44  ;;  %2622 = vmatpush1.bf16.msra.mxu0 %v3018_v16  ;;  %v3083_v16 = vcombine.high %v979_v11, %v983_v12  ;;  %v3082_v21 = vcombine.low %v979_v11, %v983_v12  ;;  %v1031_v57 = vld [vmem:[#allocation8 + $0x7b8] sm:$0xff] }
 0x2af   :  { %2653 = vmatprep.mubr.bf16.mxu0 %v3565_v44  ;;  %2537 = vmatprep.subr.bf16.mxu1 %v3025_v17  ;;  %v3040_v44 = vcombine.low %v938_v26, %v942_v27  ;;  %v986_v17 = vld [vmem:[#allocation8 + $0x650] sm:$0xff]  ;;  %v995_v26 = vld [vmem:[#allocation8 + $0x698] sm:$0xff]  ;;  %v3130_v12 = vcombine.low %v1027_v56, %v1031_v57 }
 0x2b0   :  { %2623 = vmatprep.subr.bf16.mxu0 %v3027_v20  ;;  %v991_v20 = vld [vmem:[#allocation8 + $0x678] sm:$0xff]  ;;  %v3088_v28 = vcombine.low %v986_v17, %v990_v18 }
 0x2b1   :  { %2538 = vmatpush1.bf16.msra.mxu1 %v3024_v22  ;;  %v3089_v22 = vcombine.high %v986_v17, %v990_v18  ;;  %v999_v27 = vld [vmem:[#allocation8 + $0x6b8] sm:$0xff]  ;;  %v3090_v31 = vcombine.low %v987_v19, %v991_v20  ;;  %v779_v17 = vld [vmem:[%s3620_s6] sm:$0xff]  ;;  %s3419_s6 = smov [#allocation10]  }
 0x2b2   :  { %2624 = vmatpush1.bf16.msra.mxu0 %v3026_v23  ;;  %2539 = vmatprep.subr.bf16.mxu1 %v3033_v24  ;;  %v3091_v23 = vcombine.high %v987_v19, %v991_v20  ;;  %v994_v24 = vld [vmem:[#allocation8 + $0x690] sm:$0xff]  ;;  %v3098_v41 = vcombine.low %v995_v26, %v999_v27  ;;  %v1035_v9 = vld [vmem:[#allocation8 + $0x7d8] sm:$0xff]  ;;  %v2668_v18 = vrot.slane %v779_v17, %v3520_v30  ;;  %s2790_s9 = sshll.u32 %s3419_s6, 4  ;;  %s2791_s9 = int_to_ptr.vmem [resolvable:$true] %s2790_s9 }
 0x2b3   :  { %2625 = vmatprep.subr.bf16.mxu0 %v3035_v25  ;;  %v998_v25 = vld [vmem:[#allocation8 + $0x6b0] sm:$0xff]  ;;  %v1039_v10 = vld [vmem:[#allocation8 + $0x7f8] sm:$0xff]  ;;  %v2676_v19 = vrot.slane %v779_v17, %v737_v59  ;;  %v2672_v20 = vrot.slane %v779_v17, %v3526_v32  ;;  %s3378_s10 = scalar_lea.vmem %s2791_s9, 2048  ;;  %p3383_p5 = scmp.lt.s32.totalorder %s2791_s9, %s2791_s9 }
 0x2b4   :  { %v3096_v40 = vcombine.low %v994_v24, %v998_v25  ;;  %p3379_p4 = scmp.ne.s32.totalorder %s2791_s9, %s3378_s10  ;;  %p3384_p6 = scmp.lt.s32.totalorder %s3378_s10, %s3378_s10 }
 0x2b5   :  { %2540 = vmatpush1.bf16.msra.mxu1 %v3032_v33  ;;  %v3097_v33 = vcombine.high %v994_v24, %v998_v25 }
 0x2b6   :  { %2626 = vmatpush1.bf16.msra.mxu0 %v3034_v36  ;;  %2541 = vmatprep.subr.bf16.mxu1 %v3041_v34  ;;  %v3099_v36 = vcombine.high %v995_v26, %v999_v27  ;;  %v1002_v34 = vld [vmem:[#allocation8 + $0x6d0] sm:$0xff]  ;;  %p3385_p7 = por %p3384_p6, %p3383_p5 }
 0x2b7   :  { %2627 = vmatprep.subr.bf16.mxu0 %v3043_v35  ;;  %v1006_v35 = vld [vmem:[#allocation8 + $0x6f0] sm:$0xff] }
 0x2b8   :  { %v3104_v49 = vcombine.low %v1002_v34, %v1006_v35  ;;  %p3386_p8 = pnand %p3385_p7, %p3379_p4 }
 0x2b9   :  { %2542 = vmatpush1.bf16.msra.mxu1 %v3040_v44  ;;  %v3105_v44 = vcombine.high %v1002_v34, %v1006_v35 }
 0x2ba   :  { %2628 = vmatpush1.bf16.msra.mxu0 %v3042_v42  ;;  %2543 = vmatprep.subr.bf16.mxu1 %v3049_v45  ;;  %v3107_v42 = vcombine.high %v1003_v38, %v1007_v39  ;;  %v1010_v45 = vld [vmem:[#allocation8 + $0x710] sm:$0xff] }
 0x2bb   :  { %2629 = vmatprep.subr.bf16.mxu0 %v3051_v46  ;;  %v1014_v46 = vld [vmem:[#allocation8 + $0x730] sm:$0xff] }
 0x2bc   :  { %v3112_v1 = vcombine.low %v1010_v45, %v1014_v46 }
 0x2bd   :  { %2544 = vmatpush1.bf16.msra.mxu1 %v3048_v54  ;;  %v3113_v54 = vcombine.high %v1010_v45, %v1014_v46 }
 0x2be   :  { %2630 = vmatpush1.bf16.msra.mxu0 %v3050_v58  ;;  %2545 = vmatprep.subr.bf16.mxu1 %v3057_v60  ;;  %v3115_v58 = vcombine.high %v1011_v47, %v1015_v48  ;;  %v1018_v60 = vld [vmem:[#allocation8 + $0x750] sm:$0xff] }
 0x2bf   :  { %2631 = vmatprep.subr.bf16.mxu0 %v3059_v62  ;;  %v1022_v62 = vld [vmem:[#allocation8 + $0x770] sm:$0xff] }
 0x2c0   :  { %v3120_v3 = vcombine.low %v1018_v60, %v1022_v62 }
 0x2c1   :  { %2546 = vmatpush1.bf16.msra.mxu1 %v3056_v51  ;;  %v3121_v51 = vcombine.high %v1018_v60, %v1022_v62  ;;  %v2683_v60 = vsub.s32 4, %v3517_v29  ;;  %v2691_v62 = vsub.s32 6, %v3517_v29 }
 0x2c2   :  { %2632 = vmatpush1.bf16.msra.mxu0 %v3058_v52  ;;  %2547 = vmatprep.subr.bf16.mxu1 %v3065_v53  ;;  %v3123_v52 = vcombine.high %v1019_v63, %v1023_v0  ;;  %v1026_v53 = vld [vmem:[#allocation8 + $0x790] sm:$0xff]  ;;  %v2687_v63 = vsub.s32 5, %v3517_v29  ;;  %v2695_v0 = vsub.s32 7, %v3517_v29 }
 0x2c3   :  { %2633 = vmatprep.subr.bf16.mxu0 %v3067_v55  ;;  %v1030_v55 = vld [vmem:[#allocation8 + $0x7b0] sm:$0xff] }
 0x2c4   :  { %v3128_v11 = vcombine.low %v1026_v53, %v1030_v55 }
 0x2c5   :  { %2548 = vmatpush1.bf16.msra.mxu1 %v3064_v5  ;;  %v3129_v5 = vcombine.high %v1026_v53, %v1030_v55 }
 0x2c6   :  { %2634 = vmatpush1.bf16.msra.mxu0 %v3066_v6  ;;  %2549 = vmatprep.subr.bf16.mxu1 %v3073_v7  ;;  %v3131_v6 = vcombine.high %v1027_v56, %v1031_v57  ;;  %v1034_v7 = vld [vmem:[#allocation8 + $0x7d0] sm:$0xff] }
 0x2c7   :  { %2635 = vmatprep.subr.bf16.mxu0 %v3075_v8  ;;  %v1038_v8 = vld [vmem:[#allocation8 + $0x7f0] sm:$0xff] }
 0x2c9   :  { %2550 = vmatpush1.bf16.msra.mxu1 %v3072_v13  ;;  %v3137_v13 = vcombine.high %v1034_v7, %v1038_v8 }
 0x2ca   :  { %2636 = vmatpush1.bf16.msra.mxu0 %v3074_v14  ;;  %2551 = vmatprep.subr.bf16.mxu1 %v3081_v15  ;;  %v3139_v14 = vcombine.high %v1035_v9, %v1039_v10  ;;  %v3136_v15 = vcombine.low %v1034_v7, %v1038_v8 }
 0x2cb   :  { %2637 = vmatprep.subr.bf16.mxu0 %v3083_v16  ;;  %v3138_v16 = vcombine.low %v1035_v9, %v1039_v10 }
 0x2cd   :  { %2552 = vmatpush1.bf16.msra.mxu1 %v3080_v43  ;;  %v2680_v43 = vrot.slane %v779_v17, %v741_v61 }
 0x2ce   :  { %2638 = vmatpush1.bf16.msra.mxu0 %v3082_v21  ;;  %2553 = vmatprep.subr.bf16.mxu1 %v3089_v22 }
 0x2cf   :  { %2639 = vmatprep.subr.bf16.mxu0 %v3091_v23 }
 0x2d1   :  { %2554 = vmatpush1.bf16.msra.mxu1 %v3088_v28 }
 0x2d2   :  { %2640 = vmatpush1.bf16.msra.mxu0 %v3090_v31  ;;  %2555 = vmatprep.subr.bf16.mxu1 %v3097_v33 }
 0x2d3   :  { %2641 = vmatprep.subr.bf16.mxu0 %v3099_v36 }
 0x2d5   :  { %2556 = vmatpush1.bf16.msra.mxu1 %v3096_v40 }
 0x2d6   :  { %2642 = vmatpush1.bf16.msra.mxu0 %v3098_v41  ;;  %2557 = vmatprep.subr.bf16.mxu1 %v3105_v44 }
 0x2d7   :  { %2643 = vmatprep.subr.bf16.mxu0 %v3107_v42 }
 0x2d9   :  { %2558 = vmatpush1.bf16.msra.mxu1 %v3104_v49 }
 0x2da   :  { %2644 = vmatpush1.bf16.msra.mxu0 %v3106_v50  ;;  %2559 = vmatprep.subr.bf16.mxu1 %v3113_v54 }
 0x2db   :  { %2645 = vmatprep.subr.bf16.mxu0 %v3115_v58 }
 0x2dd   :  { %2560 = vmatpush1.bf16.msra.mxu1 %v3112_v1  ;;  %v2684_v1 = vrot.slane %v779_v17, %v2683_v60 }
 0x2de   :  { %2646 = vmatpush1.bf16.msra.mxu0 %v3114_v2  ;;  %2561 = vmatprep.subr.bf16.mxu1 %v3121_v51  ;;  %v2692_v2 = vrot.slane %v779_v17, %v2691_v62  ;;  %v2688_v51 = vrot.slane %v779_v17, %v2687_v63 }
 0x2df   :  { %2647 = vmatprep.subr.bf16.mxu0 %v3123_v52  ;;  %v2696_v52 = vrot.slane %v779_v17, %v2695_v0 }
 0x2e1   :  { %2562 = vmatpush1.bf16.msra.mxu1 %v3120_v3 }
 0x2e2   :  { %2648 = vmatpush1.bf16.msra.mxu0 %v3122_v4  ;;  %2563 = vmatprep.subr.bf16.mxu1 %v3129_v5 }
 0x2e3   :  { %2649 = vmatprep.subr.bf16.mxu0 %v3131_v6 }
 0x2e5   :  { %2564 = vmatpush1.bf16.msra.mxu1 %v3128_v11 }
 0x2e6   :  { %2650 = vmatpush1.bf16.msra.mxu0 %v3130_v12  ;;  %2565 = vmatprep.subr.bf16.mxu1 %v3137_v13 }
 0x2e7   :  { %2651 = vmatprep.subr.bf16.mxu0 %v3139_v14 }
 0x2e9   :  { %2566 = vmatpush1.bf16.msra.mxu1 %v3136_v15 }
 0x2ea   :  { %2652 = vmatpush1.bf16.msra.mxu0 %v3138_v16 }
 0x2ec   :  { %2568 = vmatmul.mubr.bf16.vlgmr.msra.gmra.mrb[8].mxu1 %v3561_v37 }
 0x2ed   :  { %2654 = vmatmul.mubr.bf16.vlgmr.msra.gmra.mrb[12].mxu0 %v3561_v37 }
 0x33f   :  { %v2397_v21 = vpop.f32.mrb[4].mxu1  ;;  %v2483_v22 = vpop.f32.mrb[8].mxu0 }
 0x340   :  { %v2705_v23 = vadd.f32 %v2668_v18, %v2397_v21  ;;  %v2707_v24 = vadd.f32 %v2676_v19, %v2483_v22  ;;  %v2399_v25 = vpop.f32.mrb[5].mxu1  ;;  %v2485_v37 = vpop.f32.mrb[9].mxu0 }
 0x341   :  { %v2706_v26 = vadd.f32 %v2672_v20, %v2399_v25  ;;  %v2708_v27 = vadd.f32 %v2680_v43, %v2485_v37  ;;  %v2401_v28 = vpop.f32.mrb[6].mxu1  ;;  %v2487_v31 = vpop.f32.mrb[10].mxu0 }
 0x342   :  { %vm2721_vm12 = vcmp.gt.f32.partialorder %v2705_v23, 0.0  ;;  %v2737_v30 = vmul.f32 0.01, %v2705_v23  ;;  %vm2723_vm13 = vcmp.gt.f32.partialorder %v2707_v24, 0.0  ;;  %v2739_v33 = vmul.f32 0.01, %v2707_v24 }
 0x343   :  { %vm2722_vm14 = vcmp.gt.f32.partialorder %v2706_v26, 0.0  ;;  %v2738_v59 = vmul.f32 0.01, %v2706_v26  ;;  %vm2724_vm15 = vcmp.gt.f32.partialorder %v2708_v27, 0.0  ;;  %v2740_v32 = vmul.f32 0.01, %v2708_v27 }
 0x344   :  { %v2753_v36 = vsel %vm2721_vm12, %v2705_v23, %v2737_v30  ;;  %v2755_v61 = vsel %vm2723_vm13, %v2707_v24, %v2739_v33  ;;  %v2713_v34 = vadd.f32 %v2668_v18, %v2401_v28  ;;  %v2715_v35 = vadd.f32 %v2676_v19, %v2487_v31  ;;  %v2403_v38 = vpop.f32.mrb[7].mxu1  ;;  %v2489_v39 = vpop.f32.mrb[11].mxu0 }
 0x345   :  { %2769 = vst [vmem:[#allocation10] sm:$0xff] %v2753_v36  ;;  %2771 = vst [vmem:[#allocation10 + $0x10] sm:$0xff] %v2755_v61  ;;  %v2754_v40 = vsel %vm2722_vm14, %v2706_v26, %v2738_v59  ;;  %v2756_v41 = vsel %vm2724_vm15, %v2708_v27, %v2740_v32  ;;  %v2714_v44 = vadd.f32 %v2672_v20, %v2403_v38 }
 0x346   :  { %v2716_v42 = vadd.f32 %v2680_v43, %v2489_v39  ;;  %2770 = vst [vmem:[#allocation10 + $0x8] sm:$0xff] %v2754_v40  ;;  %2772 = vst [vmem:[#allocation10 + $0x18] sm:$0xff] %v2756_v41  ;;  %vm2729_vm0 = vcmp.gt.f32.partialorder %v2713_v34, 0.0  ;;  %v2745_v45 = vmul.f32 0.01, %v2713_v34  ;;  %vm2731_vm1 = vcmp.gt.f32.partialorder %v2715_v35, 0.0 }
 0x347   :  { %v2747_v46 = vmul.f32 0.01, %v2715_v35  ;;  %vm2730_vm2 = vcmp.gt.f32.partialorder %v2714_v44, 0.0  ;;  %v2746_v47 = vmul.f32 0.01, %v2714_v44 }
 0x348   :  { %vm2732_vm3 = vcmp.gt.f32.partialorder %v2716_v42, 0.0  ;;  %v2748_v48 = vmul.f32 0.01, %v2716_v42  ;;  %v2761_v49 = vsel %vm2729_vm0, %v2713_v34, %v2745_v45 }
 0x349   :  { %v2763_v50 = vsel %vm2731_vm1, %v2715_v35, %v2747_v46  ;;  %2777 = vst [vmem:[#allocation10 + $0x40] sm:$0xff] %v2761_v49  ;;  %v2762_v54 = vsel %vm2730_vm2, %v2714_v44, %v2746_v47 }
 0x34a   :  { %2779 = vst [vmem:[#allocation10 + $0x50] sm:$0xff] %v2763_v50  ;;  %v2764_v58 = vsel %vm2732_vm3, %v2716_v42, %v2748_v48  ;;  %2778 = vst [vmem:[#allocation10 + $0x48] sm:$0xff] %v2762_v54 }
 0x34b   :  { %2780 = vst [vmem:[#allocation10 + $0x58] sm:$0xff] %v2764_v58 }
 0x3bf   :  { %v2569_v53 = vpop.f32.mrb[8].mxu1 }
 0x3c0   :  { %v2709_v55 = vadd.f32 %v2684_v1, %v2569_v53  ;;  %v2655_v56 = vpop.f32.mrb[12].mxu0  ;;  %v2571_v57 = vpop.f32.mrb[9].mxu1 }
 0x3c1   :  { %v2711_v3 = vadd.f32 %v2692_v2, %v2655_v56  ;;  %v2710_v4 = vadd.f32 %v2688_v51, %v2571_v57  ;;  %v2657_v5 = vpop.f32.mrb[13].mxu0  ;;  %v2573_v6 = vpop.f32.mrb[10].mxu1 }
 0x3c2   :  { %vm2725_vm4 = vcmp.gt.f32.partialorder %v2709_v55, 0.0  ;;  %v2741_v7 = vmul.f32 0.01, %v2709_v55  ;;  %v2712_v8 = vadd.f32 %v2696_v52, %v2657_v5  ;;  %v2717_v9 = vadd.f32 %v2684_v1, %v2573_v6  ;;  %v2659_v10 = vpop.f32.mrb[14].mxu0  ;;  %v2575_v11 = vpop.f32.mrb[11].mxu1 }
 0x3c3   :  { %vm2727_vm5 = vcmp.gt.f32.partialorder %v2711_v3, 0.0  ;;  %v2743_v29 = vmul.f32 0.01, %v2711_v3  ;;  %vm2726_vm6 = vcmp.gt.f32.partialorder %v2710_v4, 0.0  ;;  %v2742_v12 = vmul.f32 0.01, %v2710_v4 }
 0x3c4   :  { %v2757_v13 = vsel %vm2725_vm4, %v2709_v55, %v2741_v7  ;;  %vm2728_vm7 = vcmp.gt.f32.partialorder %v2712_v8, 0.0  ;;  %v2744_v14 = vmul.f32 0.01, %v2712_v8  ;;  %vm2733_vm8 = vcmp.gt.f32.partialorder %v2717_v9, 0.0  ;;  %v2661_v15 = vpop.f32.mrb[15].mxu0 }
 0x3c5   :  { %2773 = vst [vmem:[#allocation10 + $0x20] sm:$0xff] %v2757_v13  ;;  %v2759_v16 = vsel %vm2727_vm5, %v2711_v3, %v2743_v29  ;;  %v2758_v17 = vsel %vm2726_vm6, %v2710_v4, %v2742_v12  ;;  %v2749_v18 = vmul.f32 0.01, %v2717_v9  ;;  %v2719_v19 = vadd.f32 %v2692_v2, %v2659_v10 }
 0x3c6   :  { %2775 = vst [vmem:[#allocation10 + $0x30] sm:$0xff] %v2759_v16  ;;  %2774 = vst [vmem:[#allocation10 + $0x28] sm:$0xff] %v2758_v17  ;;  %v2760_v20 = vsel %vm2728_vm7, %v2712_v8, %v2744_v14  ;;  %v2718_v43 = vadd.f32 %v2688_v51, %v2575_v11  ;;  %v2720_v21 = vadd.f32 %v2696_v52, %v2661_v15 }
 0x3c7   :  { %2776 = vst [vmem:[#allocation10 + $0x38] sm:$0xff] %v2760_v20  ;;  %v2765_v22 = vsel %vm2733_vm8, %v2717_v9, %v2749_v18  ;;  %vm2735_vm9 = vcmp.gt.f32.partialorder %v2719_v19, 0.0  ;;  %v2751_v23 = vmul.f32 0.01, %v2719_v19 }
 0x3c8   :  { %2781 = vst [vmem:[#allocation10 + $0x60] sm:$0xff] %v2765_v22  ;;  %vm2734_vm10 = vcmp.gt.f32.partialorder %v2718_v43, 0.0  ;;  %v2750_v24 = vmul.f32 0.01, %v2718_v43  ;;  %vm2736_vm11 = vcmp.gt.f32.partialorder %v2720_v21, 0.0 }
 0x3c9   :  { %v2752_v25 = vmul.f32 0.01, %v2720_v21  ;;  %v2767_v37 = vsel %vm2735_vm9, %v2719_v19, %v2751_v23 }
 0x3ca   :  { %2783 = vst [vmem:[#allocation10 + $0x70] sm:$0xff] %v2767_v37  ;;  %v2766_v26 = vsel %vm2734_vm10, %v2718_v43, %v2750_v24 }
 0x3cb   :  { %v2768_v27 = vsel %vm2736_vm11, %v2720_v21, %v2752_v25  ;;  %2782 = vst [vmem:[#allocation10 + $0x68] sm:$0xff] %v2766_v26 }
 0x3cc   :  { %2784 = vst [vmem:[#allocation10 + $0x78] sm:$0xff] %v2768_v27 }
 0x3cd   :  { %3389 = shalt.err (!%p3386_p8)
}
 0x3ce   :  { %s3390_s15 = scalar_lea.hbm %s3621_s7, 2048 }
 0x3cf   :  { %p3391_p9 = scmp.ne.s32.totalorder %s3621_s7, %s3390_s15  ;;  %p3394_p10 = scmp.lt.u32.totalorder %s3390_s15, %s3621_s7 }
 0x3d1   :  { %p3396_p11 = pnand %p3394_p10, %p3391_p9 }
 0x3d3   :  { %3399 = shalt.err (!%p3396_p11)
}
 0x3d4   :  { %s3420_s16 = smov 1024   ;;  %s3421_s17 = smov 64  }
 0x3d5   :  { %2796 = dma.vmem_to_hbm [thread:$0]  %s2791_s9, 2048, %s3621_s7, [#allocation4], %s3420_s16, %s3420_s16, %s3421_s17  }
 0x3d6   :  { %3406 = dma.done.wait [#allocation4], 2048  }
 0x3d7   :  { %3407 = vsyncadd [#allocation4], 4294965248 }
 0x3d8   :  { %2800 = vsyncpa [#allocation3], 1 }
 0x3d9   :  { %2801 = vsyncpa [#allocation6], 1 }
 0x3da   :  { %2802 = vsyncpa [#allocation9], 1 }
 0x3db   :  { %2803 = vsyncpa [#allocation4], 1 }

</bundles_post_ra>
